<compile_context>
chip_gen: v6e
topology: v6e:2x2x1
jax: 0.10.0
libtpu: 0.0.40
codegen_flags: <defaults>
</compile_context>

<pallas_src>
import jax
import jax.numpy as jnp
from jax import lax
from jax.experimental import pallas as pl
from jax.experimental.pallas import tpu as pltpu

EPS = 1e-5


def _round_up8(v):
    return ((v + 7) // 8) * 8


# ---------------------------------------------------------------------------
# fused kernel: one batch element per grid step
# ---------------------------------------------------------------------------
def _relnet_kernel(x_ref, y_ref, pos_ref, aff_in_ref, aff_mid_ref,
                   w_x_ref, w_y_ref, w2_ref, out_ref):
    C, N = x_ref.shape[1], x_ref.shape[2]
    D = y_ref.shape[1]
    K = w2_ref.shape[0]
    s_in = aff_in_ref.shape[0] // 4   # stride of packed [g_img, b_img, g_txt, b_txt]
    s_md = aff_mid_ref.shape[0] // 4  # stride of packed [g_mid, b_mid, b2, b1]

    def inorm_relu(v, g, b):  # InstanceNorm (biased var, eps=1e-5) + affine + ReLU
        mu = jnp.mean(v, axis=1, keepdims=True)
        var = jnp.mean((v - mu) ** 2, axis=1, keepdims=True)
        return jnp.maximum((v - mu) * lax.rsqrt(var + EPS) * g + b, 0.0)

    # positional embedding + input norms; channel-major (C,N)/(D,N), N on lanes
    xn = inorm_relu(x_ref[0] + pos_ref[...],
                    aff_in_ref[0:C, :], aff_in_ref[s_in:s_in + C, :])
    yn = inorm_relu(y_ref[0],
                    aff_in_ref[2 * s_in:2 * s_in + D, :],
                    aff_in_ref[3 * s_in:3 * s_in + D, :])

    # pairwise conv1x1 decomposed: z[k,i,j] = a[k,j] + b[k,i]
    # w_x = [W1_xi ; W1_xj] (2K,C): one MXU pass produces both x-dependent parts
    ab = jnp.dot(w_x_ref[...], xn, preferred_element_type=jnp.float32)       # (2K, N)
    a_t = ab[0:K]                                                            # j-term
    b_t = (ab[K:2 * K]
           + jnp.dot(w_y_ref[...], yn, preferred_element_type=jnp.float32)
           + aff_mid_ref[3 * s_md:3 * s_md + K, :])                          # i-term (+ b1)

    # InstanceNorm over the (i,j) map, analytically: z = a + b is separable
    g_mid = aff_mid_ref[0:K, :]
    beta_mid = aff_mid_ref[s_md:s_md + K, :]
    b2 = aff_mid_ref[2 * s_md:2 * s_md + K, :]
    mu_a = jnp.mean(a_t, axis=1, keepdims=True)
    mu_b = jnp.mean(b_t, axis=1, keepdims=True)
    var = (jnp.mean((a_t - mu_a) ** 2, axis=1, keepdims=True)
           + jnp.mean((b_t - mu_b) ** 2, axis=1, keepdims=True))
    scale = g_mid * lax.rsqrt(var + EPS)
    shift = beta_mid - (mu_a + mu_b) * scale
    a_s = a_t * scale              # (K, N) j-term with normalization folded in
    b_s = b_t * scale + shift      # (K, N) i-term with normalization folded in

    # s[k,i] = sum_j relu(a_s[k,j] + b_s[k,i]);  out = W2 @ s + N*b2
    # one lane-dense (N_j, N_i) slab per output channel k; W2 folded in as
    # rank-1 updates so `s` never has to be assembled/concatenated.
    a_cols = jnp.transpose(a_s)    # (N, K): j on sublanes (single small XLU transpose)
    w2 = w2_ref[...]
    acc = jnp.broadcast_to(b2 * float(N), (K, N))                 # N * b2 bias term
    for k in range(K):             # static unroll over out_dim (small)
        zk = a_cols[:, k:k + 1] + b_s[k:k + 1, :]                 # (N_j, N_i)
        sk = jnp.sum(jnp.maximum(zk, 0.0), axis=0, keepdims=True)  # (1, N_i) = s[k,:]
        acc = acc + w2[:, k:k + 1] * sk                            # += W2[:,k] (x) s[k,:]
    out_ref[0] = acc.astype(out_ref.dtype)


# ---------------------------------------------------------------------------
# wrapper: whole module forward = one pallas_call + free reshapes
# ---------------------------------------------------------------------------
def relational_network(x_nchw, y_nchw, params):
    B, C, H, W = x_nchw.shape
    D = y_nchw.shape[1]
    N = H * W
    K = params["w2"].shape[0]
    pos_cn = params["pos_cn"]
    assert N <= pos_cn.shape[1], "h*w exceeds positional-embedding maxlen"

    x = x_nchw.reshape(B, C, N)          # contiguous -> free reshape
    y = y_nchw.reshape(B, D, N)
    pos = pos_cn[:, :N]                  # (C, N)
    aff_in, aff_mid = params["aff_in"], params["aff_mid"]
    w_x, w_y, w2 = params["w_x"], params["w_y"], params["w2"]

    out = pl.pallas_call(
        _relnet_kernel,
        out_shape=jax.ShapeDtypeStruct((B, K, N), jnp.float32),   # lane-dense output slab
        grid=(B,),
        in_specs=[
            pl.BlockSpec((1, C, N), lambda b: (b, 0, 0)),
            pl.BlockSpec((1, D, N), lambda b: (b, 0, 0)),
            pl.BlockSpec((C, N), lambda b: (0, 0)),
            pl.BlockSpec(aff_in.shape, lambda b: (0, 0)),
            pl.BlockSpec(aff_mid.shape, lambda b: (0, 0)),
            pl.BlockSpec(w_x.shape, lambda b: (0, 0)),
            pl.BlockSpec(w_y.shape, lambda b: (0, 0)),
            pl.BlockSpec(w2.shape, lambda b: (0, 0)),
        ],
        out_specs=pl.BlockSpec((1, K, N), lambda b: (b, 0, 0)),
        compiler_params=pltpu.CompilerParams(dimension_semantics=("parallel",)),
        # TODO(synk): for much larger N/K, tile the i axis over a second grid dim
        # and set vmem_limit_bytes per generation (v7x: 64 MiB physical VMEM);
        # also cast matmul operands to bf16 once channel widths reach 128+.
    )(x, y, pos, aff_in, aff_mid, w_x, w_y, w2)
    return out.reshape(B, K, H, W)       # contiguous -> matches torch .view(b,-1,h,w)


# ---------------------------------------------------------------------------
# deterministic parameter init (shapes from the module __init__)
# ---------------------------------------------------------------------------
def init_params(key, image_dim, text_dim, out_dim, maxlen=256):
    C, D, K = image_dim, text_dim, out_dim
    k0, k1, k2, k3, k4 = jax.random.split(key, 5)
    pos_emb = 0.02 * jax.random.normal(k0, (maxlen, C), jnp.float32)   # nn.Embedding weight
    w1 = 0.05 * jax.random.normal(k1, (K, 2 * C + D), jnp.float32)     # conv1x1(2C+D -> K)
    b1 = 0.05 * jax.random.normal(k2, (K,), jnp.float32)
    w2 = 0.05 * jax.random.normal(k3, (K, K), jnp.float32)             # conv1x1(K -> K)
    b2 = 0.05 * jax.random.normal(k4, (K,), jnp.float32)
    g_img, b_img = jnp.ones((C,), jnp.float32), jnp.zeros((C,), jnp.float32)
    g_txt, b_txt = jnp.ones((D,), jnp.float32), jnp.zeros((D,), jnp.float32)
    g_mid, b_mid = jnp.ones((K,), jnp.float32), jnp.zeros((K,), jnp.float32)

    # packed column params with 8-row-aligned segments (aligned sublane slices)
    s_in = _round_up8(max(C, D))
    aff_in = jnp.zeros((4 * s_in, 1), jnp.float32)
    aff_in = (aff_in.at[0:C, 0].set(g_img)
              .at[s_in:s_in + C, 0].set(b_img)
              .at[2 * s_in:2 * s_in + D, 0].set(g_txt)
              .at[3 * s_in:3 * s_in + D, 0].set(b_txt))
    s_md = _round_up8(K)
    aff_mid = jnp.zeros((4 * s_md, 1), jnp.float32)
    aff_mid = (aff_mid.at[0:K, 0].set(g_mid)
               .at[s_md:s_md + K, 0].set(b_mid)
               .at[2 * s_md:2 * s_md + K, 0].set(b2)
               .at[3 * s_md:3 * s_md + K, 0].set(b1))

    # first conv1x1 split by which token index its input channels depend on:
    #   f = [x_i (<- x[:,j]) | x_j (<- x[:,i]) | y (<- y[:,i])]
    w_x = jnp.concatenate([w1[:, :C], w1[:, C:2 * C]], axis=0)  # (2K, C): top -> a(j), bottom -> b(i)
    w_y = w1[:, 2 * C:]                                         # (K, D):  -> b(i)
    return dict(pos_cn=jnp.transpose(pos_emb),                  # (C, maxlen)
                aff_in=aff_in, aff_mid=aff_mid, w_x=w_x, w_y=w_y, w2=w2,
                raw=dict(pos_emb=pos_emb, w1=w1, b1=b1, w2=w2, b2=b2))


# ---------------------------------------------------------------------------
# pure-JAX reference (materialized pairwise features) for a runtime sanity check
# ---------------------------------------------------------------------------
def relational_network_ref(x, y, params):
    B, C, H, W = x.shape
    D = y.shape[1]
    N = H * W
    raw = params["raw"]
    K = raw["w2"].shape[0]
    pos = jnp.transpose(raw["pos_emb"][:N]).reshape(1, C, H, W)
    x = x + pos

    def inorm_relu(v):
        mu = v.mean(axis=(2, 3), keepdims=True)
        var = ((v - mu) ** 2).mean(axis=(2, 3), keepdims=True)
        return jnp.maximum((v - mu) / jnp.sqrt(var + EPS), 0.0)

    xn = inorm_relu(x).reshape(B, C, N)
    yn = inorm_relu(y).reshape(B, D, N)
    x_i = jnp.broadcast_to(xn[:, :, None, :], (B, C, N, N))   # x_i[b,c,i,j] = xn[b,c,j]
    x_j = jnp.broadcast_to(xn[:, :, :, None], (B, C, N, N))   # x_j[b,c,i,j] = xn[b,c,i]
    y_i = jnp.broadcast_to(yn[:, :, :, None], (B, D, N, N))
    f = jnp.concatenate([x_i, x_j, y_i], axis=1)               # (B, 2C+D, N, N)
    hp = lax.Precision.HIGHEST
    z = jnp.einsum("oc,bcij->boij", raw["w1"], f, precision=hp) + raw["b1"][None, :, None, None]
    mu = z.mean(axis=(2, 3), keepdims=True)
    var = ((z - mu) ** 2).mean(axis=(2, 3), keepdims=True)
    zn = jnp.maximum((z - mu) / jnp.sqrt(var + EPS), 0.0)
    o = jnp.einsum("ok,bkij->boij", raw["w2"], zn, precision=hp) + raw["b2"][None, :, None, None]
    return o.sum(axis=3).reshape(B, K, H, W)


# ---------------------------------------------------------------------------
if __name__ == "__main__":
    key = jax.random.PRNGKey(0)
    B, C, D, H, W = 2, 4, 6, 16, 16         # N = H*W = 256 relational tokens
    out_dim = 8
    kx, ky, kp = jax.random.split(key, 3)
    x = jax.random.normal(kx, (B, C, H, W), jnp.float32)
    y = jax.random.normal(ky, (B, D, H, W), jnp.float32)
    params = init_params(kp, C, D, out_dim, maxlen=H * W)

    fwd = jax.jit(relational_network)
    out = jax.block_until_ready(fwd(x, y, params))
    assert out.shape == (B, out_dim, H, W)

    ref = relational_network_ref(x, y, params)
    max_err = float(jnp.max(jnp.abs(out - ref)))
    assert jnp.allclose(out, ref, atol=5e-3, rtol=5e-3), f"max abs err = {max_err}"
    print("KERNEL_OK")
</pallas_src>

<mosaic_0001>
module attributes {stable_mosaic.version = 11 : i64} {
  func.func @_relnet_kernel(%arg0: i32, %arg1: memref<1x4x256xf32, #tpu.memory_space<vmem>>, %arg2: memref<1x6x256xf32, #tpu.memory_space<vmem>>, %arg3: memref<4x256xf32, #tpu.memory_space<vmem>>, %arg4: memref<32x1xf32, #tpu.memory_space<vmem>>, %arg5: memref<32x1xf32, #tpu.memory_space<vmem>>, %arg6: memref<16x4xf32, #tpu.memory_space<vmem>>, %arg7: memref<8x6xf32, #tpu.memory_space<vmem>>, %arg8: memref<8x8xf32, #tpu.memory_space<vmem>>, %arg9: memref<1x8x256xf32, #tpu.memory_space<vmem>>) attributes {dimension_semantics = [#tpu.dimension_semantics<parallel>], iteration_bounds = array<i64: 2>, scalar_prefetch = 0 : i64, scratch_operands = 0 : i64, tpu.core_type = #tpu.core_type<tc>, window_params = [{transform_indices = @transform_0, window_bounds = array<i64: 1, 4, 256>}, {transform_indices = @transform_1, window_bounds = array<i64: 1, 6, 256>}, {pipeline_mode = #tpu.pipeline_mode<synchronous>, transform_indices = @transform_2, window_bounds = array<i64: 4, 256>}, {pipeline_mode = #tpu.pipeline_mode<synchronous>, transform_indices = @transform_3, window_bounds = array<i64: 32, 1>}, {pipeline_mode = #tpu.pipeline_mode<synchronous>, transform_indices = @transform_4, window_bounds = array<i64: 32, 1>}, {pipeline_mode = #tpu.pipeline_mode<synchronous>, transform_indices = @transform_5, window_bounds = array<i64: 16, 4>}, {pipeline_mode = #tpu.pipeline_mode<synchronous>, transform_indices = @transform_6, window_bounds = array<i64: 8, 6>}, {pipeline_mode = #tpu.pipeline_mode<synchronous>, transform_indices = @transform_7, window_bounds = array<i64: 8, 8>}, {transform_indices = @transform_8, window_bounds = array<i64: 1, 8, 256>}]} {
    %c0 = arith.constant 0 : index
    %c0_0 = arith.constant 0 : index
    %c0_1 = arith.constant 0 : index
    %0 = vector.load %arg1[%c0, %c0_0, %c0_1] : memref<1x4x256xf32, #tpu.memory_space<vmem>>, vector<1x4x256xf32>
    %1 = vector.shape_cast %0 : vector<1x4x256xf32> to vector<4x256xf32>
    %c0_2 = arith.constant 0 : index
    %c0_3 = arith.constant 0 : index
    %2 = vector.load %arg3[%c0_2, %c0_3] : memref<4x256xf32, #tpu.memory_space<vmem>>, vector<4x256xf32>
    %3 = arith.addf %1, %2 : vector<4x256xf32>
    %c0_4 = arith.constant 0 : index
    %c0_5 = arith.constant 0 : index
    %4 = vector.load %arg4[%c0_4, %c0_5] : memref<32x1xf32, #tpu.memory_space<vmem>>, vector<4x1xf32>
    %c8 = arith.constant 8 : index
    %c0_6 = arith.constant 0 : index
    %5 = vector.load %arg4[%c8, %c0_6] : memref<32x1xf32, #tpu.memory_space<vmem>>, vector<4x1xf32>
    %cst = arith.constant dense<0.000000e+00> : vector<4xf32>
    %6 = vector.multi_reduction <add>, %3, %cst [1] : vector<4x256xf32> to vector<4xf32>
    %7 = vector.shape_cast %6 : vector<4xf32> to vector<4x1xf32>
    %cst_7 = arith.constant 2.560000e+02 : f32
    %8 = vector.broadcast %cst_7 : f32 to vector<4x1xf32>
    %9 = arith.divf %7, %8 : vector<4x1xf32>
    %10 = vector.broadcast %9 : vector<4x1xf32> to vector<4x256xf32>
    %11 = arith.subf %3, %10 : vector<4x256xf32>
    %12 = arith.mulf %11, %11 : vector<4x256xf32>
    %cst_8 = arith.constant dense<0.000000e+00> : vector<4xf32>
    %13 = vector.multi_reduction <add>, %12, %cst_8 [1] : vector<4x256xf32> to vector<4xf32>
    %14 = vector.shape_cast %13 : vector<4xf32> to vector<4x1xf32>
    %cst_9 = arith.constant 2.560000e+02 : f32
    %15 = vector.broadcast %cst_9 : f32 to vector<4x1xf32>
    %16 = arith.divf %14, %15 : vector<4x1xf32>
    %17 = vector.broadcast %9 : vector<4x1xf32> to vector<4x256xf32>
    %18 = arith.subf %3, %17 : vector<4x256xf32>
    %cst_10 = arith.constant 9.99999974E-6 : f32
    %19 = vector.broadcast %cst_10 : f32 to vector<4x1xf32>
    %20 = arith.addf %16, %19 : vector<4x1xf32>
    %21 = math.rsqrt %20 : vector<4x1xf32>
    %22 = vector.broadcast %21 : vector<4x1xf32> to vector<4x256xf32>
    %23 = arith.mulf %18, %22 : vector<4x256xf32>
    %24 = vector.broadcast %4 : vector<4x1xf32> to vector<4x256xf32>
    %25 = arith.mulf %23, %24 : vector<4x256xf32>
    %26 = vector.broadcast %5 : vector<4x1xf32> to vector<4x256xf32>
    %27 = arith.addf %25, %26 : vector<4x256xf32>
    %cst_11 = arith.constant 0.000000e+00 : f32
    %28 = vector.broadcast %cst_11 : f32 to vector<4x256xf32>
    %29 = arith.maximumf %27, %28 : vector<4x256xf32>
    %c0_12 = arith.constant 0 : index
    %c0_13 = arith.constant 0 : index
    %c0_14 = arith.constant 0 : index
    %30 = vector.load %arg2[%c0_12, %c0_13, %c0_14] : memref<1x6x256xf32, #tpu.memory_space<vmem>>, vector<1x6x256xf32>
    %31 = vector.shape_cast %30 : vector<1x6x256xf32> to vector<6x256xf32>
    %c16 = arith.constant 16 : index
    %c0_15 = arith.constant 0 : index
    %32 = vector.load %arg4[%c16, %c0_15] : memref<32x1xf32, #tpu.memory_space<vmem>>, vector<6x1xf32>
    %c24 = arith.constant 24 : index
    %c0_16 = arith.constant 0 : index
    %33 = vector.load %arg4[%c24, %c0_16] : memref<32x1xf32, #tpu.memory_space<vmem>>, vector<6x1xf32>
    %cst_17 = arith.constant dense<0.000000e+00> : vector<6xf32>
    %34 = vector.multi_reduction <add>, %31, %cst_17 [1] : vector<6x256xf32> to vector<6xf32>
    %35 = vector.shape_cast %34 : vector<6xf32> to vector<6x1xf32>
    %cst_18 = arith.constant 2.560000e+02 : f32
    %36 = vector.broadcast %cst_18 : f32 to vector<6x1xf32>
    %37 = arith.divf %35, %36 : vector<6x1xf32>
    %38 = vector.broadcast %37 : vector<6x1xf32> to vector<6x256xf32>
    %39 = arith.subf %31, %38 : vector<6x256xf32>
    %40 = arith.mulf %39, %39 : vector<6x256xf32>
    %cst_19 = arith.constant dense<0.000000e+00> : vector<6xf32>
    %41 = vector.multi_reduction <add>, %40, %cst_19 [1] : vector<6x256xf32> to vector<6xf32>
    %42 = vector.shape_cast %41 : vector<6xf32> to vector<6x1xf32>
    %cst_20 = arith.constant 2.560000e+02 : f32
    %43 = vector.broadcast %cst_20 : f32 to vector<6x1xf32>
    %44 = arith.divf %42, %43 : vector<6x1xf32>
    %45 = vector.broadcast %37 : vector<6x1xf32> to vector<6x256xf32>
    %46 = arith.subf %31, %45 : vector<6x256xf32>
    %cst_21 = arith.constant 9.99999974E-6 : f32
    %47 = vector.broadcast %cst_21 : f32 to vector<6x1xf32>
    %48 = arith.addf %44, %47 : vector<6x1xf32>
    %49 = math.rsqrt %48 : vector<6x1xf32>
    %50 = vector.broadcast %49 : vector<6x1xf32> to vector<6x256xf32>
    %51 = arith.mulf %46, %50 : vector<6x256xf32>
    %52 = vector.broadcast %32 : vector<6x1xf32> to vector<6x256xf32>
    %53 = arith.mulf %51, %52 : vector<6x256xf32>
    %54 = vector.broadcast %33 : vector<6x1xf32> to vector<6x256xf32>
    %55 = arith.addf %53, %54 : vector<6x256xf32>
    %cst_22 = arith.constant 0.000000e+00 : f32
    %56 = vector.broadcast %cst_22 : f32 to vector<6x256xf32>
    %57 = arith.maximumf %55, %56 : vector<6x256xf32>
    %c0_23 = arith.constant 0 : index
    %c0_24 = arith.constant 0 : index
    %58 = vector.load %arg6[%c0_23, %c0_24] : memref<16x4xf32, #tpu.memory_space<vmem>>, vector<16x4xf32>
    %cst_25 = arith.constant dense<0.000000e+00> : vector<16x256xf32>
    %59 = tpu.matmul %58, %29, %cst_25 {dimension_numbers = #tpu.dot_dimension_numbers<[1], [0], [0], [1], [0, 0, 1, 1], [], []>} : vector<16x4xf32>, vector<4x256xf32>, vector<16x256xf32> -> vector<16x256xf32>
    %60 = vector.extract_strided_slice %59 {offsets = [0, 0], sizes = [8, 256], strides = [1, 1]} : vector<16x256xf32> to vector<8x256xf32>
    %61 = vector.extract_strided_slice %59 {offsets = [8, 0], sizes = [8, 256], strides = [1, 1]} : vector<16x256xf32> to vector<8x256xf32>
    %c0_26 = arith.constant 0 : index
    %c0_27 = arith.constant 0 : index
    %62 = vector.load %arg7[%c0_26, %c0_27] : memref<8x6xf32, #tpu.memory_space<vmem>>, vector<8x6xf32>
    %cst_28 = arith.constant dense<0.000000e+00> : vector<8x256xf32>
    %63 = tpu.matmul %62, %57, %cst_28 {dimension_numbers = #tpu.dot_dimension_numbers<[1], [0], [0], [1], [0, 0, 1, 1], [], []>} : vector<8x6xf32>, vector<6x256xf32>, vector<8x256xf32> -> vector<8x256xf32>
    %64 = arith.addf %61, %63 : vector<8x256xf32>
    %c24_29 = arith.constant 24 : index
    %c0_30 = arith.constant 0 : index
    %65 = vector.load %arg5[%c24_29, %c0_30] : memref<32x1xf32, #tpu.memory_space<vmem>>, vector<8x1xf32>
    %66 = vector.broadcast %65 : vector<8x1xf32> to vector<8x256xf32>
    %67 = arith.addf %64, %66 : vector<8x256xf32>
    %c0_31 = arith.constant 0 : index
    %c0_32 = arith.constant 0 : index
    %68 = vector.load %arg5[%c0_31, %c0_32] : memref<32x1xf32, #tpu.memory_space<vmem>>, vector<8x1xf32>
    %c8_33 = arith.constant 8 : index
    %c0_34 = arith.constant 0 : index
    %69 = vector.load %arg5[%c8_33, %c0_34] : memref<32x1xf32, #tpu.memory_space<vmem>>, vector<8x1xf32>
    %c16_35 = arith.constant 16 : index
    %c0_36 = arith.constant 0 : index
    %70 = vector.load %arg5[%c16_35, %c0_36] : memref<32x1xf32, #tpu.memory_space<vmem>>, vector<8x1xf32>
    %cst_37 = arith.constant dense<0.000000e+00> : vector<8xf32>
    %71 = vector.multi_reduction <add>, %60, %cst_37 [1] : vector<8x256xf32> to vector<8xf32>
    %72 = vector.shape_cast %71 : vector<8xf32> to vector<8x1xf32>
    %cst_38 = arith.constant 2.560000e+02 : f32
    %73 = vector.broadcast %cst_38 : f32 to vector<8x1xf32>
    %74 = arith.divf %72, %73 : vector<8x1xf32>
    %cst_39 = arith.constant dense<0.000000e+00> : vector<8xf32>
    %75 = vector.multi_reduction <add>, %67, %cst_39 [1] : vector<8x256xf32> to vector<8xf32>
    %76 = vector.shape_cast %75 : vector<8xf32> to vector<8x1xf32>
    %cst_40 = arith.constant 2.560000e+02 : f32
    %77 = vector.broadcast %cst_40 : f32 to vector<8x1xf32>
    %78 = arith.divf %76, %77 : vector<8x1xf32>
    %79 = vector.broadcast %74 : vector<8x1xf32> to vector<8x256xf32>
    %80 = arith.subf %60, %79 : vector<8x256xf32>
    %81 = arith.mulf %80, %80 : vector<8x256xf32>
    %cst_41 = arith.constant dense<0.000000e+00> : vector<8xf32>
    %82 = vector.multi_reduction <add>, %81, %cst_41 [1] : vector<8x256xf32> to vector<8xf32>
    %83 = vector.shape_cast %82 : vector<8xf32> to vector<8x1xf32>
    %cst_42 = arith.constant 2.560000e+02 : f32
    %84 = vector.broadcast %cst_42 : f32 to vector<8x1xf32>
    %85 = arith.divf %83, %84 : vector<8x1xf32>
    %86 = vector.broadcast %78 : vector<8x1xf32> to vector<8x256xf32>
    %87 = arith.subf %67, %86 : vector<8x256xf32>
    %88 = arith.mulf %87, %87 : vector<8x256xf32>
    %cst_43 = arith.constant dense<0.000000e+00> : vector<8xf32>
    %89 = vector.multi_reduction <add>, %88, %cst_43 [1] : vector<8x256xf32> to vector<8xf32>
    %90 = vector.shape_cast %89 : vector<8xf32> to vector<8x1xf32>
    %cst_44 = arith.constant 2.560000e+02 : f32
    %91 = vector.broadcast %cst_44 : f32 to vector<8x1xf32>
    %92 = arith.divf %90, %91 : vector<8x1xf32>
    %93 = arith.addf %85, %92 : vector<8x1xf32>
    %cst_45 = arith.constant 9.99999974E-6 : f32
    %94 = vector.broadcast %cst_45 : f32 to vector<8x1xf32>
    %95 = arith.addf %93, %94 : vector<8x1xf32>
    %96 = math.rsqrt %95 : vector<8x1xf32>
    %97 = arith.mulf %68, %96 : vector<8x1xf32>
    %98 = arith.addf %74, %78 : vector<8x1xf32>
    %99 = arith.mulf %98, %97 : vector<8x1xf32>
    %100 = arith.subf %69, %99 : vector<8x1xf32>
    %101 = vector.broadcast %97 : vector<8x1xf32> to vector<8x256xf32>
    %102 = arith.mulf %60, %101 : vector<8x256xf32>
    %103 = vector.broadcast %97 : vector<8x1xf32> to vector<8x256xf32>
    %104 = arith.mulf %67, %103 : vector<8x256xf32>
    %105 = vector.broadcast %100 : vector<8x1xf32> to vector<8x256xf32>
    %106 = arith.addf %104, %105 : vector<8x256xf32>
    %107 = tpu.transpose %102, [1, 0] : vector<8x256xf32> -> vector<256x8xf32>
    %c0_46 = arith.constant 0 : index
    %c0_47 = arith.constant 0 : index
    %108 = vector.load %arg8[%c0_46, %c0_47] : memref<8x8xf32, #tpu.memory_space<vmem>>, vector<8x8xf32>
    %cst_48 = arith.constant 2.560000e+02 : f32
    %109 = vector.broadcast %cst_48 : f32 to vector<8x1xf32>
    %110 = arith.mulf %70, %109 : vector<8x1xf32>
    %111 = vector.shape_cast %110 : vector<8x1xf32> to vector<8x1xf32>
    %112 = vector.broadcast %111 : vector<8x1xf32> to vector<8x256xf32>
    %113 = vector.extract_strided_slice %107 {offsets = [0, 0], sizes = [256, 1], strides = [1, 1]} : vector<256x8xf32> to vector<256x1xf32>
    %114 = vector.extract_strided_slice %106 {offsets = [0, 0], sizes = [1, 256], strides = [1, 1]} : vector<8x256xf32> to vector<1x256xf32>
    %115 = vector.broadcast %113 : vector<256x1xf32> to vector<256x256xf32>
    %116 = vector.broadcast %114 : vector<1x256xf32> to vector<256x256xf32>
    %117 = arith.addf %115, %116 : vector<256x256xf32>
    %cst_49 = arith.constant 0.000000e+00 : f32
    %118 = vector.broadcast %cst_49 : f32 to vector<256x256xf32>
    %119 = arith.maximumf %117, %118 : vector<256x256xf32>
    %cst_50 = arith.constant dense<0.000000e+00> : vector<256xf32>
    %120 = vector.multi_reduction <add>, %119, %cst_50 [0] : vector<256x256xf32> to vector<256xf32>
    %121 = vector.shape_cast %120 : vector<256xf32> to vector<1x256xf32>
    %122 = vector.extract_strided_slice %108 {offsets = [0, 0], sizes = [8, 1], strides = [1, 1]} : vector<8x8xf32> to vector<8x1xf32>
    %123 = vector.broadcast %122 : vector<8x1xf32> to vector<8x256xf32>
    %124 = vector.broadcast %121 : vector<1x256xf32> to vector<8x256xf32>
    %125 = arith.mulf %123, %124 : vector<8x256xf32>
    %126 = arith.addf %112, %125 : vector<8x256xf32>
    %127 = vector.extract_strided_slice %107 {offsets = [0, 1], sizes = [256, 1], strides = [1, 1]} : vector<256x8xf32> to vector<256x1xf32>
    %128 = vector.extract_strided_slice %106 {offsets = [1, 0], sizes = [1, 256], strides = [1, 1]} : vector<8x256xf32> to vector<1x256xf32>
    %129 = vector.broadcast %127 : vector<256x1xf32> to vector<256x256xf32>
    %130 = vector.broadcast %128 : vector<1x256xf32> to vector<256x256xf32>
    %131 = arith.addf %129, %130 : vector<256x256xf32>
    %cst_51 = arith.constant 0.000000e+00 : f32
    %132 = vector.broadcast %cst_51 : f32 to vector<256x256xf32>
    %133 = arith.maximumf %131, %132 : vector<256x256xf32>
    %cst_52 = arith.constant dense<0.000000e+00> : vector<256xf32>
    %134 = vector.multi_reduction <add>, %133, %cst_52 [0] : vector<256x256xf32> to vector<256xf32>
    %135 = vector.shape_cast %134 : vector<256xf32> to vector<1x256xf32>
    %136 = vector.extract_strided_slice %108 {offsets = [0, 1], sizes = [8, 1], strides = [1, 1]} : vector<8x8xf32> to vector<8x1xf32>
    %137 = vector.broadcast %136 : vector<8x1xf32> to vector<8x256xf32>
    %138 = vector.broadcast %135 : vector<1x256xf32> to vector<8x256xf32>
    %139 = arith.mulf %137, %138 : vector<8x256xf32>
    %140 = arith.addf %126, %139 : vector<8x256xf32>
    %141 = vector.extract_strided_slice %107 {offsets = [0, 2], sizes = [256, 1], strides = [1, 1]} : vector<256x8xf32> to vector<256x1xf32>
    %142 = vector.extract_strided_slice %106 {offsets = [2, 0], sizes = [1, 256], strides = [1, 1]} : vector<8x256xf32> to vector<1x256xf32>
    %143 = vector.broadcast %141 : vector<256x1xf32> to vector<256x256xf32>
    %144 = vector.broadcast %142 : vector<1x256xf32> to vector<256x256xf32>
    %145 = arith.addf %143, %144 : vector<256x256xf32>
    %cst_53 = arith.constant 0.000000e+00 : f32
    %146 = vector.broadcast %cst_53 : f32 to vector<256x256xf32>
    %147 = arith.maximumf %145, %146 : vector<256x256xf32>
    %cst_54 = arith.constant dense<0.000000e+00> : vector<256xf32>
    %148 = vector.multi_reduction <add>, %147, %cst_54 [0] : vector<256x256xf32> to vector<256xf32>
    %149 = vector.shape_cast %148 : vector<256xf32> to vector<1x256xf32>
    %150 = vector.extract_strided_slice %108 {offsets = [0, 2], sizes = [8, 1], strides = [1, 1]} : vector<8x8xf32> to vector<8x1xf32>
    %151 = vector.broadcast %150 : vector<8x1xf32> to vector<8x256xf32>
    %152 = vector.broadcast %149 : vector<1x256xf32> to vector<8x256xf32>
    %153 = arith.mulf %151, %152 : vector<8x256xf32>
    %154 = arith.addf %140, %153 : vector<8x256xf32>
    %155 = vector.extract_strided_slice %107 {offsets = [0, 3], sizes = [256, 1], strides = [1, 1]} : vector<256x8xf32> to vector<256x1xf32>
    %156 = vector.extract_strided_slice %106 {offsets = [3, 0], sizes = [1, 256], strides = [1, 1]} : vector<8x256xf32> to vector<1x256xf32>
    %157 = vector.broadcast %155 : vector<256x1xf32> to vector<256x256xf32>
    %158 = vector.broadcast %156 : vector<1x256xf32> to vector<256x256xf32>
    %159 = arith.addf %157, %158 : vector<256x256xf32>
    %cst_55 = arith.constant 0.000000e+00 : f32
    %160 = vector.broadcast %cst_55 : f32 to vector<256x256xf32>
    %161 = arith.maximumf %159, %160 : vector<256x256xf32>
    %cst_56 = arith.constant dense<0.000000e+00> : vector<256xf32>
    %162 = vector.multi_reduction <add>, %161, %cst_56 [0] : vector<256x256xf32> to vector<256xf32>
    %163 = vector.shape_cast %162 : vector<256xf32> to vector<1x256xf32>
    %164 = vector.extract_strided_slice %108 {offsets = [0, 3], sizes = [8, 1], strides = [1, 1]} : vector<8x8xf32> to vector<8x1xf32>
    %165 = vector.broadcast %164 : vector<8x1xf32> to vector<8x256xf32>
    %166 = vector.broadcast %163 : vector<1x256xf32> to vector<8x256xf32>
    %167 = arith.mulf %165, %166 : vector<8x256xf32>
    %168 = arith.addf %154, %167 : vector<8x256xf32>
    %169 = vector.extract_strided_slice %107 {offsets = [0, 4], sizes = [256, 1], strides = [1, 1]} : vector<256x8xf32> to vector<256x1xf32>
    %170 = vector.extract_strided_slice %106 {offsets = [4, 0], sizes = [1, 256], strides = [1, 1]} : vector<8x256xf32> to vector<1x256xf32>
    %171 = vector.broadcast %169 : vector<256x1xf32> to vector<256x256xf32>
    %172 = vector.broadcast %170 : vector<1x256xf32> to vector<256x256xf32>
    %173 = arith.addf %171, %172 : vector<256x256xf32>
    %cst_57 = arith.constant 0.000000e+00 : f32
    %174 = vector.broadcast %cst_57 : f32 to vector<256x256xf32>
    %175 = arith.maximumf %173, %174 : vector<256x256xf32>
    %cst_58 = arith.constant dense<0.000000e+00> : vector<256xf32>
    %176 = vector.multi_reduction <add>, %175, %cst_58 [0] : vector<256x256xf32> to vector<256xf32>
    %177 = vector.shape_cast %176 : vector<256xf32> to vector<1x256xf32>
    %178 = vector.extract_strided_slice %108 {offsets = [0, 4], sizes = [8, 1], strides = [1, 1]} : vector<8x8xf32> to vector<8x1xf32>
    %179 = vector.broadcast %178 : vector<8x1xf32> to vector<8x256xf32>
    %180 = vector.broadcast %177 : vector<1x256xf32> to vector<8x256xf32>
    %181 = arith.mulf %179, %180 : vector<8x256xf32>
    %182 = arith.addf %168, %181 : vector<8x256xf32>
    %183 = vector.extract_strided_slice %107 {offsets = [0, 5], sizes = [256, 1], strides = [1, 1]} : vector<256x8xf32> to vector<256x1xf32>
    %184 = vector.extract_strided_slice %106 {offsets = [5, 0], sizes = [1, 256], strides = [1, 1]} : vector<8x256xf32> to vector<1x256xf32>
    %185 = vector.broadcast %183 : vector<256x1xf32> to vector<256x256xf32>
    %186 = vector.broadcast %184 : vector<1x256xf32> to vector<256x256xf32>
    %187 = arith.addf %185, %186 : vector<256x256xf32>
    %cst_59 = arith.constant 0.000000e+00 : f32
    %188 = vector.broadcast %cst_59 : f32 to vector<256x256xf32>
    %189 = arith.maximumf %187, %188 : vector<256x256xf32>
    %cst_60 = arith.constant dense<0.000000e+00> : vector<256xf32>
    %190 = vector.multi_reduction <add>, %189, %cst_60 [0] : vector<256x256xf32> to vector<256xf32>
    %191 = vector.shape_cast %190 : vector<256xf32> to vector<1x256xf32>
    %192 = vector.extract_strided_slice %108 {offsets = [0, 5], sizes = [8, 1], strides = [1, 1]} : vector<8x8xf32> to vector<8x1xf32>
    %193 = vector.broadcast %192 : vector<8x1xf32> to vector<8x256xf32>
    %194 = vector.broadcast %191 : vector<1x256xf32> to vector<8x256xf32>
    %195 = arith.mulf %193, %194 : vector<8x256xf32>
    %196 = arith.addf %182, %195 : vector<8x256xf32>
    %197 = vector.extract_strided_slice %107 {offsets = [0, 6], sizes = [256, 1], strides = [1, 1]} : vector<256x8xf32> to vector<256x1xf32>
    %198 = vector.extract_strided_slice %106 {offsets = [6, 0], sizes = [1, 256], strides = [1, 1]} : vector<8x256xf32> to vector<1x256xf32>
    %199 = vector.broadcast %197 : vector<256x1xf32> to vector<256x256xf32>
    %200 = vector.broadcast %198 : vector<1x256xf32> to vector<256x256xf32>
    %201 = arith.addf %199, %200 : vector<256x256xf32>
    %cst_61 = arith.constant 0.000000e+00 : f32
    %202 = vector.broadcast %cst_61 : f32 to vector<256x256xf32>
    %203 = arith.maximumf %201, %202 : vector<256x256xf32>
    %cst_62 = arith.constant dense<0.000000e+00> : vector<256xf32>
    %204 = vector.multi_reduction <add>, %203, %cst_62 [0] : vector<256x256xf32> to vector<256xf32>
    %205 = vector.shape_cast %204 : vector<256xf32> to vector<1x256xf32>
    %206 = vector.extract_strided_slice %108 {offsets = [0, 6], sizes = [8, 1], strides = [1, 1]} : vector<8x8xf32> to vector<8x1xf32>
    %207 = vector.broadcast %206 : vector<8x1xf32> to vector<8x256xf32>
    %208 = vector.broadcast %205 : vector<1x256xf32> to vector<8x256xf32>
    %209 = arith.mulf %207, %208 : vector<8x256xf32>
    %210 = arith.addf %196, %209 : vector<8x256xf32>
    %211 = vector.extract_strided_slice %107 {offsets = [0, 7], sizes = [256, 1], strides = [1, 1]} : vector<256x8xf32> to vector<256x1xf32>
    %212 = vector.extract_strided_slice %106 {offsets = [7, 0], sizes = [1, 256], strides = [1, 1]} : vector<8x256xf32> to vector<1x256xf32>
    %213 = vector.broadcast %211 : vector<256x1xf32> to vector<256x256xf32>
    %214 = vector.broadcast %212 : vector<1x256xf32> to vector<256x256xf32>
    %215 = arith.addf %213, %214 : vector<256x256xf32>
    %cst_63 = arith.constant 0.000000e+00 : f32
    %216 = vector.broadcast %cst_63 : f32 to vector<256x256xf32>
    %217 = arith.maximumf %215, %216 : vector<256x256xf32>
    %cst_64 = arith.constant dense<0.000000e+00> : vector<256xf32>
    %218 = vector.multi_reduction <add>, %217, %cst_64 [0] : vector<256x256xf32> to vector<256xf32>
    %219 = vector.shape_cast %218 : vector<256xf32> to vector<1x256xf32>
    %220 = vector.extract_strided_slice %108 {offsets = [0, 7], sizes = [8, 1], strides = [1, 1]} : vector<8x8xf32> to vector<8x1xf32>
    %221 = vector.broadcast %220 : vector<8x1xf32> to vector<8x256xf32>
    %222 = vector.broadcast %219 : vector<1x256xf32> to vector<8x256xf32>
    %223 = arith.mulf %221, %222 : vector<8x256xf32>
    %224 = arith.addf %210, %223 : vector<8x256xf32>
    %c0_65 = arith.constant 0 : index
    %c0_66 = arith.constant 0 : index
    %c0_67 = arith.constant 0 : index
    %225 = vector.load %arg9[%c0_65, %c0_66, %c0_67] : memref<1x8x256xf32, #tpu.memory_space<vmem>>, vector<1x8x256xf32>
    %226 = vector.shape_cast %225 : vector<1x8x256xf32> to vector<8x256xf32>
    %227 = vector.shape_cast %224 : vector<8x256xf32> to vector<1x8x256xf32>
    tpu.vector_store %arg9[%c0_65, %c0_66, %c0_67], %227 {strides = array<i32>} : memref<1x8x256xf32, #tpu.memory_space<vmem>>, vector<1x8x256xf32>,
    return
  }
  func.func @transform_0(%arg0: i32) -> (i32, i32, i32) {
    %c0_i32 = arith.constant 0 : i32
    %c0_i32_0 = arith.constant 0 : i32
    %c0_i32_1 = arith.constant 0 : i32
    return %arg0, %c0_i32, %c0_i32_0 : i32, i32, i32
  }
  func.func @transform_1(%arg0: i32) -> (i32, i32, i32) {
    %c0_i32 = arith.constant 0 : i32
    %c0_i32_0 = arith.constant 0 : i32
    %c0_i32_1 = arith.constant 0 : i32
    return %arg0, %c0_i32, %c0_i32_0 : i32, i32, i32
  }
  func.func @transform_2(%arg0: i32) -> (i32, i32) {
    %c0_i32 = arith.constant 0 : i32
    %c0_i32_0 = arith.constant 0 : i32
    %c0_i32_1 = arith.constant 0 : i32
    return %c0_i32, %c0_i32_0 : i32, i32
  }
  func.func @transform_3(%arg0: i32) -> (i32, i32) {
    %c0_i32 = arith.constant 0 : i32
    %c0_i32_0 = arith.constant 0 : i32
    %c0_i32_1 = arith.constant 0 : i32
    return %c0_i32, %c0_i32_0 : i32, i32
  }
  func.func @transform_4(%arg0: i32) -> (i32, i32) {
    %c0_i32 = arith.constant 0 : i32
    %c0_i32_0 = arith.constant 0 : i32
    %c0_i32_1 = arith.constant 0 : i32
    return %c0_i32, %c0_i32_0 : i32, i32
  }
  func.func @transform_5(%arg0: i32) -> (i32, i32) {
    %c0_i32 = arith.constant 0 : i32
    %c0_i32_0 = arith.constant 0 : i32
    %c0_i32_1 = arith.constant 0 : i32
    return %c0_i32, %c0_i32_0 : i32, i32
  }
  func.func @transform_6(%arg0: i32) -> (i32, i32) {
    %c0_i32 = arith.constant 0 : i32
    %c0_i32_0 = arith.constant 0 : i32
    %c0_i32_1 = arith.constant 0 : i32
    return %c0_i32, %c0_i32_0 : i32, i32
  }
  func.func @transform_7(%arg0: i32) -> (i32, i32) {
    %c0_i32 = arith.constant 0 : i32
    %c0_i32_0 = arith.constant 0 : i32
    %c0_i32_1 = arith.constant 0 : i32
    return %c0_i32, %c0_i32_0 : i32, i32
  }
  func.func @transform_8(%arg0: i32) -> (i32, i32, i32) {
    %c0_i32 = arith.constant 0 : i32
    %c0_i32_0 = arith.constant 0 : i32
    %c0_i32_1 = arith.constant 0 : i32
    return %arg0, %c0_i32, %c0_i32_0 : i32, i32, i32
  }
}

</mosaic_0001>

<bundles_post_ra>
// kernel: relational_network.1
= control target key start
LH: loop header
LB: loop body
LE: loop exit
PB: predicated region body
PF: predicated region fallthrough
CT: control target
= control target key end

     0   :  { %s3882_s27 = smov 0   ;;  %s7435_s0 = inlined_call_operand.vmem [shape: f32[2,4,256], index: 0, kind: input, shape index: {}]   ;;  %s7436_s1 = inlined_call_operand.vmem [shape: f32[2,6,256], index: 1, kind: input, shape index: {}]   ;;  %s7437_s2 = inlined_call_operand.vmem [shape: f32[4,256], index: 2, kind: input, shape index: {}]   ;;  %s7438_s3 = inlined_call_operand.vmem [shape: f32[32,1], index: 3, kind: input, shape index: {}]   ;;  %s7439_s4 = inlined_call_operand.vmem [shape: f32[32,1], index: 4, kind: input, shape index: {}]   ;;  %s7440_s5 = inlined_call_operand.vmem [shape: f32[16,4], index: 5, kind: input, shape index: {}]   ;;  %s7441_s6 = inlined_call_operand.vmem [shape: f32[8,6], index: 6, kind: input, shape index: {}]   ;;  %s7442_s7 = inlined_call_operand.vmem [shape: f32[8,8], index: 7, kind: input, shape index: {}]   ;;  %s7443_s8 = inlined_call_operand.vmem [shape: f32[2,8,256], index: 8, kind: output, shape index: {}]  }
   0x1 LB: > { %s3617_s28 = sadd.s32 4294967295, %s3825_s27   ;;  %p3621_p0 = scmp.ge.s32.totalorder %s3825_s27, 1  ;;  %s3825_s27 = sphi %s3882_s27, %s18_s27  }
   0x2   : > { %p272_p1 = scmp.lt.s32.totalorder %s3825_s27, 3 }
   0x4   : > { %p273_p2 = pnand %p3621_p0, %p272_p1 }
   0x6   : > { %276 = sbr.rel (%p273_p2) target bundleno = 1942 (0x796), region = 52 }
   0xb   : > { %p311_p3 = scmp.lt.s32.totalorder %s3617_s28, 1  ;;  %v7444_v0 = vmov 0   ;;  %v329_v1 = vld [vmem:[%s7438_s3] sm:$0xf]  ;;  %v330_v2 = vld [vmem:[%s7438_s3 + $0x8] sm:$0xf]  ;;  %v346_v28 = vlaneseq }
   0xc   : > { %3658 = vset.pattern.permute.xlu1 %v7444_v0  ;;  %3659 = vset.pattern.permute.xlu0 %v7444_v0  ;;  %vm405_vm0 = vcmask 1045504   ;;  %v327_v3 = vld [vmem:[%s7437_s2] sm:$0xff]  ;;  %vm334_vm1 = vcmask 1043456   ;;  %v404_v9 = vld [vmem:[%s7438_s3 + $0x18] sm:$0x3f]  ;;  %v7450_v17 = vmov 1  }
   0xd   : > { %s8872_s28 = smov (!%p311_p3, %s3617_s28), 1  ;;  %376 = vperm.xlu1 %3658, %v329_v1   ;;  %v740_v14 = vld [vmem:[%s7442_s7] sm:$0xff]  ;;  %v7456_v18 = vmov 2   ;;  %v7462_v19 = vmov 3   ;;  %v7454_v20 = vmov 4   ;;  %v7452_v22 = vmov 5  }
   0xe   : > { %s3638_s11 = sshll.u32 %s8872_s28, 4  ;;  %s3637_s12 = sshll.u32 %s8872_s28, 3  ;;  %v403_v21 = vld [vmem:[%s7438_s3 + $0x10] sm:$0x3f]  ;;  %v618_v23 = vld [vmem:[%s7439_s4 + $0x18] sm:$0xff]  ;;  %v3938_v31 = vshrl.u32 %v346_v28, 7 }
   0xf   : > { %s320_s15 = scalar_lea.vmem %s7436_s1, %s3638_s11  ;;  %s315_s20 = scalar_lea.vmem %s7435_s0, %s3637_s12  ;;  %v628_v24 = vld [vmem:[%s7439_s4 + $0x10] sm:$0xff]  ;;  %v3833_v26 = vmov 839922192   ;;  %v3834_v50 = vmov 0.0   ;;  %vm535_vm2 = vcmask 48128   ;;  %vm446_vm3 = vcmask 31744  }
  0x10   : > { %v401_v4 = vld [vmem:[%s320_s15] sm:$0x3f]  ;;  %v402_v5 = vld [vmem:[%s320_s15 + $0x8] sm:$0x3f]  ;;  %v741_v25 = vmul.f32 256.0, %v628_v24  ;;  %v344_v27 = vunpack.c.l.s4 %v3833_v26  ;;  %521 = vmatprep.mubr.f32.mxu0 %v3834_v50  ;;  %609 = vmatprep.mubr.f32.mxu1 %v3834_v50  ;;  %s325_s26 = scalar_lea.vmem %s7443_s8, %s3638_s11 }
  0x11   : > { %389 = vperm.xlu1 %3658, %v330_v2   ;;  %v406_v6 = vsel %vm405_vm0, %v401_v4, 0.0  ;;  %v407_v7 = vsel %vm405_vm0, %v402_v5, 0.0  ;;  %v326_v8 = vld [vmem:[%s315_s20] sm:$0xff] }
  0x12   : > { %v408_v10 = vadd.f32 %v407_v7, %v406_v6  ;;  %v328_v11 = vadd.f32 %v327_v3, %v326_v8  ;;  %v345_v30 = vunpack.c.0.s8 %v344_v27 }
  0x14   : > { %409 = vadd.xlane.f32.xlu0 %v408_v10  ;;  %v332_v12 = vcombine.high %v328_v11, %v328_v11  ;;  %v335_v13 = vsel %vm334_vm1, %v328_v11, 0.0  ;;  %v348_v35 = vsub.s32 %v345_v30, %v3938_v31  ;;  %v442_v30 = vld [vmem:[%s7440_s5] sm:$0xff] }
  0x15   : > { %435 = vperm.xlu1 %3658, %v404_v9  }
  0x16   : > { %v336_v15 = vsel %vm334_vm1, %v332_v12, 0.0 }
  0x17   : > { %v337_v16 = vadd.f32 %v336_v15, %v335_v13  ;;  %v534_v15 = vld [vmem:[%s7441_s6] sm:$0xff] }
  0x19   : > { %1119 = vperm.xlu1 %3658, %v740_v14   ;;  %338 = vadd.xlane.f32.xlu0 %v337_v16 }
  0x1d   : > { %3660 = vset.pattern.permute.xlu1 %v7450_v17 }
  0x1e   : > { %1465 = vperm.xlu1 %3660, %v740_v14  }
  0x22   : > { %3661 = vset.pattern.permute.xlu1 %v7456_v18 }
  0x23   : > { %1811 = vperm.xlu1 %3661, %v740_v14  }
  0x27   : > { %3662 = vset.pattern.permute.xlu1 %v7462_v19 }
  0x28   : > { %2157 = vperm.xlu1 %3662, %v740_v14  }
  0x2c   : > { %3663 = vset.pattern.permute.xlu1 %v7454_v20 }
  0x2d   : > { %2503 = vperm.xlu1 %3663, %v740_v14  }
  0x2f   : > { %428 = vperm.xlu0 %3659, %v403_v21  }
  0x31   : > { %3664 = vset.pattern.permute.xlu1 %v7452_v22 }
  0x32   : > { %2849 = vperm.xlu1 %3664, %v740_v14  }
  0x33   : > { %621 = vperm.xlu0 %3659, %v618_v23  }
  0x36   : > { %3665 = vset.pattern.permute.xlu1 %v7444_v0 }
  0x37   : > { %744 = vperm.xlu0 %3659, %v741_v25  }
  0x88   : > { %v377_v51 = vpop.permute.xlu1 %376 }
  0x89   : > { %v384_v23 = vrot.slane %v377_v51, %v348_v35 }
  0x8c   : > { %v390_v52 = vpop.permute.xlu1 %389 }
  0x8d   : > { %v397_v25 = vrot.slane %v390_v52, %v348_v35 }
  0x90   : > { %v436_v53 = vpop.permute.xlu1 %435 }
  0x94   : > { %v3945_v54 = vpop.permute.xlu1 %1119 }
  0x95   : > { %7839 = vst [vmem:[#allocation2_spill] sm:$0xff] %v3945_v54 }
  0x99   : > { %v3947_v55 = vpop.permute.xlu1 %1465 }
  0x9a   : > { %7840 = vst [vmem:[#allocation3_spill] sm:$0xff] %v3947_v55 }
  0x9d   : > { %v410_v29 = vpop.xlane.xlu0 %409 }
  0x9e   : > { %v411_v32 = vmul.f32 0.00390625, %v410_v29  ;;  %v3949_v56 = vpop.permute.xlu1 %1811 }
  0x9f   : > { %7841 = vst [vmem:[#allocation4_spill] sm:$0xff] %v3949_v56  ;;  %v7865_v56 = vmov 5  }
  0xa0   : > { %v412_v33 = vsub.f32 %v401_v4, %v411_v32  ;;  %v413_v34 = vsub.f32 %v402_v5, %v411_v32  ;;  %v443_v32 = vld [vmem:[%s7440_s5 + $0x8] sm:$0xff] }
  0xa2   : > { %v339_v36 = vpop.xlane.xlu0 %338  ;;  %v414_v37 = vmul.f32 %v412_v33, %v412_v33  ;;  %v415_v38 = vmul.f32 %v413_v34, %v413_v34 }
  0xa3   : > { %v341_v39 = vmul.f32 0.00390625, %v339_v36  ;;  %v3951_v57 = vpop.permute.xlu1 %2157 }
  0xa4   : > { %v416_v40 = vsel %vm405_vm0, %v414_v37, 0.0  ;;  %v417_v41 = vsel %vm405_vm0, %v415_v38, 0.0  ;;  %7842 = vst [vmem:[#allocation5_spill] sm:$0xff] %v3951_v57 }
  0xa5   : > { %v349_v42 = vrot.slane %v341_v39, %v348_v35  ;;  %v418_v43 = vadd.f32 %v417_v41, %v416_v40 }
  0xa7   : > { %v351_v44 = vsub.f32 %v328_v11, %v349_v42  ;;  %419 = vadd.xlane.f32.xlu1 %v418_v43 }
  0xa8   : > { %v3953_v58 = vpop.permute.xlu1 %2503 }
  0xa9   : > { %v352_v45 = vmul.f32 %v351_v44, %v351_v44  ;;  %7843 = vst [vmem:[#allocation6_spill] sm:$0xff] %v3953_v58 }
  0xaa   : > { %v429_v59 = vpop.permute.xlu0 %428 }
  0xab   : > { %v354_v46 = vcombine.high %v352_v45, %v352_v45  ;;  %v356_v47 = vsel %vm334_vm1, %v352_v45, 0.0 }
  0xad   : > { %v357_v48 = vsel %vm334_vm1, %v354_v46, 0.0  ;;  %v3955_v60 = vpop.permute.xlu1 %2849 }
  0xae   : > { %v358_v49 = vadd.f32 %v357_v48, %v356_v47  ;;  %7844 = vst [vmem:[#allocation7_spill] sm:$0xff] %v3955_v60  ;;  %v622_v61 = vpop.permute.xlu0 %621 }
  0xb0   : > { %359 = vadd.xlane.f32.xlu0 %v358_v49 }
  0xb2   : > { %v3957_v2 = vpop.permute.xlu0 %744 }
  0xb3   : > { %7845 = vst [vmem:[#allocation8_spill] sm:$0xff] %v3957_v2 }
 0x130   : > { %v420_v62 = vpop.xlane.xlu1 %419 }
 0x131   : > { %v421_v63 = vmul.f32 0.00390625, %v420_v62 }
 0x133   : > { %v422_v1 = vadd.f32 1e-05, %v421_v63 }
 0x135   : > { %3812 = vrsqrt.f32 %v422_v1 }
 0x139   : > { %v360_v3 = vpop.xlane.xlu0 %359 }
 0x13a   : > { %v361_v4 = vmul.f32 0.00390625, %v360_v3 }
 0x13c   : > { %v362_v5 = vadd.f32 1e-05, %v361_v4 }
 0x13e   : > { %3814 = vrsqrt.f32 %v362_v5 }
 0x142   : > { %v3813_v6 = vpop.eup %3812 }
 0x143   : > { %v425_v7 = vmul.f32 %v3813_v6, %v413_v34  ;;  %v424_v8 = vmul.f32 %v3813_v6, %v412_v33 }
 0x145   : > { %v432_v9 = vmul.f32 %v429_v59, %v425_v7  ;;  %v431_v10 = vmul.f32 %v429_v59, %v424_v8 }
 0x147   : > { %v439_v11 = vadd.f32 %v436_v53, %v432_v9  ;;  %v438_v12 = vadd.f32 %v436_v53, %v431_v10  ;;  %v626_v10 = vld [vmem:[%s7439_s4] sm:$0xff] }
 0x149   : > { %v441_v13 = vmax.f32 %v439_v11, 0.0  ;;  %v440_v14 = vmax.f32 %v438_v12, 0.0 }
 0x14b   : > { %v3815_v16 = vpop.eup %3814  ;;  %3632 = vmatprep.subr.msk.mxu1 %vm405_vm0, %v441_v13  ;;  %v627_v13 = vld [vmem:[%s7439_s4 + $0x8] sm:$0xff] }
 0x14c   : > { %3633 = vmatpush1.msk.msra.mxu1 %vm405_vm0, %v440_v14  ;;  %v371_v21 = vrot.slane %v3815_v16, %v348_v35 }
 0x14d   : > { %3634 = vmatmul.mubr.msk.f32.vlgmr.msra.gmra.mxu1 %vm535_vm2, %v534_v15 }
 0x14e   : > { %v373_v24 = vmul.f32 %v371_v21, %v351_v44 }
 0x150   : > { %v386_v26 = vmul.f32 %v384_v23, %v373_v24 }
 0x152   : > { %v399_v27 = vadd.f32 %v397_v25, %v386_v26 }
 0x154   : > { %v400_v28 = vmax.f32 %v399_v27, 0.0  ;;  %v7448_v27 = vmov 6  }
 0x156   : > { %v445_v29 = vcombine.high %v400_v28, %v400_v28 }
 0x158   : > { %3628 = vmatprep.subr.msk.mxu0 %vm334_vm1, %v445_v29 }
 0x159   : > { %3629 = vmatpush1.msk.msra.mxu0 %vm334_vm1, %v400_v28  ;;  %v7446_v28 = vmov 7  }
 0x15a   : > { %3630 = vmatmul.mubr.msk.f32.vlgmr.msra.gmra.mxu0 %vm446_vm3, %v442_v30 }
 0x15b   : > { %527 = vmatprep.mubr.f32.mxu0 %v3834_v50 }
 0x15e   : > { %3631 = vmatmul.mubr.msk.f32.gmra.mxu0 %vm446_vm3, %v443_v32 }
 0x20d   : > { %v611_v35 = vpop.f32.mrf.mxu1 }
 0x20f   : > { %v613_v39 = vpop.f32.mrf.mxu1 }
 0x21a   : > { %v523_v33 = vpop.f32.mrf.mxu0 }
 0x21c   : > { %v525_v34 = vpop.f32.mrf.mxu0 }
 0x21d   : > { %v629_v36 = vadd.f32 %v525_v34, %v523_v33 }
 0x21e   : > { %v529_v37 = vpop.f32.mrf.mxu0 }
 0x21f   : > { %v616_v38 = vadd.f32 %v611_v35, %v529_v37  ;;  %630 = vadd.xlane.f32.xlu0 %v629_v36 }
 0x220   : > { %v531_v40 = vpop.f32.mrf.mxu0 }
 0x221   : > { %v617_v41 = vadd.f32 %v613_v39, %v531_v40  ;;  %v3972_v42 = vadd.f32 %v622_v61, %v616_v38 }
 0x223   : > { %v3974_v43 = vadd.f32 %v622_v61, %v617_v41 }
 0x225   : > { %v633_v44 = vadd.f32 %v3974_v43, %v3972_v42 }
 0x227   : > { %634 = vadd.xlane.f32.xlu1 %v633_v44 }
 0x2a8   : > { %v631_v45 = vpop.xlane.xlu0 %630 }
 0x2a9   : > { %v632_v46 = vmul.f32 0.00390625, %v631_v45 }
 0x2ab   : > { %v637_v47 = vsub.f32 %v523_v33, %v632_v46  ;;  %v638_v48 = vsub.f32 %v525_v34, %v632_v46 }
 0x2ad   : > { %v639_v49 = vmul.f32 %v637_v47, %v637_v47  ;;  %v640_v50 = vmul.f32 %v638_v48, %v638_v48 }
 0x2af   : > { %v641_v51 = vadd.f32 %v640_v50, %v639_v49 }
 0x2b0   : > { %v635_v52 = vpop.xlane.xlu1 %634 }
 0x2b1   : > { %v636_v53 = vmul.f32 0.00390625, %v635_v52  ;;  %642 = vadd.xlane.f32.xlu0 %v641_v51 }
 0x2b3   : > { %v657_v59 = vadd.f32 %v636_v53, %v632_v46  ;;  %v645_v62 = vsub.f32 %v3972_v42, %v636_v53  ;;  %v646_v61 = vsub.f32 %v3974_v43, %v636_v53 }
 0x2b5   : > { %v647_v63 = vmul.f32 %v645_v62, %v645_v62  ;;  %v648_v1 = vmul.f32 %v646_v61, %v646_v61 }
 0x2b7   : > { %v649_v3 = vadd.f32 %v648_v1, %v647_v63 }
 0x2b9   : > { %650 = vadd.xlane.f32.xlu0 %v649_v3 }
 0x33a   : > { %v643_v4 = vpop.xlane.xlu0 %642 }
 0x33b   : > { %v644_v6 = vmul.f32 0.00390625, %v643_v4 }
 0x342   : > { %v651_v5 = vpop.xlane.xlu0 %650 }
 0x343   : > { %v652_v7 = vmul.f32 0.00390625, %v651_v5 }
 0x345   : > { %v653_v8 = vadd.f32 %v652_v7, %v644_v6 }
 0x347   : > { %v654_v9 = vadd.f32 1e-05, %v653_v8 }
 0x349   : > { %3816 = vrsqrt.f32 %v654_v9 }
 0x356   : > { %v3817_v11 = vpop.eup %3816 }
 0x357   : > { %v656_v12 = vmul.f32 %v3817_v11, %v626_v10 }
 0x359   : > { %662 = vperm.xlu1 %3665, %v656_v12   ;;  %v658_v14 = vmul.f32 %v657_v59, %v656_v12 }
 0x35b   : > { %v659_v15 = vsub.f32 %v627_v13, %v658_v14 }
 0x35d   : > { %671 = vperm.xlu0 %3659, %v659_v15  }
 0x3d4   : > { %v3986_v16 = vpop.permute.xlu1 %662 }
 0x3d5   : > { %v665_v21 = vmul.f32 %v3986_v16, %v523_v33  ;;  %v666_v23 = vmul.f32 %v3986_v16, %v525_v34 }
 0x3d7   : > { %676 = vxpose.xlu1.b32.start.end [1/1] (short) %v665_v21, 128  ;;  %708 = vxpose.xlu0.b32.start.end [1/1] (short) %v666_v23, 128 }
 0x3d8   : > { %v3991_v24 = vpop.permute.xlu0 %671 }
 0x400   : > { %3666 = vset.pattern.permute.xlu0 %v7450_v17 }
 0x453   : > { %v692_v25 = vpop.trf.xlu1  ;;  %v724_v26 = vpop.trf.xlu0 }
 0x454   : > { %749 = vperm.xlu1 %3665, %v692_v25   ;;  %1127 = vperm.xlu0 %3666, %v692_v25  }
 0x457   : > { %v725_v29 = vpop.trf.xlu0  ;;  %v693_v30 = vpop.trf.xlu1 }
 0x458   : > { %3668 = vset.pattern.permute.xlu0 %v7456_v18  ;;  %829 = vperm.xlu1 %3665, %v724_v26  }
 0x459   : > { %1473 = vperm.xlu0 %3668, %v692_v25  }
 0x45b   : > { %v4008_v32 = vpop.trf.xlu1  ;;  %v4010_v33 = vpop.trf.xlu0 }
 0x45c   : > { %3667 = vset.pattern.permute.xlu1 %v7450_v17 }
 0x45d   : > { %3670 = vset.pattern.permute.xlu0 %v7462_v19  ;;  %1191 = vperm.xlu1 %3667, %v724_v26  }
 0x45e   : > { %1819 = vperm.xlu0 %3670, %v692_v25  }
 0x45f   : > { %v4014_v34 = vpop.trf.xlu1  ;;  %v4016_v35 = vpop.trf.xlu0 }
 0x460   : > { %7846 = vst [vmem:[#allocation9_spill] sm:$0xff] %v4016_v35 }
 0x461   : > { %3669 = vset.pattern.permute.xlu1 %v7456_v18 }
 0x462   : > { %3672 = vset.pattern.permute.xlu0 %v7454_v20  ;;  %1537 = vperm.xlu1 %3669, %v724_v26  }
 0x463   : > { %2165 = vperm.xlu0 %3672, %v692_v25   ;;  %v4020_v36 = vpop.trf.xlu1  ;;  %v4022_v37 = vpop.trf.xlu0 }
 0x464   : > { %7847 = vst [vmem:[#allocation10_spill] sm:$0xff] %v4022_v37 }
 0x466   : > { %3671 = vset.pattern.permute.xlu1 %v7462_v19 }
 0x467   : > { %3674 = vset.pattern.permute.xlu0 %v7452_v22  ;;  %1883 = vperm.xlu1 %3671, %v724_v26   ;;  %v4026_v38 = vpop.trf.xlu1  ;;  %v4028_v39 = vpop.trf.xlu0 }
 0x468   : > { %2511 = vperm.xlu0 %3674, %v692_v25   ;;  %7848 = vst [vmem:[#allocation11_spill] sm:$0xff] %v4028_v39 }
 0x46b   : > { %3673 = vset.pattern.permute.xlu1 %v7454_v20  ;;  %v4033_v40 = vpop.trf.xlu1  ;;  %v4035_v41 = vpop.trf.xlu0 }
 0x46c   : > { %3676 = vset.pattern.permute.xlu0 %v7448_v27  ;;  %2229 = vperm.xlu1 %3673, %v724_v26   ;;  %7849 = vst [vmem:[#allocation12_spill] sm:$0xff] %v4035_v41 }
 0x46d   : > { %2857 = vperm.xlu0 %3676, %v692_v25  }
 0x46f   : > { %v4040_v44 = vpop.trf.xlu1  ;;  %v4042_v45 = vpop.trf.xlu0 }
 0x470   : > { %3675 = vset.pattern.permute.xlu1 %v7452_v22  ;;  %7850 = vst [vmem:[#allocation13_spill] sm:$0xff] %v4042_v45 }
 0x471   : > { %3679 = vset.pattern.permute.xlu0 %v7446_v28  ;;  %2575 = vperm.xlu1 %3675, %v724_v26  }
 0x472   : > { %3267 = vperm.xlu0 %3679, %v724_v26  }
 0x473   : > { %v4046_v46 = vpop.trf.xlu1  ;;  %v4048_v47 = vpop.trf.xlu0 }
 0x474   : > { %7851 = vst [vmem:[#allocation14_spill] sm:$0xff] %v4048_v47 }
 0x475   : > { %3677 = vset.pattern.permute.xlu1 %v7448_v27 }
 0x476   : > { %3681 = vset.pattern.permute.xlu0 %v7444_v0  ;;  %2921 = vperm.xlu1 %3677, %v724_v26  }
 0x477   : > { %834 = vperm.xlu0 %3681, %v725_v29   ;;  %v4053_v48 = vpop.trf.xlu1  ;;  %v4055_v49 = vpop.trf.xlu0 }
 0x478   : > { %7852 = vst [vmem:[#allocation15_spill] sm:$0xff] %v4055_v49 }
 0x47a   : > { %3678 = vset.pattern.permute.xlu1 %v7446_v28 }
 0x47b   : > { %3203 = vperm.xlu1 %3678, %v692_v25   ;;  %3683 = vset.pattern.permute.xlu0 %v7450_v17  ;;  %v4061_v50 = vpop.trf.xlu1  ;;  %v4063_v51 = vpop.trf.xlu0 }
 0x47c   : > { %1195 = vperm.xlu0 %3683, %v725_v29   ;;  %7853 = vst [vmem:[#allocation16_spill] sm:$0xff] %v4063_v51 }
 0x47f   : > { %3680 = vset.pattern.permute.xlu1 %v7444_v0  ;;  %v4070_v52 = vpop.trf.xlu1  ;;  %v4072_v53 = vpop.trf.xlu0 }
 0x480   : > { %754 = vperm.xlu1 %3680, %v693_v30   ;;  %3685 = vset.pattern.permute.xlu0 %v7456_v18  ;;  %7854 = vst [vmem:[#allocation17_spill] sm:$0xff] %v4072_v53 }
 0x481   : > { %1541 = vperm.xlu0 %3685, %v725_v29  }
 0x483   : > { %v4077_v59 = vpop.trf.xlu1  ;;  %v4079_v62 = vpop.trf.xlu0 }
 0x484   : > { %3682 = vset.pattern.permute.xlu1 %v7450_v17  ;;  %7855 = vst [vmem:[#allocation18_spill] sm:$0xff] %v4077_v59  ;;  %7856 = vst [vmem:[#allocation19_spill] sm:$0xff] %v4079_v62  ;;  %v7875_v62 = vmov 7   ;;  %v7878_v59 = vmov 0  }
 0x485   : > { %1131 = vperm.xlu1 %3682, %v693_v30   ;;  %3687 = vset.pattern.permute.xlu0 %v7462_v19 }
 0x486   : > { %1887 = vperm.xlu0 %3687, %v725_v29  }
 0x487   : > { %v4085_v61 = vpop.trf.xlu1  ;;  %v4087_v63 = vpop.trf.xlu0 }
 0x488   : > { %7857 = vst [vmem:[#allocation20_spill] sm:$0xff] %v4085_v61  ;;  %7858 = vst [vmem:[#allocation21_spill] sm:$0xff] %v4087_v63 }
 0x489   : > { %3684 = vset.pattern.permute.xlu1 %v7456_v18 }
 0x48a   : > { %1477 = vperm.xlu1 %3684, %v693_v30   ;;  %3689 = vset.pattern.permute.xlu0 %v7454_v20 }
 0x48b   : > { %2233 = vperm.xlu0 %3689, %v725_v29   ;;  %v4094_v1 = vpop.trf.xlu1  ;;  %v4096_v3 = vpop.trf.xlu0 }
 0x48c   : > { %7859 = vst [vmem:[#allocation22_spill] sm:$0xff] %v4094_v1  ;;  %7860 = vst [vmem:[#allocation23_spill] sm:$0xff] %v4096_v3 }
 0x48e   : > { %3686 = vset.pattern.permute.xlu1 %v7462_v19 }
 0x48f   : > { %1823 = vperm.xlu1 %3686, %v693_v30   ;;  %3691 = vset.pattern.permute.xlu0 %v7452_v22  ;;  %v4101_v4 = vpop.trf.xlu1  ;;  %v4103_v5 = vpop.trf.xlu0 }
 0x490   : > { %2579 = vperm.xlu0 %3691, %v725_v29   ;;  %7861 = vst [vmem:[#allocation24_spill] sm:$0xff] %v4101_v4  ;;  %7862 = vst [vmem:[#allocation25_spill] sm:$0xff] %v4103_v5 }
 0x493   : > { %3688 = vset.pattern.permute.xlu1 %v7454_v20 }
 0x494   : > { %2169 = vperm.xlu1 %3688, %v693_v30   ;;  %3693 = vset.pattern.permute.xlu0 %v7448_v27 }
 0x495   : > { %2925 = vperm.xlu0 %3693, %v725_v29  }
 0x498   : > { %3690 = vset.pattern.permute.xlu1 %v7452_v22 }
 0x499   : > { %2515 = vperm.xlu1 %3690, %v693_v30   ;;  %3694 = vset.pattern.permute.xlu0 %v7446_v28 }
 0x49a   : > { %3207 = vperm.xlu0 %3694, %v693_v30  }
 0x49d   : > { %3692 = vset.pattern.permute.xlu1 %v7448_v27 }
 0x49e   : > { %2861 = vperm.xlu1 %3692, %v693_v30   ;;  %3275 = vperm.xlu0 %3694, %v4010_v33  }
 0x4a2   : > { %3695 = vset.pattern.permute.xlu1 %v7446_v28  ;;  %3704 = vset.pattern.permute.xlu0 %v7444_v0 }
 0x4a3   : > { %3271 = vperm.xlu1 %3695, %v725_v29   ;;  %764 = vperm.xlu0 %3704, %v4014_v34  }
 0x4a7   : > { %3696 = vset.pattern.permute.xlu1 %v7444_v0  ;;  %844 = vperm.xlu0 %3704, %v4016_v35  }
 0x4a8   : > { %759 = vperm.xlu1 %3696, %v4008_v32  }
 0x4ab   : > { %3705 = vset.pattern.permute.xlu0 %v7450_v17 }
 0x4ac   : > { %839 = vperm.xlu1 %3696, %v4010_v33   ;;  %1139 = vperm.xlu0 %3705, %v4014_v34  }
 0x4b0   : > { %3697 = vset.pattern.permute.xlu1 %v7450_v17  ;;  %1203 = vperm.xlu0 %3705, %v4016_v35  }
 0x4b1   : > { %1135 = vperm.xlu1 %3697, %v4008_v32  }
 0x4b4   : > { %3706 = vset.pattern.permute.xlu0 %v7456_v18 }
 0x4b5   : > { %1199 = vperm.xlu1 %3697, %v4010_v33   ;;  %1485 = vperm.xlu0 %3706, %v4014_v34  }
 0x4b9   : > { %3698 = vset.pattern.permute.xlu1 %v7456_v18  ;;  %1549 = vperm.xlu0 %3706, %v4016_v35  }
 0x4ba   : > { %1481 = vperm.xlu1 %3698, %v4008_v32  }
 0x4bd   : > { %3707 = vset.pattern.permute.xlu0 %v7462_v19 }
 0x4be   : > { %1545 = vperm.xlu1 %3698, %v4010_v33   ;;  %1831 = vperm.xlu0 %3707, %v4014_v34  }
 0x4c2   : > { %3699 = vset.pattern.permute.xlu1 %v7462_v19  ;;  %1895 = vperm.xlu0 %3707, %v4016_v35  }
 0x4c3   : > { %1827 = vperm.xlu1 %3699, %v4008_v32  }
 0x4c6   : > { %3708 = vset.pattern.permute.xlu0 %v7454_v20 }
 0x4c7   : > { %1891 = vperm.xlu1 %3699, %v4010_v33   ;;  %2177 = vperm.xlu0 %3708, %v4014_v34  }
 0x4cb   : > { %3700 = vset.pattern.permute.xlu1 %v7454_v20  ;;  %2241 = vperm.xlu0 %3708, %v4016_v35  }
 0x4cc   : > { %2173 = vperm.xlu1 %3700, %v4008_v32  }
 0x4cf   : > { %v4108_v6 = vpop.permute.xlu1 %749  ;;  %3709 = vset.pattern.permute.xlu0 %v7452_v22  ;;  %v4111_v7 = vpop.permute.xlu0 %1127 }
 0x4d0   : > { %2237 = vperm.xlu1 %3700, %v4010_v33   ;;  %2523 = vperm.xlu0 %3709, %v4014_v34  }
 0x4d3   : > { %v4115_v8 = vpop.permute.xlu1 %829 }
 0x4d4   : > { %3701 = vset.pattern.permute.xlu1 %v7452_v22  ;;  %v4118_v9 = vpop.permute.xlu0 %1473  ;;  %2587 = vperm.xlu0 %3709, %v4016_v35  }
 0x4d5   : > { %2519 = vperm.xlu1 %3701, %v4008_v32  }
 0x4d8   : > { %v4122_v10 = vpop.permute.xlu1 %1191  ;;  %3710 = vset.pattern.permute.xlu0 %v7448_v27 }
 0x4d9   : > { %2583 = vperm.xlu1 %3701, %v4010_v33   ;;  %v4126_v11 = vpop.permute.xlu0 %1819  ;;  %2869 = vperm.xlu0 %3710, %v4014_v34  }
 0x4dd   : > { %v4129_v12 = vpop.permute.xlu1 %1537  ;;  %3702 = vset.pattern.permute.xlu1 %v7448_v27  ;;  %2933 = vperm.xlu0 %3710, %v4016_v35   ;;  %v7870_v35 = vmov 6  }
 0x4de   : > { %2865 = vperm.xlu1 %3702, %v4008_v32   ;;  %v4134_v13 = vpop.permute.xlu0 %2165 }
 0x4e1   : > { %3718 = vset.pattern.permute.xlu0 %v7446_v28 }
 0x4e2   : > { %v4137_v14 = vpop.permute.xlu1 %1883  ;;  %2929 = vperm.xlu1 %3702, %v4010_v33   ;;  %3219 = vperm.xlu0 %3718, %v4020_v36  }
 0x4e3   : > { %v4141_v15 = vpop.permute.xlu0 %2511 }
 0x4e6   : > { %3703 = vset.pattern.permute.xlu1 %v7446_v28  ;;  %3719 = vset.pattern.permute.xlu0 %v7444_v0 }
 0x4e7   : > { %v4145_v21 = vpop.permute.xlu1 %2229  ;;  %3211 = vperm.xlu1 %3703, %v4008_v32   ;;  %774 = vperm.xlu0 %3719, %v4026_v38  }
 0x4e8   : > { %v4149_v23 = vpop.permute.xlu0 %2857 }
 0x4eb   : > { %3215 = vperm.xlu1 %3703, %v4014_v34   ;;  %854 = vperm.xlu0 %3719, %v4028_v39  }
 0x4ec   : > { %v4153_v25 = vpop.permute.xlu1 %2575 }
 0x4ed   : > { %v4155_v26 = vpop.permute.xlu0 %3267 }
 0x4ef   : > { %3711 = vset.pattern.permute.xlu1 %v7444_v0  ;;  %3720 = vset.pattern.permute.xlu0 %v7450_v17 }
 0x4f0   : > { %769 = vperm.xlu1 %3711, %v4020_v36   ;;  %1147 = vperm.xlu0 %3720, %v4026_v38  }
 0x4f1   : > { %v4161_v29 = vpop.permute.xlu1 %2921 }
 0x4f2   : > { %v4163_v30 = vpop.permute.xlu0 %834 }
 0x4f4   : > { %849 = vperm.xlu1 %3711, %v4022_v37   ;;  %1211 = vperm.xlu0 %3720, %v4028_v39  }
 0x4f6   : > { %v4167_v32 = vpop.permute.xlu1 %3203 }
 0x4f7   : > { %v4169_v33 = vpop.permute.xlu0 %1195 }
 0x4f8   : > { %3712 = vset.pattern.permute.xlu1 %v7450_v17  ;;  %3721 = vset.pattern.permute.xlu0 %v7456_v18 }
 0x4f9   : > { %1143 = vperm.xlu1 %3712, %v4020_v36   ;;  %1493 = vperm.xlu0 %3721, %v4026_v38  }
 0x4fb   : > { %v4175_v34 = vpop.permute.xlu1 %754 }
 0x4fc   : > { %v4177_v0 = vpop.permute.xlu0 %1541 }
 0x4fd   : > { %1207 = vperm.xlu1 %3712, %v4022_v37   ;;  %1557 = vperm.xlu0 %3721, %v4028_v39  }
 0x500   : > { %v4181_v28 = vpop.permute.xlu1 %1131 }
 0x501   : > { %3713 = vset.pattern.permute.xlu1 %v7456_v18  ;;  %v4184_v27 = vpop.permute.xlu0 %1887  ;;  %3722 = vset.pattern.permute.xlu0 %v7462_v19  ;;  %v7863_v18 = vmov 4  }
 0x502   : > { %1489 = vperm.xlu1 %3713, %v4020_v36   ;;  %1839 = vperm.xlu0 %3722, %v4026_v38  }
 0x505   : > { %v4189_v17 = vpop.permute.xlu1 %1477 }
 0x506   : > { %1553 = vperm.xlu1 %3713, %v4022_v37   ;;  %v4192_v22 = vpop.permute.xlu0 %2233  ;;  %1903 = vperm.xlu0 %3722, %v4028_v39  }
 0x50a   : > { %v4195_v20 = vpop.permute.xlu1 %1823  ;;  %3714 = vset.pattern.permute.xlu1 %v7462_v19  ;;  %3723 = vset.pattern.permute.xlu0 %v7863_v18 }
 0x50b   : > { %1835 = vperm.xlu1 %3714, %v4020_v36   ;;  %v4200_v60 = vpop.permute.xlu0 %2579  ;;  %2185 = vperm.xlu0 %3723, %v4026_v38  }
 0x50f   : > { %v4203_v58 = vpop.permute.xlu1 %2169  ;;  %1899 = vperm.xlu1 %3714, %v4022_v37   ;;  %2249 = vperm.xlu0 %3723, %v4028_v39  }
 0x510   : > { %v4207_v57 = vpop.permute.xlu0 %2925 }
 0x511   : > { %7864 = vst [vmem:[#allocation26_spill] sm:$0xff] %v4207_v57 }
 0x513   : > { %3715 = vset.pattern.permute.xlu1 %v7863_v18  ;;  %3724 = vset.pattern.permute.xlu0 %v7865_v56 }
 0x514   : > { %v4211_v19 = vpop.permute.xlu1 %2515  ;;  %2181 = vperm.xlu1 %3715, %v4020_v36   ;;  %2531 = vperm.xlu0 %3724, %v4026_v38  }
 0x515   : > { %7866 = vst [vmem:[#allocation27_spill] sm:$0xff] %v4211_v19  ;;  %v4215_v2 = vpop.permute.xlu0 %3207 }
 0x516   : > { %7867 = vst [vmem:[#allocation28_spill] sm:$0xff] %v4215_v2 }
 0x518   : > { %2245 = vperm.xlu1 %3715, %v4022_v37   ;;  %2595 = vperm.xlu0 %3724, %v4028_v39  }
 0x519   : > { %v4219_v55 = vpop.permute.xlu1 %2861  ;;  %v4221_v54 = vpop.permute.xlu0 %3275 }
 0x51a   : > { %7868 = vst [vmem:[#allocation29_spill] sm:$0xff] %v4219_v55  ;;  %7869 = vst [vmem:[#allocation30_spill] sm:$0xff] %v4221_v54 }
 0x51c   : > { %3716 = vset.pattern.permute.xlu1 %v7865_v56  ;;  %3725 = vset.pattern.permute.xlu0 %v7870_v35 }
 0x51d   : > { %2527 = vperm.xlu1 %3716, %v4020_v36   ;;  %2877 = vperm.xlu0 %3725, %v4026_v38  }
 0x51e   : > { %v4227_v3 = vpop.permute.xlu1 %3271  ;;  %v4229_v5 = vpop.permute.xlu0 %764 }
 0x51f   : > { %7871 = vst [vmem:[#allocation31_spill] sm:$0xff] %v4227_v3  ;;  %7872 = vst [vmem:[#allocation32_spill] sm:$0xff] %v4229_v5 }
 0x521   : > { %2591 = vperm.xlu1 %3716, %v4022_v37   ;;  %2941 = vperm.xlu0 %3725, %v4028_v39  }
 0x522   : > { %v4233_v4 = vpop.permute.xlu0 %844 }
 0x523   : > { %7873 = vst [vmem:[#allocation33_spill] sm:$0xff] %v4233_v4  ;;  %v4235_v1 = vpop.permute.xlu1 %759 }
 0x524   : > { %7874 = vst [vmem:[#allocation34_spill] sm:$0xff] %v4235_v1 }
 0x525   : > { %3717 = vset.pattern.permute.xlu1 %v7870_v35  ;;  %3734 = vset.pattern.permute.xlu0 %v7875_v62 }
 0x526   : > { %2873 = vperm.xlu1 %3717, %v4020_v36   ;;  %3227 = vperm.xlu0 %3734, %v4033_v40  }
 0x527   : > { %v4241_v63 = vpop.permute.xlu1 %839  ;;  %v4243_v61 = vpop.permute.xlu0 %1139 }
 0x528   : > { %7876 = vst [vmem:[#allocation35_spill] sm:$0xff] %v4241_v63  ;;  %7877 = vst [vmem:[#allocation36_spill] sm:$0xff] %v4243_v61 }
 0x52a   : > { %2937 = vperm.xlu1 %3717, %v4022_v37   ;;  %3735 = vset.pattern.permute.xlu0 %v7878_v59  ;;  %v7883_v37 = vmov 1  }
 0x52b   : > { %v4247_v39 = vpop.permute.xlu0 %1203  ;;  %784 = vperm.xlu0 %3735, %v4040_v44  }
 0x52c   : > { %7879 = vst [vmem:[#allocation37_spill] sm:$0xff] %v4247_v39  ;;  %v4250_v4 = vpop.permute.xlu1 %1135 }
 0x52d   : > { %7880 = vst [vmem:[#allocation38_spill] sm:$0xff] %v4250_v4 }
 0x52e   : > { %3726 = vset.pattern.permute.xlu1 %v7875_v62 }
 0x52f   : > { %3223 = vperm.xlu1 %3726, %v4026_v38   ;;  %864 = vperm.xlu0 %3735, %v4042_v45  }
 0x530   : > { %v4255_v36 = vpop.permute.xlu1 %1199  ;;  %v4257_v63 = vpop.permute.xlu0 %1485 }
 0x531   : > { %7881 = vst [vmem:[#allocation39_spill] sm:$0xff] %v4255_v36  ;;  %7882 = vst [vmem:[#allocation40_spill] sm:$0xff] %v4257_v63  ;;  %v7888_v63 = vmov 2  }
 0x533   : > { %3727 = vset.pattern.permute.xlu1 %v7878_v59  ;;  %3736 = vset.pattern.permute.xlu0 %v7883_v37 }
 0x534   : > { %779 = vperm.xlu1 %3727, %v4033_v40   ;;  %v4262_v39 = vpop.permute.xlu0 %1549  ;;  %1155 = vperm.xlu0 %3736, %v4040_v44  }
 0x535   : > { %7884 = vst [vmem:[#allocation41_spill] sm:$0xff] %v4262_v39  ;;  %v4265_v61 = vpop.permute.xlu1 %1481 }
 0x536   : > { %7885 = vst [vmem:[#allocation42_spill] sm:$0xff] %v4265_v61 }
 0x538   : > { %859 = vperm.xlu1 %3727, %v4035_v41   ;;  %1219 = vperm.xlu0 %3736, %v4042_v45  }
 0x539   : > { %v4269_v38 = vpop.permute.xlu1 %1545  ;;  %v4271_v36 = vpop.permute.xlu0 %1831 }
 0x53a   : > { %7886 = vst [vmem:[#allocation43_spill] sm:$0xff] %v4269_v38  ;;  %7887 = vst [vmem:[#allocation44_spill] sm:$0xff] %v4271_v36  ;;  %v7893_v36 = vmov 3  }
 0x53c   : > { %3728 = vset.pattern.permute.xlu1 %v7883_v37  ;;  %3737 = vset.pattern.permute.xlu0 %v7888_v63 }
 0x53d   : > { %1151 = vperm.xlu1 %3728, %v4033_v40   ;;  %v4276_v4 = vpop.permute.xlu0 %1895  ;;  %1501 = vperm.xlu0 %3737, %v4040_v44  }
 0x53e   : > { %7889 = vst [vmem:[#allocation45_spill] sm:$0xff] %v4276_v4  ;;  %v4279_v39 = vpop.permute.xlu1 %1827 }
 0x53f   : > { %7890 = vst [vmem:[#allocation46_spill] sm:$0xff] %v4279_v39 }
 0x541   : > { %1215 = vperm.xlu1 %3728, %v4035_v41   ;;  %1565 = vperm.xlu0 %3737, %v4042_v45  }
 0x542   : > { %v4283_v61 = vpop.permute.xlu1 %1891  ;;  %v4285_v38 = vpop.permute.xlu0 %2177 }
 0x543   : > { %7891 = vst [vmem:[#allocation47_spill] sm:$0xff] %v4283_v61  ;;  %7892 = vst [vmem:[#allocation48_spill] sm:$0xff] %v4285_v38 }
 0x545   : > { %3729 = vset.pattern.permute.xlu1 %v7888_v63  ;;  %3738 = vset.pattern.permute.xlu0 %v7893_v36 }
 0x546   : > { %1497 = vperm.xlu1 %3729, %v4033_v40   ;;  %v4290_v5 = vpop.permute.xlu0 %2241  ;;  %1847 = vperm.xlu0 %3738, %v4040_v44  }
 0x547   : > { %7894 = vst [vmem:[#allocation49_spill] sm:$0xff] %v4290_v5  ;;  %v4293_v4 = vpop.permute.xlu1 %2173 }
 0x548   : > { %7895 = vst [vmem:[#allocation50_spill] sm:$0xff] %v4293_v4 }
 0x54a   : > { %1561 = vperm.xlu1 %3729, %v4035_v41   ;;  %1911 = vperm.xlu0 %3738, %v4042_v45  }
 0x54b   : > { %v4297_v39 = vpop.permute.xlu1 %2237  ;;  %v4299_v61 = vpop.permute.xlu0 %2523 }
 0x54c   : > { %7896 = vst [vmem:[#allocation51_spill] sm:$0xff] %v4297_v39  ;;  %7897 = vst [vmem:[#allocation52_spill] sm:$0xff] %v4299_v61 }
 0x54e   : > { %3730 = vset.pattern.permute.xlu1 %v7893_v36  ;;  %3739 = vset.pattern.permute.xlu0 %v7863_v18 }
 0x54f   : > { %1843 = vperm.xlu1 %3730, %v4033_v40   ;;  %2193 = vperm.xlu0 %3739, %v4040_v44   ;;  %v4305_v5 = vpop.permute.xlu0 %2587 }
 0x550   : > { %7898 = vst [vmem:[#allocation53_spill] sm:$0xff] %v4305_v5  ;;  %v4307_v38 = vpop.permute.xlu1 %2519 }
 0x551   : > { %7899 = vst [vmem:[#allocation54_spill] sm:$0xff] %v4307_v38 }
 0x553   : > { %1907 = vperm.xlu1 %3730, %v4035_v41   ;;  %2257 = vperm.xlu0 %3739, %v4042_v45  }
 0x554   : > { %v4311_v4 = vpop.permute.xlu1 %2583  ;;  %v4313_v39 = vpop.permute.xlu0 %2869 }
 0x555   : > { %7900 = vst [vmem:[#allocation55_spill] sm:$0xff] %v4311_v4  ;;  %7901 = vst [vmem:[#allocation56_spill] sm:$0xff] %v4313_v39 }
 0x557   : > { %3731 = vset.pattern.permute.xlu1 %v7863_v18  ;;  %3740 = vset.pattern.permute.xlu0 %v7865_v56 }
 0x558   : > { %2189 = vperm.xlu1 %3731, %v4033_v40   ;;  %2539 = vperm.xlu0 %3740, %v4040_v44   ;;  %v4319_v61 = vpop.permute.xlu0 %2933 }
 0x559   : > { %7902 = vst [vmem:[#allocation57_spill] sm:$0xff] %v4319_v61  ;;  %v4321_v5 = vpop.permute.xlu1 %2865 }
 0x55a   : > { %7903 = vst [vmem:[#allocation58_spill] sm:$0xff] %v4321_v5 }
 0x55c   : > { %2253 = vperm.xlu1 %3731, %v4035_v41   ;;  %2603 = vperm.xlu0 %3740, %v4042_v45  }
 0x55d   : > { %v4325_v38 = vpop.permute.xlu1 %2929  ;;  %v4327_v4 = vpop.permute.xlu0 %3219 }
 0x55e   : > { %7904 = vst [vmem:[#allocation59_spill] sm:$0xff] %v4325_v38  ;;  %7905 = vst [vmem:[#allocation60_spill] sm:$0xff] %v4327_v4 }
 0x560   : > { %3732 = vset.pattern.permute.xlu1 %v7865_v56  ;;  %3741 = vset.pattern.permute.xlu0 %v7870_v35 }
 0x561   : > { %2535 = vperm.xlu1 %3732, %v4033_v40   ;;  %2885 = vperm.xlu0 %3741, %v4040_v44  }
 0x562   : > { %v4333_v39 = vpop.permute.xlu1 %3211  ;;  %v4335_v61 = vpop.permute.xlu0 %774 }
 0x563   : > { %7906 = vst [vmem:[#allocation61_spill] sm:$0xff] %v4333_v39  ;;  %7907 = vst [vmem:[#allocation62_spill] sm:$0xff] %v4335_v61 }
 0x565   : > { %2599 = vperm.xlu1 %3732, %v4035_v41   ;;  %2949 = vperm.xlu0 %3741, %v4042_v45  }
 0x566   : > { %v4339_v5 = vpop.permute.xlu1 %3215  ;;  %v4341_v38 = vpop.permute.xlu0 %854 }
 0x567   : > { %7908 = vst [vmem:[#allocation63_spill] sm:$0xff] %v4339_v5  ;;  %7909 = vst [vmem:[#allocation64_spill] sm:$0xff] %v4341_v38 }
 0x569   : > { %3733 = vset.pattern.permute.xlu1 %v7870_v35  ;;  %3750 = vset.pattern.permute.xlu0 %v7875_v62 }
 0x56a   : > { %2881 = vperm.xlu1 %3733, %v4033_v40   ;;  %3235 = vperm.xlu0 %3750, %v4046_v46  }
 0x56b   : > { %v4347_v4 = vpop.permute.xlu1 %769  ;;  %v4349_v39 = vpop.permute.xlu0 %1147 }
 0x56c   : > { %7910 = vst [vmem:[#allocation65_spill] sm:$0xff] %v4347_v4  ;;  %7911 = vst [vmem:[#allocation66_spill] sm:$0xff] %v4349_v39 }
 0x56e   : > { %2945 = vperm.xlu1 %3733, %v4035_v41   ;;  %3751 = vset.pattern.permute.xlu0 %v7878_v59 }
 0x56f   : > { %v4353_v45 = vpop.permute.xlu1 %849  ;;  %794 = vperm.xlu0 %3751, %v4053_v48   ;;  %v4356_v38 = vpop.permute.xlu0 %1211 }
 0x570   : > { %7912 = vst [vmem:[#allocation67_spill] sm:$0xff] %v4353_v45  ;;  %7913 = vst [vmem:[#allocation68_spill] sm:$0xff] %v4356_v38 }
 0x572   : > { %3742 = vset.pattern.permute.xlu1 %v7875_v62 }
 0x573   : > { %3231 = vperm.xlu1 %3742, %v4040_v44   ;;  %874 = vperm.xlu0 %3751, %v4055_v49  }
 0x574   : > { %v4361_v40 = vpop.permute.xlu1 %1143  ;;  %v4363_v61 = vpop.permute.xlu0 %1493 }
 0x575   : > { %7914 = vst [vmem:[#allocation69_spill] sm:$0xff] %v4361_v40  ;;  %7915 = vst [vmem:[#allocation70_spill] sm:$0xff] %v4363_v61 }
 0x577   : > { %3743 = vset.pattern.permute.xlu1 %v7878_v59  ;;  %3752 = vset.pattern.permute.xlu0 %v7883_v37 }
 0x578   : > { %v4367_v41 = vpop.permute.xlu1 %1207  ;;  %789 = vperm.xlu1 %3743, %v4046_v46   ;;  %1163 = vperm.xlu0 %3752, %v4053_v48   ;;  %v4371_v38 = vpop.permute.xlu0 %1557 }
 0x579   : > { %7916 = vst [vmem:[#allocation71_spill] sm:$0xff] %v4367_v41  ;;  %7917 = vst [vmem:[#allocation72_spill] sm:$0xff] %v4371_v38 }
 0x57c   : > { %869 = vperm.xlu1 %3743, %v4048_v47   ;;  %1227 = vperm.xlu0 %3752, %v4055_v49  }
 0x57d   : > { %v4375_v44 = vpop.permute.xlu1 %1489  ;;  %v4377_v45 = vpop.permute.xlu0 %1839 }
 0x57e   : > { %7918 = vst [vmem:[#allocation73_spill] sm:$0xff] %v4375_v44  ;;  %7919 = vst [vmem:[#allocation74_spill] sm:$0xff] %v4377_v45 }
 0x580   : > { %3744 = vset.pattern.permute.xlu1 %v7883_v37  ;;  %3753 = vset.pattern.permute.xlu0 %v7888_v63 }
 0x581   : > { %v4381_v61 = vpop.permute.xlu1 %1553  ;;  %1159 = vperm.xlu1 %3744, %v4046_v46   ;;  %1509 = vperm.xlu0 %3753, %v4053_v48   ;;  %v4385_v41 = vpop.permute.xlu0 %1903 }
 0x582   : > { %7920 = vst [vmem:[#allocation75_spill] sm:$0xff] %v4381_v61  ;;  %7921 = vst [vmem:[#allocation76_spill] sm:$0xff] %v4385_v41 }
 0x585   : > { %1223 = vperm.xlu1 %3744, %v4048_v47   ;;  %1573 = vperm.xlu0 %3753, %v4055_v49  }
 0x586   : > { %v4389_v38 = vpop.permute.xlu1 %1835  ;;  %v4391_v44 = vpop.permute.xlu0 %2185 }
 0x587   : > { %7922 = vst [vmem:[#allocation77_spill] sm:$0xff] %v4389_v38  ;;  %7923 = vst [vmem:[#allocation78_spill] sm:$0xff] %v4391_v44 }
 0x589   : > { %3745 = vset.pattern.permute.xlu1 %v7888_v63  ;;  %3754 = vset.pattern.permute.xlu0 %v7893_v36 }
 0x58a   : > { %v4395_v45 = vpop.permute.xlu1 %1899  ;;  %1505 = vperm.xlu1 %3745, %v4046_v46   ;;  %1855 = vperm.xlu0 %3754, %v4053_v48   ;;  %v4399_v61 = vpop.permute.xlu0 %2249 }
 0x58b   : > { %7924 = vst [vmem:[#allocation79_spill] sm:$0xff] %v4395_v45  ;;  %7925 = vst [vmem:[#allocation80_spill] sm:$0xff] %v4399_v61 }
 0x58e   : > { %1569 = vperm.xlu1 %3745, %v4048_v47   ;;  %1919 = vperm.xlu0 %3754, %v4055_v49  }
 0x58f   : > { %v4403_v41 = vpop.permute.xlu1 %2181  ;;  %v4405_v38 = vpop.permute.xlu0 %2531 }
 0x590   : > { %7926 = vst [vmem:[#allocation81_spill] sm:$0xff] %v4403_v41  ;;  %7927 = vst [vmem:[#allocation82_spill] sm:$0xff] %v4405_v38 }
 0x592   : > { %3746 = vset.pattern.permute.xlu1 %v7893_v36  ;;  %3755 = vset.pattern.permute.xlu0 %v7863_v18 }
 0x593   : > { %v4409_v44 = vpop.permute.xlu1 %2245  ;;  %1851 = vperm.xlu1 %3746, %v4046_v46   ;;  %2201 = vperm.xlu0 %3755, %v4053_v48   ;;  %v4413_v45 = vpop.permute.xlu0 %2595 }
 0x594   : > { %7928 = vst [vmem:[#allocation83_spill] sm:$0xff] %v4409_v44  ;;  %7929 = vst [vmem:[#allocation84_spill] sm:$0xff] %v4413_v45 }
 0x597   : > { %1915 = vperm.xlu1 %3746, %v4048_v47   ;;  %2265 = vperm.xlu0 %3755, %v4055_v49  }
 0x598   : > { %v4417_v61 = vpop.permute.xlu1 %2527  ;;  %v4419_v41 = vpop.permute.xlu0 %2877 }
 0x599   : > { %7930 = vst [vmem:[#allocation85_spill] sm:$0xff] %v4417_v61  ;;  %7931 = vst [vmem:[#allocation86_spill] sm:$0xff] %v4419_v41 }
 0x59b   : > { %3747 = vset.pattern.permute.xlu1 %v7863_v18  ;;  %3756 = vset.pattern.permute.xlu0 %v7865_v56 }
 0x59c   : > { %v4423_v38 = vpop.permute.xlu1 %2591  ;;  %2197 = vperm.xlu1 %3747, %v4046_v46   ;;  %2547 = vperm.xlu0 %3756, %v4053_v48   ;;  %v4427_v44 = vpop.permute.xlu0 %2941 }
 0x59d   : > { %7932 = vst [vmem:[#allocation87_spill] sm:$0xff] %v4423_v38  ;;  %7933 = vst [vmem:[#allocation88_spill] sm:$0xff] %v4427_v44 }
 0x5a0   : > { %2261 = vperm.xlu1 %3747, %v4048_v47   ;;  %2611 = vperm.xlu0 %3756, %v4055_v49  }
 0x5a1   : > { %v4431_v45 = vpop.permute.xlu1 %2873  ;;  %v4433_v61 = vpop.permute.xlu0 %3227 }
 0x5a2   : > { %7934 = vst [vmem:[#allocation89_spill] sm:$0xff] %v4431_v45  ;;  %7935 = vst [vmem:[#allocation90_spill] sm:$0xff] %v4433_v61  ;;  %v667_v61 = vmul.f32 %v3986_v16, %v3972_v42  ;;  %v1256_v42 = vsub.s32 1, %v3938_v31 }
 0x5a4   : > { %3748 = vset.pattern.permute.xlu1 %v7865_v56  ;;  %3757 = vset.pattern.permute.xlu0 %v7870_v35 }
 0x5a5   : > { %v4437_v41 = vpop.permute.xlu1 %2937  ;;  %2543 = vperm.xlu1 %3748, %v4046_v46   ;;  %2893 = vperm.xlu0 %3757, %v4053_v48  }
 0x5a6   : > { %7936 = vst [vmem:[#allocation91_spill] sm:$0xff] %v4437_v41  ;;  %v4441_v38 = vpop.permute.xlu0 %784  ;;  %v668_v41 = vmul.f32 %v3986_v16, %v3974_v43  ;;  %v1602_v43 = vsub.s32 2, %v3938_v31  ;;  %v1948_v16 = vsub.s32 3, %v3938_v31 }
 0x5a7   : > { %7937 = vst [vmem:[#allocation92_spill] sm:$0xff] %v4441_v38 }
 0x5a9   : > { %2607 = vperm.xlu1 %3748, %v4048_v47   ;;  %2957 = vperm.xlu0 %3757, %v4055_v49   ;;  %v909_v49 = vsub.s32 0, %v3938_v31 }
 0x5aa   : > { %v4445_v44 = vpop.permute.xlu1 %3223  ;;  %v4447_v45 = vpop.permute.xlu0 %864 }
 0x5ab   : > { %7938 = vst [vmem:[#allocation93_spill] sm:$0xff] %v4445_v44  ;;  %7939 = vst [vmem:[#allocation94_spill] sm:$0xff] %v4447_v45  ;;  %v674_v45 = vadd.f32 %v3991_v24, %v667_v61  ;;  %v675_v44 = vadd.f32 %v3991_v24, %v668_v41  ;;  %v2986_v24 = vsub.s32 6, %v3938_v31  ;;  %v3332_v41 = vsub.s32 7, %v3938_v31 }
 0x5ad   : > { %3749 = vset.pattern.permute.xlu1 %v7870_v35  ;;  %3766 = vset.pattern.permute.xlu0 %v7875_v62  ;;  %v4475_v61 = vrot.slane %v674_v45, %v909_v49  ;;  %v4482_v5 = vrot.slane %v674_v45, %v1256_v42  ;;  %v4486_v35 = vrot.slane %v674_v45, %v1602_v43 }
 0x5ae   : > { %2889 = vperm.xlu1 %3749, %v4046_v46   ;;  %3243 = vperm.xlu0 %3766, %v4061_v50   ;;  %v2294_v46 = vsub.s32 4, %v3938_v31  ;;  %v4488_v56 = vrot.slane %v675_v44, %v1602_v43  ;;  %v4492_v3 = vrot.slane %v675_v44, %v1948_v16  ;;  %v4529_v18 = vrot.slane %v675_v44, %v2986_v24 }
 0x5af   : > { %v4457_v38 = vpop.permute.xlu1 %779  ;;  %v4462_v40 = vpop.permute.xlu0 %1155  ;;  %7943 = vst [vmem:[#allocation98_spill] sm:$0xff] %v4475_v61  ;;  %7946 = vst [vmem:[#allocation101_spill] sm:$0xff] %v4482_v5  ;;  %v4524_v1 = vadd.f32 %v4475_v61, %v4115_v8  ;;  %v4545_v57 = vrot.slane %v674_v45, %v3332_v41  ;;  %v4547_v2 = vrot.slane %v675_v44, %v3332_v41 }
 0x5b0   : > { %7940 = vst [vmem:[#allocation95_spill] sm:$0xff] %v4457_v38  ;;  %7941 = vst [vmem:[#allocation96_spill] sm:$0xff] %v4462_v40  ;;  %v2640_v38 = vsub.s32 5, %v3938_v31  ;;  %v4477_v40 = vrot.slane %v675_v44, %v909_v49  ;;  %v4494_v31 = vrot.slane %v674_v45, %v2294_v46  ;;  %v4496_v49 = vrot.slane %v675_v44, %v2294_v46 }
 0x5b1   : > { %7953 = vst [vmem:[#allocation108_spill] sm:$0xff] %v4524_v1  ;;  %7955 = vst [vmem:[#allocation110_spill] sm:$0xff] %v4529_v18 }
 0x5b2   : > { %2953 = vperm.xlu1 %3749, %v4048_v47   ;;  %3767 = vset.pattern.permute.xlu0 %v7878_v59  ;;  %7944 = vst [vmem:[#allocation99_spill] sm:$0xff] %v4477_v40  ;;  %v4484_v47 = vrot.slane %v675_v44, %v1256_v42  ;;  %7948 = vst [vmem:[#allocation103_spill] sm:$0xff] %v4494_v31  ;;  %v4499_v54 = vrot.slane %v674_v45, %v2640_v38 }
 0x5b3   : > { %v4471_v39 = vpop.permute.xlu1 %859  ;;  %804 = vperm.xlu0 %3767, %v4070_v52   ;;  %v4480_v4 = vpop.permute.xlu0 %1219  ;;  %7949 = vst [vmem:[#allocation104_spill] sm:$0xff] %v4496_v49  ;;  %v4503_v42 = vadd.f32 %v4475_v61, %v4108_v6  ;;  %v4507_v43 = vadd.f32 %v4477_v40, %v4108_v6  ;;  %v4514_v46 = vrot.slane %v675_v44, %v2640_v38  ;;  %7958 = vst [vmem:[#allocation113_spill] sm:$0xff] %v4545_v57 }
 0x5b4   : > { %7942 = vst [vmem:[#allocation97_spill] sm:$0xff] %v4471_v39  ;;  %7945 = vst [vmem:[#allocation100_spill] sm:$0xff] %v4480_v4  ;;  %v4490_v39 = vrot.slane %v674_v45, %v1948_v16  ;;  %v4511_v16 = vadd.f32 %v4482_v5, %v4111_v7  ;;  %v4516_v4 = vrot.slane %v674_v45, %v2986_v24 }
 0x5b5   : > { %7947 = vst [vmem:[#allocation102_spill] sm:$0xff] %v4484_v47  ;;  %7950 = vst [vmem:[#allocation105_spill] sm:$0xff] %v4499_v54  ;;  %v4537_v38 = vadd.f32 %v4486_v35, %v4118_v9  ;;  %v4551_v24 = vadd.f32 %v4482_v5, %v4122_v10  ;;  %v4597_v19 = vadd.f32 %v4496_v49, %v4134_v13 }
 0x5b6   : > { %3758 = vset.pattern.permute.xlu1 %v7875_v62  ;;  %7951 = vst [vmem:[#allocation106_spill] sm:$0xff] %v4514_v46  ;;  %7952 = vst [vmem:[#allocation107_spill] sm:$0xff] %v4516_v4  ;;  %v4520_v62 = vadd.f32 %v4484_v47, %v4111_v7  ;;  %v4541_v7 = vadd.f32 %v4488_v56, %v4118_v9  ;;  %v4562_v45 = vadd.f32 %v4490_v39, %v4126_v11 }
 0x5b7   : > { %3239 = vperm.xlu1 %3758, %v4053_v48   ;;  %884 = vperm.xlu0 %3767, %v4072_v53   ;;  %v4533_v48 = vadd.f32 %v4477_v40, %v4115_v8  ;;  %7959 = vst [vmem:[#allocation114_spill] sm:$0xff] %v4547_v2  ;;  %7960 = vst [vmem:[#allocation115_spill] sm:$0xff] %v4551_v24  ;;  %v4555_v8 = vadd.f32 %v4484_v47, %v4122_v10 }
 0x5b8   : > { %v4527_v6 = vpop.permute.xlu1 %1151  ;;  %v4543_v55 = vpop.permute.xlu0 %1501  ;;  %v4569_v10 = vadd.f32 %v4492_v3, %v4126_v11  ;;  %v4584_v11 = vadd.f32 %v4488_v56, %v4129_v12  ;;  %7966 = vst [vmem:[#allocation121_spill] sm:$0xff] %v4597_v19  ;;  %v4606_v44 = vadd.f32 %v4492_v3, %v4137_v14  ;;  %v4620_v41 = vadd.f32 %v4494_v31, %v4145_v21 }
 0x5b9   : > { %7954 = vst [vmem:[#allocation109_spill] sm:$0xff] %v4527_v6  ;;  %7956 = vst [vmem:[#allocation111_spill] sm:$0xff] %v4533_v48  ;;  %v4573_v6 = vadd.f32 %v4486_v35, %v4129_v12  ;;  %v4602_v12 = vadd.f32 %v4490_v39, %v4137_v14  ;;  %v4626_v24 = vadd.f32 %v4496_v49, %v4145_v21 }
 0x5ba   : > { %7957 = vst [vmem:[#allocation112_spill] sm:$0xff] %v4543_v55  ;;  %7961 = vst [vmem:[#allocation116_spill] sm:$0xff] %v4555_v8  ;;  %v4630_v55 = vadd.f32 %v4516_v4, %v4149_v23  ;;  %v4643_v21 = vadd.f32 %v4499_v54, %v4153_v25  ;;  %v4674_v14 = vadd.f32 %v4529_v18, %v4161_v29 }
 0x5bb   : > { %3759 = vset.pattern.permute.xlu1 %v7878_v59  ;;  %7962 = vst [vmem:[#allocation117_spill] sm:$0xff] %v4573_v6  ;;  %3768 = vset.pattern.permute.xlu0 %v7883_v37  ;;  %7964 = vst [vmem:[#allocation119_spill] sm:$0xff] %v4584_v11  ;;  %v4593_v59 = vadd.f32 %v4494_v31, %v4134_v13  ;;  %v4616_v13 = vadd.f32 %v4514_v46, %v4141_v15 }
 0x5bc   : > { %v4576_v9 = vpop.permute.xlu1 %1215  ;;  %799 = vperm.xlu1 %3759, %v4061_v50   ;;  %1171 = vperm.xlu0 %3768, %v4070_v52   ;;  %v4587_v1 = vpop.permute.xlu0 %1565  ;;  %7967 = vst [vmem:[#allocation122_spill] sm:$0xff] %v4602_v12  ;;  %7968 = vst [vmem:[#allocation123_spill] sm:$0xff] %v4606_v44  ;;  %v4647_v11 = vadd.f32 %v4514_v46, %v4153_v25  ;;  %v4656_v6 = vadd.f32 %v4545_v57, %v4155_v26 }
 0x5bd   : > { %7963 = vst [vmem:[#allocation118_spill] sm:$0xff] %v4576_v9  ;;  %7965 = vst [vmem:[#allocation120_spill] sm:$0xff] %v4587_v1  ;;  %v4610_v9 = vadd.f32 %v4499_v54, %v4141_v15  ;;  %v4634_v15 = vadd.f32 %v4529_v18, %v4149_v23  ;;  %v4662_v25 = vadd.f32 %v4547_v2, %v4155_v26 }
 0x5be   : > { %7969 = vst [vmem:[#allocation124_spill] sm:$0xff] %v4620_v41  ;;  %7970 = vst [vmem:[#allocation125_spill] sm:$0xff] %v4626_v24  ;;  %v4684_v1 = vadd.f32 %v4475_v61, %v4163_v30  ;;  %v4696_v24 = vadd.f32 %v4545_v57, %v4167_v32  ;;  %v917_v41 = vadd.f32 %v4475_v61, %v4175_v34 }
 0x5bf   : > { %7972 = vst [vmem:[#allocation127_spill] sm:$0xff] %v4643_v21  ;;  %7973 = vst [vmem:[#allocation128_spill] sm:$0xff] %v4647_v11  ;;  %v918_v19 = vadd.f32 %v4477_v40, %v4175_v34  ;;  %v4706_v21 = vadd.f32 %v4547_v2, %v4167_v32  ;;  %v1264_v23 = vadd.f32 %v4482_v5, %v4181_v28 }
 0x5c0   : > { %879 = vperm.xlu1 %3759, %v4063_v51   ;;  %1235 = vperm.xlu0 %3768, %v4072_v53   ;;  %7975 = vst [vmem:[#allocation130_spill] sm:$0xff] %v4656_v6  ;;  %7976 = vst [vmem:[#allocation131_spill] sm:$0xff] %v4662_v25  ;;  %v4713_v44 = vadd.f32 %v4482_v5, %v4169_v33  ;;  %v4717_v34 = vadd.f32 %v4484_v47, %v4169_v33 }
 0x5c1   : > { %v4637_v8 = vpop.permute.xlu1 %1497  ;;  %v4649_v48 = vpop.permute.xlu0 %1847  ;;  %7978 = vst [vmem:[#allocation133_spill] sm:$0xff] %v4674_v14  ;;  %7980 = vst [vmem:[#allocation135_spill] sm:$0xff] %v4684_v1  ;;  %v1265_v11 = vadd.f32 %v4484_v47, %v4181_v28  ;;  %v4726_v6 = vadd.f32 %v4486_v35, %v4177_v0  ;;  %v4730_v25 = vadd.f32 %v4488_v56, %v4177_v0  ;;  %v981_v14 = vmax.f32 %v917_v41, 0.0 }
 0x5c2   : > { %7971 = vst [vmem:[#allocation126_spill] sm:$0xff] %v4637_v8  ;;  %7974 = vst [vmem:[#allocation129_spill] sm:$0xff] %v4649_v48  ;;  %v4666_v48 = vadd.f32 %v4516_v4, %v4161_v29  ;;  %v4688_v8 = vadd.f32 %v4477_v40, %v4163_v30  ;;  %v4738_v32 = vadd.f32 %v4490_v39, %v4184_v27 }
 0x5c3   : > { %7983 = vst [vmem:[#allocation138_spill] sm:$0xff] %v4713_v44  ;;  %7984 = vst [vmem:[#allocation139_spill] sm:$0xff] %v4717_v34  ;;  %v4745_v0 = vadd.f32 %v4492_v3, %v4184_v27  ;;  %v1610_v1 = vadd.f32 %v4486_v35, %v4189_v17  ;;  %v1329_v41 = vmax.f32 %v1265_v11, 0.0  ;;  %v4758_v27 = vadd.f32 %v4494_v31, %v4192_v22 }
 0x5c4   : > { %7977 = vst [vmem:[#allocation132_spill] sm:$0xff] %v4666_v48  ;;  %3760 = vset.pattern.permute.xlu1 %v7883_v37  ;;  %3769 = vset.pattern.permute.xlu0 %v7888_v63  ;;  %7981 = vst [vmem:[#allocation136_spill] sm:$0xff] %v4688_v8  ;;  %v982_v48 = vmax.f32 %v918_v19, 0.0  ;;  %v1328_v8 = vmax.f32 %v1264_v23, 0.0  ;;  %v7995_v23 = vmax.f32 %v4507_v43, 0.0  ;;  %v1957_v43 = vadd.f32 %v4492_v3, %v4195_v20 }
 0x5c5   : > { %v4677_v26 = vpop.permute.xlu1 %1561  ;;  %1167 = vperm.xlu1 %3760, %v4061_v50   ;;  %1517 = vperm.xlu0 %3769, %v4070_v52   ;;  %v4691_v29 = vpop.permute.xlu0 %1911  ;;  %7985 = vst [vmem:[#allocation140_spill] sm:$0xff] %v4726_v6  ;;  %7986 = vst [vmem:[#allocation141_spill] sm:$0xff] %v4730_v25  ;;  %v7997_v6 = vmax.f32 %v4511_v16, 0.0  ;;  %v4795_v28 = vadd.f32 %v4499_v54, %v4200_v60  ;;  %v4799_v16 = vadd.f32 %v4514_v46, %v4200_v60 }
 0x5c6   : > { %7979 = vst [vmem:[#allocation134_spill] sm:$0xff] %v4677_v26  ;;  %7982 = vst [vmem:[#allocation137_spill] sm:$0xff] %v4691_v29  ;;  %v1611_v29 = vadd.f32 %v4488_v56, %v4189_v17  ;;  %v4762_v26 = vadd.f32 %v4496_v49, %v4192_v22  ;;  %v7994_v17 = vmax.f32 %v4503_v42, 0.0  ;;  %v4774_v12 = vadd.f32 %v982_v48, %v7995_v23 }
 0x5c7   : > { %7988 = vst [vmem:[#allocation143_spill] sm:$0xff] %v4738_v32  ;;  %7990 = vst [vmem:[#allocation145_spill] sm:$0xff] %v4745_v0  ;;  %v1956_v22 = vadd.f32 %v4490_v39, %v4195_v20  ;;  %v4784_v34 = vadd.f32 %v1328_v8, %v7997_v6  ;;  %v7998_v48 = vmax.f32 %v4520_v62, 0.0  ;;  %v2302_v20 = vadd.f32 %v4494_v31, %v4203_v58 }
 0x5c8   : > { %7991 = vst [vmem:[#allocation146_spill] sm:$0xff] %v4758_v27  ;;  %7992 = vst [vmem:[#allocation147_spill] sm:$0xff] %v4762_v26  ;;  %v4770_v19 = vadd.f32 %v981_v14, %v7994_v17  ;;  %v1674_v14 = vmax.f32 %v1610_v1, 0.0  ;;  %v1675_v17 = vmax.f32 %v1611_v29, 0.0  ;;  %v2303_v62 = vadd.f32 %v4496_v49, %v4203_v58  ;;  %v8001_v29 = vld [vmem:[#allocation27_spill] sm:$0xff]  ;;  %v8005_v27 = vld [vmem:[#allocation26_spill] sm:$0xff] }
 0x5c9   : > { %1231 = vperm.xlu1 %3760, %v4063_v51   ;;  %1581 = vperm.xlu0 %3769, %v4072_v53   ;;  %v4791_v23 = vadd.f32 %v1329_v41, %v7998_v48  ;;  %7999 = vst [vmem:[#allocation150_spill] sm:$0xff] %v4795_v28  ;;  %8000 = vst [vmem:[#allocation151_spill] sm:$0xff] %v4799_v16  ;;  %v2020_v8 = vmax.f32 %v1956_v22, 0.0  ;;  %v2648_v41 = vadd.f32 %v4499_v54, %v8001_v29  ;;  %v8002_v48 = vld [vmem:[#allocation28_spill] sm:$0xff]  ;;  %v8012_v16 = vmov 4  }
 0x5ca   : > { %v4733_v33 = vpop.permute.xlu1 %1843  ;;  %v4740_v30 = vpop.permute.xlu0 %2193  ;;  %v2649_v60 = vadd.f32 %v4514_v46, %v8001_v29  ;;  %v3340_v6 = vadd.f32 %v4545_v57, %v8002_v48  ;;  %v8004_v42 = vmax.f32 %v4537_v38, 0.0  ;;  %v2021_v58 = vmax.f32 %v1957_v43, 0.0 }
 0x5cb   : > { %7987 = vst [vmem:[#allocation142_spill] sm:$0xff] %v4733_v33  ;;  %7989 = vst [vmem:[#allocation144_spill] sm:$0xff] %v4740_v30  ;;  %v4823_v22 = vadd.f32 %v4516_v4, %v8005_v27  ;;  %v3341_v0 = vadd.f32 %v4547_v2, %v8002_v48  ;;  %v8008_v32 = vmax.f32 %v4541_v7, 0.0  ;;  %v2367_v43 = vmax.f32 %v2303_v62, 0.0 }
 0x5cc   : > { %v4819_v26 = vadd.f32 %v1674_v14, %v8004_v42  ;;  %v4837_v42 = vadd.f32 %v4529_v18, %v8005_v27  ;;  %v2366_v14 = vmax.f32 %v2302_v20, 0.0  ;;  %v8011_v7 = vmax.f32 %v4562_v45, 0.0 }
 0x5cd   : > { %3761 = vset.pattern.permute.xlu1 %v7888_v63  ;;  %3770 = vset.pattern.permute.xlu0 %v7893_v36  ;;  %8006 = vst [vmem:[#allocation28_spill] sm:$0xff] %v4823_v22  ;;  %v4831_v44 = vadd.f32 %v1675_v17, %v8008_v32  ;;  %v2712_v17 = vmax.f32 %v2648_v41, 0.0  ;;  %v2713_v38 = vmax.f32 %v2649_v60, 0.0  ;;  %v8014_v20 = vmax.f32 %v4569_v10, 0.0  ;;  %v8017_v41 = vld [vmem:[#allocation30_spill] sm:$0xff] }
 0x5ce   : > { %v4765_v11 = vpop.permute.xlu1 %1907  ;;  %1513 = vperm.xlu1 %3761, %v4061_v50   ;;  %1863 = vperm.xlu0 %3770, %v4070_v52   ;;  %v4780_v25 = vpop.permute.xlu0 %2257  ;;  %8009 = vst [vmem:[#allocation152_spill] sm:$0xff] %v4837_v42  ;;  %v4846_v32 = vadd.f32 %v2020_v8, %v8011_v7  ;;  %v3405_v28 = vmax.f32 %v3341_v0, 0.0  ;;  %v4865_v60 = vadd.f32 %v4545_v57, %v8017_v41 }
 0x5cf   : > { %7993 = vst [vmem:[#allocation148_spill] sm:$0xff] %v4765_v11  ;;  %7996 = vst [vmem:[#allocation149_spill] sm:$0xff] %v4780_v25  ;;  %v8010_v11 = vld [vmem:[#allocation29_spill] sm:$0xff]  ;;  %v3404_v25 = vmax.f32 %v3340_v6, 0.0  ;;  %v4854_v62 = vadd.f32 %v2021_v58, %v8014_v20  ;;  %v4869_v10 = vadd.f32 %v4547_v2, %v8017_v41  ;;  %v8020_v58 = vmax.f32 %v4593_v59, 0.0  ;;  %v8026_v59 = vld [vmem:[#allocation31_spill] sm:$0xff] }
 0x5d0   : > { %v2995_v48 = vadd.f32 %v4529_v18, %v8010_v11  ;;  %8018 = vst [vmem:[#allocation30_spill] sm:$0xff] %v4865_v60  ;;  %v8021_v20 = vld [vmem:[#allocation121_spill] sm:$0xff]  ;;  %v8024_v41 = vmax.f32 %v4616_v13, 0.0  ;;  %v8030_v13 = vld [vmem:[#allocation32_spill] sm:$0xff] }
 0x5d1   : > { %8019 = vst [vmem:[#allocation153_spill] sm:$0xff] %v4869_v10  ;;  %v4875_v7 = vadd.f32 %v2366_v14, %v8020_v58  ;;  %v4895_v14 = vadd.f32 %v4545_v57, %v8026_v59  ;;  %v8044_v10 = vld [vmem:[#allocation36_spill] sm:$0xff] }
 0x5d2   : > { %1577 = vperm.xlu1 %3761, %v4063_v51   ;;  %1927 = vperm.xlu0 %3770, %v4072_v53   ;;  %v3059_v42 = vmax.f32 %v2995_v48, 0.0  ;;  %v4887_v30 = vadd.f32 %v2713_v38, %v8024_v41  ;;  %v921_v38 = vadd.f32 %v4475_v61, %v8030_v13  ;;  %v8035_v41 = vld [vmem:[#allocation38_spill] sm:$0xff]  ;;  %v1268_v60 = vadd.f32 %v4482_v5, %v8044_v10 }
 0x5d3   : > { %v4815_v1 = vpop.permute.xlu1 %2189  ;;  %v4827_v29 = vpop.permute.xlu0 %2539  ;;  %8027 = vst [vmem:[#allocation121_spill] sm:$0xff] %v4895_v14 }
 0x5d4   : > { %8003 = vst [vmem:[#allocation27_spill] sm:$0xff] %v4815_v1  ;;  %8007 = vst [vmem:[#allocation26_spill] sm:$0xff] %v4827_v29  ;;  %v2994_v1 = vadd.f32 %v4516_v4, %v8010_v11  ;;  %v8015_v29 = vld [vmem:[#allocation34_spill] sm:$0xff]  ;;  %v8022_v11 = vmax.f32 %v8021_v20, 0.0 }
 0x5d5   : > { %v919_v45 = vadd.f32 %v4475_v61, %v8015_v29  ;;  %v920_v0 = vadd.f32 %v4477_v40, %v8015_v29  ;;  %v8025_v29 = vmax.f32 %v4696_v24, 0.0 }
 0x5d6   : > { %3762 = vset.pattern.permute.xlu1 %v7893_v36  ;;  %3771 = vset.pattern.permute.xlu0 %v8012_v16  ;;  %v4879_v22 = vadd.f32 %v2367_v43, %v8022_v11  ;;  %v3058_v6 = vmax.f32 %v2994_v1, 0.0  ;;  %v8028_v1 = vmax.f32 %v4706_v21, 0.0  ;;  %v922_v21 = vadd.f32 %v4477_v40, %v8030_v13  ;;  %v8036_v13 = vld [vmem:[#allocation33_spill] sm:$0xff] }
 0x5d7   : > { %v4849_v27 = vpop.permute.xlu1 %2253  ;;  %1859 = vperm.xlu1 %3762, %v4061_v50   ;;  %2209 = vperm.xlu0 %3771, %v4070_v52   ;;  %v4860_v8 = vpop.permute.xlu0 %2603  ;;  %v4891_v33 = vadd.f32 %v3404_v25, %v8025_v29  ;;  %v983_v24 = vmax.f32 %v919_v45, 0.0  ;;  %v8034_v45 = vmax.f32 %v4634_v15, 0.0  ;;  %v1266_v29 = vadd.f32 %v4482_v5, %v8035_v41 }
 0x5d8   : > { %8013 = vst [vmem:[#allocation29_spill] sm:$0xff] %v4849_v27  ;;  %8016 = vst [vmem:[#allocation34_spill] sm:$0xff] %v4860_v8  ;;  %v8023_v8 = vmax.f32 %v4610_v9, 0.0  ;;  %v4900_v43 = vadd.f32 %v3405_v28, %v8028_v1  ;;  %v4904_v9 = vadd.f32 %v4547_v2, %v8026_v59  ;;  %v984_v28 = vmax.f32 %v920_v0, 0.0 }
 0x5d9   : > { %v4923_v20 = vadd.f32 %v3059_v42, %v8034_v45  ;;  %v1267_v59 = vadd.f32 %v4484_v47, %v8035_v41  ;;  %v4932_v0 = vadd.f32 %v4475_v61, %v8036_v13  ;;  %v1044_v45 = vadd.f32 %v4770_v19, %v983_v24  ;;  %v8046_v42 = vld [vmem:[#allocation42_spill] sm:$0xff] }
 0x5da   : > { %v4883_v27 = vadd.f32 %v2712_v17, %v8023_v8  ;;  %8029 = vst [vmem:[#allocation31_spill] sm:$0xff] %v4904_v9  ;;  %v8033_v8 = vmax.f32 %v4630_v55, 0.0  ;;  %v4936_v55 = vadd.f32 %v4477_v40, %v8036_v13  ;;  %v8042_v17 = vmov 5  }
 0x5db   : > { %1923 = vperm.xlu1 %3762, %v4063_v51   ;;  %2273 = vperm.xlu0 %3771, %v4072_v53   ;;  %8037 = vst [vmem:[#allocation38_spill] sm:$0xff] %v4932_v0  ;;  %v986_v13 = vmax.f32 %v922_v21, 0.0  ;;  %v1081_v1 = vadd.f32 %v4774_v12, %v984_v28  ;;  %v1330_v24 = vmax.f32 %v1266_v29, 0.0  ;;  %v1612_v9 = vadd.f32 %v4486_v35, %v8046_v42 }
 0x5dc   : > { %v4909_v25 = vpop.permute.xlu1 %2535  ;;  %v4915_v11 = vpop.permute.xlu0 %2885  ;;  %v4919_v58 = vadd.f32 %v3058_v6, %v8033_v8  ;;  %8038 = vst [vmem:[#allocation33_spill] sm:$0xff] %v4936_v55  ;;  %v8039_v6 = vld [vmem:[#allocation35_spill] sm:$0xff]  ;;  %v985_v8 = vmax.f32 %v921_v38, 0.0  ;;  %v1269_v38 = vadd.f32 %v4484_v47, %v8044_v10  ;;  %v1613_v21 = vadd.f32 %v4488_v56, %v8046_v42 }
 0x5dd   : > { %8031 = vst [vmem:[#allocation32_spill] sm:$0xff] %v4909_v25  ;;  %8032 = vst [vmem:[#allocation154_spill] sm:$0xff] %v4915_v11  ;;  %v4940_v15 = vadd.f32 %v4475_v61, %v8039_v6  ;;  %v4947_v41 = vadd.f32 %v4477_v40, %v8039_v6  ;;  %v1331_v6 = vmax.f32 %v1267_v59, 0.0  ;;  %v8050_v59 = vld [vmem:[#allocation39_spill] sm:$0xff]  ;;  %v1332_v28 = vmax.f32 %v1268_v60, 0.0 }
 0x5de   : > { %v4979_v11 = vadd.f32 %v4482_v5, %v8050_v59  ;;  %v4981_v42 = vadd.f32 %v1044_v45, %v985_v8  ;;  %v1333_v12 = vmax.f32 %v1269_v38, 0.0  ;;  %v4986_v14 = vadd.f32 %v4484_v47, %v8050_v59  ;;  %v8055_v38 = vld [vmem:[#allocation40_spill] sm:$0xff] }
 0x5df   : > { %8040 = vst [vmem:[#allocation35_spill] sm:$0xff] %v4940_v15  ;;  %3763 = vset.pattern.permute.xlu1 %v8012_v16  ;;  %8041 = vst [vmem:[#allocation155_spill] sm:$0xff] %v4947_v41  ;;  %3772 = vset.pattern.permute.xlu0 %v8042_v17  ;;  %v4988_v55 = vadd.f32 %v1081_v1, %v986_v13  ;;  %v1428_v0 = vadd.f32 %v4791_v23, %v1331_v6  ;;  %v1676_v8 = vmax.f32 %v1612_v9, 0.0  ;;  %v8056_v13 = vld [vmem:[#allocation46_spill] sm:$0xff]  ;;  %v8057_v23 = vld [vmem:[#allocation41_spill] sm:$0xff] }
 0x5e0   : > { %v4950_v48 = vpop.permute.xlu1 %2599  ;;  %2205 = vperm.xlu1 %3763, %v4061_v50   ;;  %2555 = vperm.xlu0 %3772, %v4070_v52   ;;  %v4959_v19 = vpop.permute.xlu0 %2949  ;;  %8051 = vst [vmem:[#allocation39_spill] sm:$0xff] %v4979_v11  ;;  %8052 = vst [vmem:[#allocation157_spill] sm:$0xff] %v4986_v14  ;;  %v1677_v45 = vmax.f32 %v1613_v21, 0.0  ;;  %v1614_v59 = vadd.f32 %v4486_v35, %v8055_v38  ;;  %v1615_v1 = vadd.f32 %v4488_v56, %v8055_v38  ;;  %v8060_v38 = vld [vmem:[#allocation43_spill] sm:$0xff] }
 0x5e1   : > { %8043 = vst [vmem:[#allocation156_spill] sm:$0xff] %v4950_v48  ;;  %8045 = vst [vmem:[#allocation36_spill] sm:$0xff] %v4959_v19  ;;  %v8047_v48 = vld [vmem:[#allocation37_spill] sm:$0xff]  ;;  %v1391_v19 = vadd.f32 %v4784_v34, %v1330_v24  ;;  %v1958_v15 = vadd.f32 %v4490_v39, %v8056_v13  ;;  %v5008_v9 = vadd.f32 %v4486_v35, %v8057_v23  ;;  %v8063_v34 = vmov 6  }
 0x5e2   : > { %v4970_v10 = vadd.f32 %v4482_v5, %v8047_v48  ;;  %v4975_v29 = vadd.f32 %v4484_v47, %v8047_v48  ;;  %v1959_v24 = vadd.f32 %v4492_v3, %v8056_v13  ;;  %v5016_v21 = vadd.f32 %v4488_v56, %v8057_v23 }
 0x5e3   : > { %8058 = vst [vmem:[#allocation40_spill] sm:$0xff] %v5008_v9  ;;  %v5024_v60 = vadd.f32 %v4488_v56, %v8060_v38  ;;  %v1737_v13 = vadd.f32 %v4819_v26, %v1676_v8  ;;  %v1774_v6 = vadd.f32 %v4831_v44, %v1677_v45  ;;  %v5032_v23 = vadd.f32 %v1391_v19, %v1332_v28  ;;  %v8067_v8 = vld [vmem:[#allocation50_spill] sm:$0xff]  ;;  %v8068_v45 = vld [vmem:[#allocation45_spill] sm:$0xff]  ;;  %v8076_v9 = vld [vmem:[#allocation48_spill] sm:$0xff] }
 0x5e4   : > { %8048 = vst [vmem:[#allocation42_spill] sm:$0xff] %v4970_v10  ;;  %8049 = vst [vmem:[#allocation37_spill] sm:$0xff] %v4975_v29  ;;  %2269 = vperm.xlu1 %3763, %v4063_v51   ;;  %2619 = vperm.xlu0 %3772, %v4072_v53   ;;  %v5034_v10 = vadd.f32 %v1428_v0, %v1333_v12  ;;  %v1678_v14 = vmax.f32 %v1614_v59, 0.0  ;;  %v1679_v11 = vmax.f32 %v1615_v1, 0.0  ;;  %v2022_v25 = vmax.f32 %v1958_v15, 0.0  ;;  %v8072_v15 = vld [vmem:[#allocation47_spill] sm:$0xff] }
 0x5e5   : > { %v4991_v48 = vpop.permute.xlu1 %2881  ;;  %v4995_v41 = vpop.permute.xlu0 %3235  ;;  %8059 = vst [vmem:[#allocation46_spill] sm:$0xff] %v5016_v21  ;;  %8062 = vst [vmem:[#allocation43_spill] sm:$0xff] %v5024_v60  ;;  %v2023_v26 = vmax.f32 %v1959_v24, 0.0  ;;  %v2304_v44 = vadd.f32 %v4494_v31, %v8067_v8  ;;  %v2305_v0 = vadd.f32 %v4496_v49, %v8067_v8  ;;  %v5054_v59 = vadd.f32 %v4490_v39, %v8068_v45 }
 0x5e6   : > { %8053 = vst [vmem:[#allocation158_spill] sm:$0xff] %v4991_v48  ;;  %8054 = vst [vmem:[#allocation159_spill] sm:$0xff] %v4995_v41  ;;  %v5020_v48 = vadd.f32 %v4486_v35, %v8060_v38  ;;  %v8065_v38 = vld [vmem:[#allocation44_spill] sm:$0xff]  ;;  %v5058_v1 = vadd.f32 %v4492_v3, %v8068_v45  ;;  %v5060_v24 = vadd.f32 %v1737_v13, %v1678_v14 }
 0x5e7   : > { %v1960_v41 = vadd.f32 %v4490_v39, %v8065_v38  ;;  %8069 = vst [vmem:[#allocation50_spill] sm:$0xff] %v5054_v59  ;;  %v2083_v19 = vadd.f32 %v4846_v32, %v2022_v25  ;;  %v5070_v28 = vadd.f32 %v4490_v39, %v8072_v15  ;;  %v5074_v21 = vadd.f32 %v4492_v3, %v8072_v15  ;;  %v8077_v25 = vld [vmem:[#allocation54_spill] sm:$0xff] }
 0x5e8   : > { %3764 = vset.pattern.permute.xlu1 %v8042_v17  ;;  %8061 = vst [vmem:[#allocation41_spill] sm:$0xff] %v5020_v48  ;;  %3773 = vset.pattern.permute.xlu0 %v8063_v34  ;;  %8070 = vst [vmem:[#allocation45_spill] sm:$0xff] %v5058_v1  ;;  %v2369_v13 = vmax.f32 %v2305_v0, 0.0  ;;  %v2307_v32 = vadd.f32 %v4496_v49, %v8076_v9  ;;  %v2650_v60 = vadd.f32 %v4499_v54, %v8077_v25  ;;  %v8084_v1 = vld [vmem:[#allocation18_spill] sm:$0xff] }
 0x5e9   : > { %v5027_v29 = vpop.permute.xlu1 %2945  ;;  %2551 = vperm.xlu1 %3764, %v4061_v50   ;;  %2901 = vperm.xlu0 %3773, %v4070_v52   ;;  %v2024_v12 = vmax.f32 %v1960_v41, 0.0  ;;  %8073 = vst [vmem:[#allocation47_spill] sm:$0xff] %v5070_v28  ;;  %8074 = vst [vmem:[#allocation162_spill] sm:$0xff] %v5074_v21  ;;  %v2306_v41 = vadd.f32 %v4494_v31, %v8076_v9  ;;  %v2651_v15 = vadd.f32 %v4514_v46, %v8077_v25  ;;  %v8081_v9 = vmov 7  }
 0x5ea   : > { %8064 = vst [vmem:[#allocation160_spill] sm:$0xff] %v5027_v29  ;;  %v5039_v17 = vpop.permute.xlu0 %794  ;;  %v1961_v29 = vadd.f32 %v4492_v3, %v8065_v38  ;;  %v5062_v38 = vadd.f32 %v1774_v6, %v1679_v11  ;;  %v2120_v11 = vadd.f32 %v4854_v62, %v2023_v26  ;;  %v2368_v6 = vmax.f32 %v2304_v44, 0.0  ;;  %v8078_v26 = vld [vmem:[#allocation49_spill] sm:$0xff] }
 0x5eb   : > { %8066 = vst [vmem:[#allocation44_spill] sm:$0xff] %v5039_v17  ;;  %v5092_v44 = vadd.f32 %v4494_v31, %v8078_v26  ;;  %v5096_v0 = vadd.f32 %v4496_v49, %v8078_v26  ;;  %v5106_v62 = vadd.f32 %v2083_v19, %v2024_v12  ;;  %v2370_v21 = vmax.f32 %v2306_v41, 0.0 }
 0x5ec   : > { %v2025_v14 = vmax.f32 %v1961_v29, 0.0  ;;  %v2429_v26 = vadd.f32 %v4875_v7, %v2368_v6  ;;  %v2371_v28 = vmax.f32 %v2307_v32, 0.0  ;;  %v2714_v19 = vmax.f32 %v2650_v60, 0.0  ;;  %v8092_v6 = vld [vmem:[#allocation58_spill] sm:$0xff] }
 0x5ed   : > { %2615 = vperm.xlu1 %3764, %v4063_v51   ;;  %2965 = vperm.xlu0 %3773, %v4072_v53   ;;  %8079 = vst [vmem:[#allocation48_spill] sm:$0xff] %v5092_v44  ;;  %8080 = vst [vmem:[#allocation54_spill] sm:$0xff] %v5096_v0  ;;  %v8082_v53 = vld [vmem:[#allocation51_spill] sm:$0xff]  ;;  %v2715_v12 = vmax.f32 %v2651_v15, 0.0  ;;  %v8093_v41 = vmov 0   ;;  %v2997_v15 = vadd.f32 %v4529_v18, %v8092_v6 }
 0x5ee   : > { %v5065_v8 = vpop.permute.xlu1 %3231  ;;  %v5076_v45 = vpop.permute.xlu0 %874  ;;  %v5104_v29 = vadd.f32 %v4494_v31, %v8082_v53  ;;  %v5117_v25 = vadd.f32 %v2120_v11, %v2025_v14  ;;  %v8089_v14 = vld [vmem:[#allocation53_spill] sm:$0xff]  ;;  %v2775_v0 = vadd.f32 %v4883_v27, %v2714_v19 }
 0x5ef   : > { %8071 = vst [vmem:[#allocation161_spill] sm:$0xff] %v5065_v8  ;;  %8075 = vst [vmem:[#allocation163_spill] sm:$0xff] %v5076_v45  ;;  %v2466_v45 = vadd.f32 %v4879_v22, %v2369_v13  ;;  %v8088_v8 = vld [vmem:[#allocation52_spill] sm:$0xff]  ;;  %v5131_v11 = vadd.f32 %v4499_v54, %v8089_v14  ;;  %v5135_v60 = vadd.f32 %v4514_v46, %v8089_v14 }
 0x5f0   : > { %8083 = vst [vmem:[#allocation49_spill] sm:$0xff] %v5104_v29  ;;  %v2652_v7 = vadd.f32 %v4499_v54, %v8088_v8  ;;  %v2653_v22 = vadd.f32 %v4514_v46, %v8088_v8  ;;  %v2996_v13 = vadd.f32 %v4516_v4, %v8092_v6  ;;  %v2812_v44 = vadd.f32 %v4887_v30, %v2715_v12  ;;  %v8098_v29 = vld [vmem:[#allocation55_spill] sm:$0xff]  ;;  %v8102_v6 = vld [vmem:[#allocation61_spill] sm:$0xff] }
 0x5f1   : > { %3765 = vset.pattern.permute.xlu1 %v8063_v34  ;;  %3782 = vset.pattern.permute.xlu0 %v8081_v9  ;;  %8090 = vst [vmem:[#allocation52_spill] sm:$0xff] %v5131_v11  ;;  %8091 = vst [vmem:[#allocation53_spill] sm:$0xff] %v5135_v60  ;;  %v5147_v17 = vadd.f32 %v2466_v45, %v2371_v28  ;;  %v5160_v8 = vadd.f32 %v4514_v46, %v8098_v29 }
 0x5f2   : > { %2897 = vperm.xlu1 %3765, %v4061_v50   ;;  %3251 = vperm.xlu0 %3782, %v8084_v1   ;;  %v5115_v50 = vadd.f32 %v4496_v49, %v8082_v53  ;;  %v8096_v53 = vld [vmem:[#allocation20_spill] sm:$0xff]  ;;  %v3342_v27 = vadd.f32 %v4545_v57, %v8102_v6  ;;  %v2717_v30 = vmax.f32 %v2653_v22, 0.0 }
 0x5f3   : > { %v5109_v59 = vpop.permute.xlu1 %789  ;;  %v5119_v48 = vpop.permute.xlu0 %1163  ;;  %8095 = vst [vmem:[#allocation165_spill] sm:$0xff] %v5147_v17  ;;  %8100 = vst [vmem:[#allocation166_spill] sm:$0xff] %v5160_v8 }
 0x5f4   : > { %8085 = vst [vmem:[#allocation51_spill] sm:$0xff] %v5109_v59  ;;  %8086 = vst [vmem:[#allocation18_spill] sm:$0xff] %v5115_v50  ;;  %v5145_v59 = vadd.f32 %v2429_v26, %v2370_v21  ;;  %v2716_v21 = vmax.f32 %v2652_v7, 0.0  ;;  %v8101_v26 = vld [vmem:[#allocation56_spill] sm:$0xff]  ;;  %v3060_v50 = vmax.f32 %v2996_v13, 0.0  ;;  %v5187_v19 = vadd.f32 %v2812_v44, %v2717_v30  ;;  %v8115_v30 = vld [vmem:[#allocation65_spill] sm:$0xff] }
 0x5f5   : > { %8087 = vst [vmem:[#allocation164_spill] sm:$0xff] %v5119_v48  ;;  %v2998_v28 = vadd.f32 %v4516_v4, %v8101_v26  ;;  %v2999_v45 = vadd.f32 %v4529_v18, %v8101_v26  ;;  %v3343_v26 = vadd.f32 %v4547_v2, %v8102_v6  ;;  %v3406_v6 = vmax.f32 %v3342_v27, 0.0 }
 0x5f6   : > { %2961 = vperm.xlu1 %3765, %v4063_v51   ;;  %3783 = vset.pattern.permute.xlu0 %v8093_v41  ;;  %v8105_v51 = vld [vmem:[#allocation63_spill] sm:$0xff]  ;;  %v3121_v12 = vadd.f32 %v4919_v58, %v3060_v50  ;;  %v8114_v58 = vld [vmem:[#allocation60_spill] sm:$0xff] }
 0x5f7   : > { %v5140_v32 = vpop.permute.xlu1 %869  ;;  %814 = vperm.xlu0 %3783, %v8096_v53   ;;  %v5150_v14 = vpop.permute.xlu0 %1227  ;;  %v3344_v48 = vadd.f32 %v4545_v57, %v8105_v51  ;;  %v3063_v11 = vmax.f32 %v2999_v45, 0.0  ;;  %v3345_v34 = vadd.f32 %v4547_v2, %v8105_v51  ;;  %v3346_v50 = vadd.f32 %v4545_v57, %v8114_v58 }
 0x5f8   : > { %8094 = vst [vmem:[#allocation58_spill] sm:$0xff] %v5140_v32  ;;  %8097 = vst [vmem:[#allocation20_spill] sm:$0xff] %v5150_v14  ;;  %v5156_v32 = vadd.f32 %v4499_v54, %v8098_v29  ;;  %v8103_v29 = vld [vmem:[#allocation57_spill] sm:$0xff]  ;;  %v3061_v14 = vmax.f32 %v2997_v15, 0.0  ;;  %v3062_v15 = vmax.f32 %v2998_v28, 0.0  ;;  %v3407_v28 = vmax.f32 %v3343_v26, 0.0 }
 0x5f9   : > { %v5174_v7 = vadd.f32 %v4516_v4, %v8103_v29  ;;  %v5195_v17 = vadd.f32 %v4529_v18, %v8103_v29  ;;  %v3408_v45 = vmax.f32 %v3344_v48, 0.0  ;;  %v923_v29 = vadd.f32 %v4475_v61, %v8115_v30  ;;  %v8117_v26 = vld [vmem:[#allocation62_spill] sm:$0xff] }
 0x5fa   : > { %8099 = vst [vmem:[#allocation55_spill] sm:$0xff] %v5156_v32  ;;  %3774 = vset.pattern.permute.xlu1 %v8081_v9  ;;  %v8106_v9 = vld [vmem:[#allocation21_spill] sm:$0xff]  ;;  %v8110_v32 = vld [vmem:[#allocation59_spill] sm:$0xff]  ;;  %v3158_v51 = vadd.f32 %v4923_v20, %v3061_v14  ;;  %v924_v20 = vadd.f32 %v4477_v40, %v8115_v30  ;;  %v3467_v14 = vadd.f32 %v4891_v33, %v3406_v6 }
 0x5fb   : > { %3247 = vperm.xlu1 %3774, %v4070_v52   ;;  %8104 = vst [vmem:[#allocation56_spill] sm:$0xff] %v5174_v7  ;;  %894 = vperm.xlu0 %3783, %v8106_v9   ;;  %v5185_v52 = vadd.f32 %v2775_v0, %v2716_v21  ;;  %8109 = vst [vmem:[#allocation63_spill] sm:$0xff] %v5195_v17  ;;  %v5200_v0 = vadd.f32 %v4516_v4, %v8110_v32  ;;  %v3409_v7 = vmax.f32 %v3345_v34, 0.0  ;;  %v8128_v17 = vld [vmem:[#allocation73_spill] sm:$0xff] }
 0x5fc   : > { %v5181_v22 = vpop.permute.xlu1 %1159  ;;  %v5189_v60 = vpop.permute.xlu0 %1509  ;;  %v5204_v44 = vadd.f32 %v4529_v18, %v8110_v32  ;;  %v3347_v32 = vadd.f32 %v4547_v2, %v8114_v58  ;;  %v925_v21 = vadd.f32 %v4475_v61, %v8117_v26  ;;  %v926_v13 = vadd.f32 %v4477_v40, %v8117_v26 }
 0x5fd   : > { %8107 = vst [vmem:[#allocation61_spill] sm:$0xff] %v5181_v22  ;;  %8108 = vst [vmem:[#allocation57_spill] sm:$0xff] %v5189_v60  ;;  %v5232_v30 = vadd.f32 %v3121_v12, %v3062_v15  ;;  %v3504_v60 = vadd.f32 %v4900_v43, %v3407_v28  ;;  %v5239_v6 = vadd.f32 %v3158_v51, %v3063_v11  ;;  %v8120_v22 = vld [vmem:[#allocation19_spill] sm:$0xff]  ;;  %v3410_v34 = vmax.f32 %v3346_v50, 0.0  ;;  %v8123_v11 = vld [vmem:[#allocation66_spill] sm:$0xff] }
 0x5fe   : > { %8111 = vst [vmem:[#allocation59_spill] sm:$0xff] %v5200_v0  ;;  %8112 = vst [vmem:[#allocation167_spill] sm:$0xff] %v5204_v44  ;;  %v987_v58 = vmax.f32 %v923_v29, 0.0  ;;  %v3411_v43 = vmax.f32 %v3347_v32, 0.0  ;;  %v989_v15 = vmax.f32 %v925_v21, 0.0  ;;  %v990_v28 = vmax.f32 %v926_v13, 0.0 }
 0x5ff   : > { %3775 = vset.pattern.permute.xlu1 %v8093_v41  ;;  %3784 = vset.pattern.permute.xlu0 %v7883_v37  ;;  %v8118_v41 = vld [vmem:[#allocation64_spill] sm:$0xff]  ;;  %v5253_v51 = vadd.f32 %v4482_v5, %v8123_v11  ;;  %v8124_v50 = vld [vmem:[#allocation69_spill] sm:$0xff]  ;;  %v8125_v13 = vld [vmem:[#allocation67_spill] sm:$0xff]  ;;  %v1616_v21 = vadd.f32 %v4486_v35, %v8128_v17 }
 0x600   : > { %v5210_v27 = vpop.permute.xlu1 %1223  ;;  %809 = vperm.xlu1 %3775, %v8084_v1   ;;  %1179 = vperm.xlu0 %3784, %v8096_v53   ;;  %v5222_v48 = vpop.permute.xlu0 %1573  ;;  %v5237_v33 = vadd.f32 %v4475_v61, %v8118_v41  ;;  %v5244_v26 = vadd.f32 %v4477_v40, %v8118_v41  ;;  %v5257_v41 = vadd.f32 %v4484_v47, %v8123_v11 }
 0x601   : > { %8113 = vst [vmem:[#allocation168_spill] sm:$0xff] %v5210_v27  ;;  %8116 = vst [vmem:[#allocation60_spill] sm:$0xff] %v5222_v48  ;;  %v3468_v48 = vadd.f32 %v3467_v14, %v3408_v45  ;;  %v988_v27 = vmax.f32 %v924_v20, 0.0  ;;  %v3505_v45 = vadd.f32 %v3504_v60, %v3409_v7  ;;  %v1270_v29 = vadd.f32 %v4482_v5, %v8124_v50 }
 0x602   : > { %8119 = vst [vmem:[#allocation65_spill] sm:$0xff] %v5237_v33  ;;  %8121 = vst [vmem:[#allocation62_spill] sm:$0xff] %v5244_v26  ;;  %v1271_v20 = vadd.f32 %v4484_v47, %v8124_v50  ;;  %v5266_v60 = vadd.f32 %v4475_v61, %v8125_v13  ;;  %v5270_v7 = vadd.f32 %v4477_v40, %v8125_v13  ;;  %v8130_v13 = vld [vmem:[#allocation68_spill] sm:$0xff]  ;;  %v1337_v11 = vmax.f32 %v5257_v41, 0.0 }
 0x603   : > { %v5272_v32 = vadd.f32 %v3468_v48, %v3410_v34  ;;  %v1046_v8 = vadd.f32 %v4981_v42, %v987_v58  ;;  %v1083_v50 = vadd.f32 %v4988_v55, %v988_v27  ;;  %v5286_v48 = vadd.f32 %v4482_v5, %v8130_v13 }
 0x604   : > { %889 = vperm.xlu1 %3775, %v8120_v22   ;;  %1243 = vperm.xlu0 %3784, %v8106_v9   ;;  %8126 = vst [vmem:[#allocation66_spill] sm:$0xff] %v5266_v60  ;;  %8127 = vst [vmem:[#allocation69_spill] sm:$0xff] %v5270_v7  ;;  %v5290_v34 = vadd.f32 %v4484_v47, %v8130_v13  ;;  %v1617_v55 = vadd.f32 %v4488_v56, %v8128_v17  ;;  %v1336_v58 = vmax.f32 %v5253_v51, 0.0  ;;  %v8144_v7 = vld [vmem:[#allocation75_spill] sm:$0xff] }
 0x605   : > { %v5247_v12 = vpop.permute.xlu1 %1505  ;;  %v5249_v14 = vpop.permute.xlu0 %1855  ;;  %8131 = vst [vmem:[#allocation73_spill] sm:$0xff] %v5286_v48  ;;  %v5294_v42 = vadd.f32 %v3505_v45, %v3411_v43  ;;  %v1334_v0 = vmax.f32 %v1270_v29, 0.0  ;;  %v1335_v26 = vmax.f32 %v1271_v20, 0.0  ;;  %v8135_v43 = vld [vmem:[#allocation71_spill] sm:$0xff]  ;;  %v5311_v51 = vadd.f32 %v1046_v8, %v989_v15  ;;  %v8142_v29 = vld [vmem:[#allocation77_spill] sm:$0xff] }
 0x606   : > { %8122 = vst [vmem:[#allocation64_spill] sm:$0xff] %v5249_v14  ;;  %8132 = vst [vmem:[#allocation68_spill] sm:$0xff] %v5290_v34  ;;  %v5309_v45 = vadd.f32 %v4482_v5, %v8135_v43  ;;  %v5313_v41 = vadd.f32 %v1083_v50, %v990_v28  ;;  %v5320_v13 = vadd.f32 %v4484_v47, %v8135_v43  ;;  %v8138_v28 = vld [vmem:[#allocation72_spill] sm:$0xff] }
 0x607   : > { %v1393_v8 = vadd.f32 %v5032_v23, %v1334_v0  ;;  %v1430_v15 = vadd.f32 %v5034_v10, %v1335_v26  ;;  %v5333_v50 = vadd.f32 %v4488_v56, %v8138_v28  ;;  %v1962_v34 = vadd.f32 %v4490_v39, %v8142_v29  ;;  %v8143_v26 = vld [vmem:[#allocation74_spill] sm:$0xff] }
 0x608   : > { %3776 = vset.pattern.permute.xlu1 %v7883_v37  ;;  %3785 = vset.pattern.permute.xlu0 %v7888_v63  ;;  %8137 = vst [vmem:[#allocation71_spill] sm:$0xff] %v5320_v13  ;;  %v1963_v23 = vadd.f32 %v4492_v3, %v8142_v29  ;;  %v1964_v48 = vadd.f32 %v4490_v39, %v8143_v26 }
 0x609   : > { %v5281_v44 = vpop.permute.xlu1 %1569  ;;  %1175 = vperm.xlu1 %3776, %v8084_v1   ;;  %1525 = vperm.xlu0 %3785, %v8096_v53   ;;  %v5297_v27 = vpop.permute.xlu0 %1919  ;;  %8140 = vst [vmem:[#allocation170_spill] sm:$0xff] %v5333_v50  ;;  %v5352_v60 = vadd.f32 %v4486_v35, %v8144_v7  ;;  %v5356_v29 = vadd.f32 %v4488_v56, %v8144_v7  ;;  %v8149_v7 = vld [vmem:[#allocation76_spill] sm:$0xff] }
 0x60a   : > { %8129 = vst [vmem:[#allocation67_spill] sm:$0xff] %v5281_v44  ;;  %8133 = vst [vmem:[#allocation169_spill] sm:$0xff] %v5297_v27  ;;  %v8134_v44 = vld [vmem:[#allocation70_spill] sm:$0xff]  ;;  %v1680_v27 = vmax.f32 %v1616_v21, 0.0  ;;  %v5329_v21 = vadd.f32 %v4486_v35, %v8138_v28  ;;  %v1965_v28 = vadd.f32 %v4492_v3, %v8143_v26  ;;  %v5373_v10 = vadd.f32 %v4490_v39, %v8149_v7 }
 0x60b   : > { %v1618_v14 = vadd.f32 %v4486_v35, %v8134_v44  ;;  %v1619_v17 = vadd.f32 %v4488_v56, %v8134_v44  ;;  %8136 = vst [vmem:[#allocation70_spill] sm:$0xff] %v5309_v45  ;;  %v1681_v44 = vmax.f32 %v1617_v55, 0.0  ;;  %8145 = vst [vmem:[#allocation77_spill] sm:$0xff] %v5352_v60  ;;  %v5377_v13 = vadd.f32 %v4492_v3, %v8149_v7 }
 0x60c   : > { %8139 = vst [vmem:[#allocation72_spill] sm:$0xff] %v5329_v21  ;;  %v1739_v0 = vadd.f32 %v5060_v24, %v1680_v27  ;;  %8146 = vst [vmem:[#allocation74_spill] sm:$0xff] %v5356_v29  ;;  %v2026_v45 = vmax.f32 %v1962_v34, 0.0  ;;  %v2027_v27 = vmax.f32 %v1963_v23, 0.0  ;;  %v2028_v21 = vmax.f32 %v1964_v48, 0.0  ;;  %v8153_v34 = vld [vmem:[#allocation78_spill] sm:$0xff] }
 0x60d   : > { %1239 = vperm.xlu1 %3776, %v8120_v22   ;;  %1589 = vperm.xlu0 %3785, %v8106_v9   ;;  %v1682_v43 = vmax.f32 %v1618_v14, 0.0  ;;  %v1683_v55 = vmax.f32 %v1619_v17, 0.0  ;;  %v1776_v17 = vadd.f32 %v5062_v38, %v1681_v44  ;;  %v5364_v14 = vadd.f32 %v1393_v8, %v1336_v58  ;;  %8150 = vst [vmem:[#allocation76_spill] sm:$0xff] %v5373_v10  ;;  %v8152_v58 = vld [vmem:[#allocation81_spill] sm:$0xff] }
 0x60e   : > { %v5323_v33 = vpop.permute.xlu1 %1851  ;;  %v5335_v20 = vpop.permute.xlu0 %2201  ;;  %v5366_v38 = vadd.f32 %v1430_v15, %v1337_v11  ;;  %8151 = vst [vmem:[#allocation173_spill] sm:$0xff] %v5377_v13  ;;  %v2029_v26 = vmax.f32 %v1965_v28, 0.0  ;;  %v2308_v11 = vadd.f32 %v4494_v31, %v8152_v58  ;;  %v2309_v8 = vadd.f32 %v4496_v49, %v8152_v58  ;;  %v8154_v28 = vld [vmem:[#allocation79_spill] sm:$0xff]  ;;  %v8159_v15 = vld [vmem:[#allocation80_spill] sm:$0xff] }
 0x60f   : > { %8141 = vst [vmem:[#allocation171_spill] sm:$0xff] %v5335_v20  ;;  %v2310_v48 = vadd.f32 %v4494_v31, %v8153_v34  ;;  %v2311_v23 = vadd.f32 %v4496_v49, %v8153_v34  ;;  %v5396_v7 = vadd.f32 %v4490_v39, %v8154_v28  ;;  %v5400_v58 = vadd.f32 %v4492_v3, %v8154_v28 }
 0x610   : > { %v2122_v34 = vadd.f32 %v5117_v25, %v2027_v27  ;;  %v5413_v29 = vadd.f32 %v4494_v31, %v8159_v15  ;;  %v5417_v28 = vadd.f32 %v4496_v49, %v8159_v15  ;;  %v2372_v60 = vmax.f32 %v2308_v11, 0.0  ;;  %v8163_v25 = vld [vmem:[#allocation85_spill] sm:$0xff]  ;;  %v8173_v11 = vld [vmem:[#allocation86_spill] sm:$0xff] }
 0x611   : > { %3777 = vset.pattern.permute.xlu1 %v7888_v63  ;;  %3786 = vset.pattern.permute.xlu0 %v7893_v36  ;;  %8155 = vst [vmem:[#allocation81_spill] sm:$0xff] %v5396_v7  ;;  %8156 = vst [vmem:[#allocation78_spill] sm:$0xff] %v5400_v58  ;;  %v2373_v20 = vmax.f32 %v2309_v8, 0.0  ;;  %v2655_v27 = vadd.f32 %v4514_v46, %v8163_v25  ;;  %v2374_v15 = vmax.f32 %v2310_v48, 0.0 }
 0x612   : > { %v5359_v24 = vpop.permute.xlu1 %1915  ;;  %1521 = vperm.xlu1 %3777, %v8084_v1   ;;  %1871 = vperm.xlu0 %3786, %v8096_v53   ;;  %v5369_v44 = vpop.permute.xlu0 %2265  ;;  %8160 = vst [vmem:[#allocation80_spill] sm:$0xff] %v5413_v29  ;;  %8161 = vst [vmem:[#allocation175_spill] sm:$0xff] %v5417_v28  ;;  %v2431_v7 = vadd.f32 %v5145_v59, %v2372_v60  ;;  %v5469_v58 = vadd.f32 %v4516_v4, %v8173_v11 }
 0x613   : > { %8147 = vst [vmem:[#allocation75_spill] sm:$0xff] %v5359_v24  ;;  %8148 = vst [vmem:[#allocation172_spill] sm:$0xff] %v5369_v44  ;;  %v5385_v44 = vadd.f32 %v1739_v0, %v1682_v43  ;;  %v5387_v24 = vadd.f32 %v1776_v17, %v1683_v55  ;;  %v2085_v17 = vadd.f32 %v5106_v62, %v2026_v45  ;;  %v2375_v0 = vmax.f32 %v2311_v23, 0.0 }
 0x614   : > { %v2654_v45 = vadd.f32 %v4499_v54, %v8163_v25  ;;  %v5448_v23 = vadd.f32 %v2122_v34, %v2029_v26  ;;  %v8170_v26 = vld [vmem:[#allocation84_spill] sm:$0xff]  ;;  %v5473_v59 = vadd.f32 %v4529_v18, %v8173_v11  ;;  %v5493_v60 = vadd.f32 %v2431_v7, %v2374_v15 }
 0x615   : > { %v5446_v48 = vadd.f32 %v2085_v17, %v2028_v21  ;;  %v2719_v17 = vmax.f32 %v2655_v27, 0.0  ;;  %v5461_v34 = vadd.f32 %v4499_v54, %v8170_v26  ;;  %v8176_v27 = vld [vmem:[#allocation87_spill] sm:$0xff]  ;;  %v3066_v7 = vmax.f32 %v5469_v58, 0.0 }
 0x616   : > { %1585 = vperm.xlu1 %3777, %v8120_v22   ;;  %1935 = vperm.xlu0 %3786, %v8106_v9   ;;  %v2718_v21 = vmax.f32 %v2654_v45, 0.0  ;;  %v5487_v11 = vadd.f32 %v4499_v54, %v8176_v27 }
 0x617   : > { %v5403_v43 = vpop.permute.xlu1 %2197  ;;  %v5409_v50 = vpop.permute.xlu0 %2547  ;;  %v2814_v29 = vadd.f32 %v5187_v19, %v2719_v17 }
 0x618   : > { %8157 = vst [vmem:[#allocation79_spill] sm:$0xff] %v5403_v43  ;;  %8158 = vst [vmem:[#allocation174_spill] sm:$0xff] %v5409_v50  ;;  %v8162_v43 = vld [vmem:[#allocation82_spill] sm:$0xff] }
 0x619   : > { %v5421_v55 = vadd.f32 %v4499_v54, %v8162_v43  ;;  %v5425_v62 = vadd.f32 %v4514_v46, %v8162_v43  ;;  %v8165_v43 = vld [vmem:[#allocation83_spill] sm:$0xff] }
 0x61a   : > { %3778 = vset.pattern.permute.xlu1 %v7893_v36  ;;  %3787 = vset.pattern.permute.xlu0 %v8012_v16  ;;  %v5440_v10 = vadd.f32 %v4494_v31, %v8165_v43  ;;  %v5444_v25 = vadd.f32 %v4496_v49, %v8165_v43 }
 0x61b   : > { %v5435_v13 = vpop.permute.xlu1 %2261  ;;  %1867 = vperm.xlu1 %3778, %v8084_v1   ;;  %2217 = vperm.xlu0 %3787, %v8096_v53   ;;  %v5451_v8 = vpop.permute.xlu0 %2611  ;;  %v2720_v36 = vmax.f32 %v5421_v55, 0.0  ;;  %v2721_v43 = vmax.f32 %v5425_v62, 0.0 }
 0x61c   : > { %8164 = vst [vmem:[#allocation82_spill] sm:$0xff] %v5435_v13  ;;  %8166 = vst [vmem:[#allocation85_spill] sm:$0xff] %v5440_v10  ;;  %v8169_v13 = vld [vmem:[#allocation165_spill] sm:$0xff] }
 0x61d   : > { %8167 = vst [vmem:[#allocation83_spill] sm:$0xff] %v5444_v25  ;;  %8168 = vst [vmem:[#allocation176_spill] sm:$0xff] %v5451_v8  ;;  %v2468_v50 = vadd.f32 %v8169_v13, %v2373_v20  ;;  %v5465_v8 = vadd.f32 %v4514_v46, %v8170_v26  ;;  %v8174_v20 = vld [vmem:[#allocation89_spill] sm:$0xff]  ;;  %v5491_v26 = vadd.f32 %v4514_v46, %v8176_v27  ;;  %v8186_v27 = vld [vmem:[#allocation90_spill] sm:$0xff] }
 0x61e   : > { %8171 = vst [vmem:[#allocation165_spill] sm:$0xff] %v5461_v34  ;;  %v3000_v55 = vadd.f32 %v4516_v4, %v8174_v20  ;;  %v3001_v62 = vadd.f32 %v4529_v18, %v8174_v20  ;;  %8177 = vst [vmem:[#allocation89_spill] sm:$0xff] %v5487_v11  ;;  %v2777_v20 = vadd.f32 %v5185_v52, %v2718_v21  ;;  %v8180_v25 = vld [vmem:[#allocation93_spill] sm:$0xff]  ;;  %v8184_v21 = vmov 5  }
 0x61f   : > { %8172 = vst [vmem:[#allocation84_spill] sm:$0xff] %v5465_v8  ;;  %1931 = vperm.xlu1 %3778, %v8120_v22   ;;  %2281 = vperm.xlu0 %3787, %v8106_v9   ;;  %8178 = vst [vmem:[#allocation87_spill] sm:$0xff] %v5491_v26  ;;  %v5495_v13 = vadd.f32 %v2468_v50, %v2375_v0  ;;  %v3348_v10 = vadd.f32 %v4545_v57, %v8180_v25  ;;  %v3067_v50 = vmax.f32 %v5473_v59, 0.0  ;;  %v8181_v0 = vld [vmem:[#allocation88_spill] sm:$0xff]  ;;  %v8191_v26 = vld [vmem:[#allocation95_spill] sm:$0xff] }
 0x620   : > { %v5483_v45 = vpop.permute.xlu1 %2543  ;;  %v5497_v28 = vpop.permute.xlu0 %2893  ;;  %v5512_v52 = vadd.f32 %v4516_v4, %v8181_v0  ;;  %v5516_v19 = vadd.f32 %v4529_v18, %v8181_v0  ;;  %v3064_v15 = vmax.f32 %v3000_v55, 0.0  ;;  %v3350_v63 = vadd.f32 %v4545_v57, %v8186_v27 }
 0x621   : > { %8175 = vst [vmem:[#allocation86_spill] sm:$0xff] %v5483_v45  ;;  %8179 = vst [vmem:[#allocation177_spill] sm:$0xff] %v5497_v28  ;;  %v3349_v45 = vadd.f32 %v4547_v2, %v8180_v25  ;;  %v3065_v25 = vmax.f32 %v3001_v62, 0.0  ;;  %v3351_v8 = vadd.f32 %v4547_v2, %v8186_v27  ;;  %v3412_v62 = vmax.f32 %v3348_v10, 0.0  ;;  %v8188_v28 = vld [vmem:[#allocation91_spill] sm:$0xff] }
 0x622   : > { %8182 = vst [vmem:[#allocation93_spill] sm:$0xff] %v5512_v52  ;;  %8183 = vst [vmem:[#allocation88_spill] sm:$0xff] %v5516_v19  ;;  %v5531_v34 = vadd.f32 %v2777_v20, %v2720_v36  ;;  %v5537_v58 = vadd.f32 %v4516_v4, %v8188_v28  ;;  %v5541_v59 = vadd.f32 %v4529_v18, %v8188_v28  ;;  %v8192_v28 = vld [vmem:[#allocation92_spill] sm:$0xff]  ;;  %v8198_v52 = vld [vmem:[#allocation109_spill] sm:$0xff] }
 0x623   : > { %3779 = vset.pattern.permute.xlu1 %v8012_v16  ;;  %3788 = vset.pattern.permute.xlu0 %v8184_v21  ;;  %v3413_v0 = vmax.f32 %v3349_v45, 0.0  ;;  %v927_v27 = vadd.f32 %v4475_v61, %v8191_v26  ;;  %v928_v11 = vadd.f32 %v4477_v40, %v8191_v26  ;;  %v3414_v45 = vmax.f32 %v3350_v63, 0.0 }
 0x624   : > { %v5519_v17 = vpop.permute.xlu1 %2607  ;;  %2213 = vperm.xlu1 %3779, %v8084_v1   ;;  %2563 = vperm.xlu0 %3788, %v8096_v53   ;;  %v5529_v55 = vpop.permute.xlu0 %2957  ;;  %8189 = vst [vmem:[#allocation91_spill] sm:$0xff] %v5537_v58  ;;  %8190 = vst [vmem:[#allocation179_spill] sm:$0xff] %v5541_v59  ;;  %v3415_v20 = vmax.f32 %v3351_v8, 0.0  ;;  %v930_v16 = vadd.f32 %v4477_v40, %v8192_v28  ;;  %v3470_v36 = vadd.f32 %v5272_v32, %v3412_v62 }
 0x625   : > { %8185 = vst [vmem:[#allocation178_spill] sm:$0xff] %v5519_v17  ;;  %8187 = vst [vmem:[#allocation90_spill] sm:$0xff] %v5529_v55  ;;  %v5533_v17 = vadd.f32 %v2814_v29, %v2721_v43  ;;  %v3123_v29 = vadd.f32 %v5232_v30, %v3064_v15  ;;  %v3160_v43 = vadd.f32 %v5239_v6, %v3065_v25  ;;  %v8194_v15 = vld [vmem:[#allocation94_spill] sm:$0xff]  ;;  %v991_v10 = vmax.f32 %v927_v27, 0.0 }
 0x626   : > { %v929_v55 = vadd.f32 %v4475_v61, %v8192_v28  ;;  %v3507_v30 = vadd.f32 %v5294_v42, %v3413_v0  ;;  %v5563_v6 = vadd.f32 %v4475_v61, %v8194_v15  ;;  %v5567_v63 = vadd.f32 %v4477_v40, %v8194_v15 }
 0x627   : > { %v992_v19 = vmax.f32 %v928_v11, 0.0  ;;  %v1274_v32 = vadd.f32 %v4482_v5, %v8198_v52  ;;  %v1275_v42 = vadd.f32 %v4484_v47, %v8198_v52  ;;  %v5577_v62 = vadd.f32 %v3123_v29, %v3066_v7 }
 0x628   : > { %2277 = vperm.xlu1 %3779, %v8120_v22   ;;  %2627 = vperm.xlu0 %3788, %v8106_v9   ;;  %8195 = vst [vmem:[#allocation92_spill] sm:$0xff] %v5563_v6  ;;  %8196 = vst [vmem:[#allocation94_spill] sm:$0xff] %v5567_v63  ;;  %v5579_v0 = vadd.f32 %v3160_v43, %v3067_v50  ;;  %v993_v15 = vmax.f32 %v929_v55, 0.0  ;;  %v8200_v27 = vmov 6   ;;  %v5592_v52 = vadd.f32 %v3470_v36, %v3414_v45  ;;  %v8202_v43 = vld [vmem:[#allocation97_spill] sm:$0xff]  ;;  %v8211_v63 = vld [vmem:[#allocation142_spill] sm:$0xff] }
 0x629   : > { %v5557_v26 = vpop.permute.xlu1 %2889  ;;  %v5569_v8 = vpop.permute.xlu0 %3243  ;;  %v5594_v55 = vadd.f32 %v3507_v30, %v3415_v20  ;;  %v1085_v29 = vadd.f32 %v5313_v41, %v992_v19  ;;  %v5605_v59 = vadd.f32 %v4477_v40, %v8202_v43  ;;  %v1338_v36 = vmax.f32 %v1274_v32, 0.0  ;;  %v8206_v20 = vld [vmem:[#allocation126_spill] sm:$0xff]  ;;  %v8207_v19 = vld [vmem:[#allocation112_spill] sm:$0xff] }
 0x62a   : > { %8193 = vst [vmem:[#allocation95_spill] sm:$0xff] %v5557_v26  ;;  %8197 = vst [vmem:[#allocation180_spill] sm:$0xff] %v5569_v8  ;;  %v994_v8 = vmax.f32 %v930_v16, 0.0  ;;  %v8199_v26 = vld [vmem:[#allocation96_spill] sm:$0xff]  ;;  %v1048_v16 = vadd.f32 %v5311_v51, %v991_v10  ;;  %v1339_v45 = vmax.f32 %v1275_v42, 0.0  ;;  %v1620_v30 = vadd.f32 %v4486_v35, %v8206_v20 }
 0x62b   : > { %v1276_v25 = vadd.f32 %v4482_v5, %v8199_v26  ;;  %v1277_v11 = vadd.f32 %v4484_v47, %v8199_v26  ;;  %v5601_v26 = vadd.f32 %v4475_v61, %v8202_v43  ;;  %8204 = vst [vmem:[#allocation97_spill] sm:$0xff] %v5605_v59  ;;  %v1621_v51 = vadd.f32 %v4488_v56, %v8206_v20  ;;  %v8208_v43 = vld [vmem:[#allocation100_spill] sm:$0xff]  ;;  %v8214_v61 = vld [vmem:[#allocation129_spill] sm:$0xff] }
 0x62c   : > { %3780 = vset.pattern.permute.xlu1 %v8184_v21  ;;  %3789 = vset.pattern.permute.xlu0 %v8200_v27  ;;  %v1622_v50 = vadd.f32 %v4486_v35, %v8207_v19  ;;  %v1623_v58 = vadd.f32 %v4488_v56, %v8207_v19  ;;  %v5620_v32 = vadd.f32 %v4482_v5, %v8208_v43  ;;  %v1684_v21 = vmax.f32 %v1620_v30, 0.0 }
 0x62d   : > { %v5587_v28 = vpop.permute.xlu1 %2953  ;;  %2559 = vperm.xlu1 %3780, %v8084_v1   ;;  %2909 = vperm.xlu0 %3789, %v8096_v53   ;;  %8203 = vst [vmem:[#allocation96_spill] sm:$0xff] %v5601_v26  ;;  %v1340_v10 = vmax.f32 %v1276_v25, 0.0  ;;  %v1341_v41 = vmax.f32 %v1277_v11, 0.0  ;;  %v5624_v42 = vadd.f32 %v4484_v47, %v8208_v43  ;;  %v1966_v25 = vadd.f32 %v4490_v39, %v8211_v63 }
 0x62e   : > { %8201 = vst [vmem:[#allocation109_spill] sm:$0xff] %v5587_v28  ;;  %v5607_v7 = vpop.permute.xlu0 %804  ;;  %8209 = vst [vmem:[#allocation126_spill] sm:$0xff] %v5620_v32  ;;  %v1967_v11 = vadd.f32 %v4492_v3, %v8211_v63  ;;  %v5635_v28 = vadd.f32 %v1048_v16, %v993_v15  ;;  %v5637_v32 = vadd.f32 %v1085_v29, %v994_v8  ;;  %v1685_v63 = vmax.f32 %v1621_v51, 0.0  ;;  %v8215_v8 = vld [vmem:[#allocation118_spill] sm:$0xff] }
 0x62f   : > { %8205 = vst [vmem:[#allocation181_spill] sm:$0xff] %v5607_v7  ;;  %8210 = vst [vmem:[#allocation112_spill] sm:$0xff] %v5624_v42  ;;  %v1395_v42 = vadd.f32 %v5364_v14, %v1338_v36  ;;  %v1432_v7 = vadd.f32 %v5366_v38, %v1339_v45  ;;  %v1686_v40 = vmax.f32 %v1622_v50, 0.0  ;;  %v1969_v6 = vadd.f32 %v4492_v3, %v8214_v61  ;;  %v8222_v36 = vld [vmem:[#allocation61_spill] sm:$0xff]  ;;  %v8223_v51 = vld [vmem:[#allocation22_spill] sm:$0xff] }
 0x630   : > { %v5650_v15 = vadd.f32 %v4482_v5, %v8215_v8  ;;  %v5654_v14 = vadd.f32 %v4484_v47, %v8215_v8  ;;  %v2030_v38 = vmax.f32 %v1966_v25, 0.0  ;;  %v2031_v16 = vmax.f32 %v1967_v11, 0.0 }
 0x631   : > { %2623 = vperm.xlu1 %3780, %v8120_v22   ;;  %2973 = vperm.xlu0 %3789, %v8106_v9   ;;  %v1687_v9 = vmax.f32 %v1623_v58, 0.0  ;;  %v8218_v50 = vmov 7   ;;  %v8219_v58 = vld [vmem:[#allocation120_spill] sm:$0xff]  ;;  %v1278_v45 = vadd.f32 %v4482_v5, %v8222_v36  ;;  %v1279_v30 = vadd.f32 %v4484_v47, %v8222_v36 }
 0x632   : > { %v5631_v20 = vpop.permute.xlu1 %3239  ;;  %v5639_v43 = vpop.permute.xlu0 %884  ;;  %8216 = vst [vmem:[#allocation129_spill] sm:$0xff] %v5650_v15  ;;  %8217 = vst [vmem:[#allocation118_spill] sm:$0xff] %v5654_v14  ;;  %v5660_v29 = vadd.f32 %v4486_v35, %v8219_v58  ;;  %v1778_v11 = vadd.f32 %v5387_v24, %v1685_v63  ;;  %v1396_v8 = vadd.f32 %v1395_v42, %v1340_v10  ;;  %v8224_v14 = vld [vmem:[#allocation144_spill] sm:$0xff]  ;;  %v8226_v10 = vmov 0  }
 0x633   : > { %8212 = vst [vmem:[#allocation100_spill] sm:$0xff] %v5631_v20  ;;  %8213 = vst [vmem:[#allocation142_spill] sm:$0xff] %v5639_v43  ;;  %v1968_v20 = vadd.f32 %v4490_v39, %v8214_v61  ;;  %v5664_v61 = vadd.f32 %v4488_v56, %v8219_v58  ;;  %v1433_v19 = vadd.f32 %v1432_v7, %v1341_v41  ;;  %v2033_v58 = vmax.f32 %v1969_v6, 0.0  ;;  %v8228_v41 = vld [vmem:[#allocation26_spill] sm:$0xff] }
 0x634   : > { %8220 = vst [vmem:[#allocation120_spill] sm:$0xff] %v5660_v29  ;;  %v2087_v36 = vadd.f32 %v5446_v48, %v2030_v38  ;;  %v2124_v29 = vadd.f32 %v5448_v23, %v2031_v16  ;;  %v5689_v24 = vadd.f32 %v4496_v49, %v8224_v14  ;;  %v1342_v7 = vmax.f32 %v1278_v45, 0.0  ;;  %v8229_v38 = vld [vmem:[#allocation24_spill] sm:$0xff] }
 0x635   : > { %3781 = vset.pattern.permute.xlu1 %v8200_v27  ;;  %3798 = vset.pattern.permute.xlu0 %v8218_v50  ;;  %8221 = vst [vmem:[#allocation182_spill] sm:$0xff] %v5664_v61  ;;  %v2032_v26 = vmax.f32 %v1968_v20, 0.0  ;;  %v1343_v48 = vmax.f32 %v1279_v30, 0.0  ;;  %v5701_v42 = vadd.f32 %v4499_v54, %v8228_v41  ;;  %v5705_v20 = vadd.f32 %v4514_v46, %v8228_v41 }
 0x636   : > { %2905 = vperm.xlu1 %3781, %v8084_v1   ;;  %3259 = vperm.xlu0 %3798, %v8223_v51   ;;  %v1741_v1 = vadd.f32 %v5385_v44, %v1684_v21  ;;  %v5685_v44 = vadd.f32 %v4494_v31, %v8224_v14  ;;  %v8225_v21 = vld [vmem:[#allocation27_spill] sm:$0xff]  ;;  %v1779_v14 = vadd.f32 %v1778_v11, %v1687_v9 }
 0x637   : > { %v5671_v25 = vpop.permute.xlu1 %799  ;;  %v1172_v59 = vpop.permute.xlu0 %1171  ;;  %v2312_v6 = vadd.f32 %v4494_v31, %v8225_v21  ;;  %v5720_v9 = vadd.f32 %v2087_v36, %v2032_v26  ;;  %v1397_v27 = vadd.f32 %v1396_v8, %v1342_v7  ;;  %v1625_v26 = vadd.f32 %v4488_v56, %v5247_v12 }
 0x638   : > { %v5676_v43 = vadd.f32 %v4482_v5, %v1172_v59  ;;  %v5679_v61 = vadd.f32 %v4484_v47, %v1172_v59  ;;  %v2313_v59 = vadd.f32 %v4496_v49, %v8225_v21  ;;  %v1742_v63 = vadd.f32 %v1741_v1, %v1686_v40  ;;  %v8230_v21 = vld [vmem:[#allocation164_spill] sm:$0xff] }
 0x639   : > { %v1280_v45 = vadd.f32 %v4482_v5, %v8230_v21  ;;  %v1281_v30 = vadd.f32 %v4484_v47, %v8230_v21  ;;  %v2378_v41 = vmax.f32 %v5685_v44, 0.0  ;;  %v2379_v40 = vmax.f32 %v5689_v24, 0.0 }
 0x63a   : > { %2969 = vperm.xlu1 %3781, %v8120_v22   ;;  %3799 = vset.pattern.permute.xlu0 %v8226_v10  ;;  %v5722_v1 = vadd.f32 %v2124_v29, %v2033_v58  ;;  %v2376_v11 = vmax.f32 %v2312_v6, 0.0  ;;  %v2377_v15 = vmax.f32 %v2313_v59, 0.0  ;;  %v1434_v21 = vadd.f32 %v1433_v19, %v1343_v48  ;;  %v8233_v29 = vld [vmem:[#allocation25_spill] sm:$0xff]  ;;  %v8234_v6 = vld [vmem:[#allocation32_spill] sm:$0xff] }
 0x63b   : > { %v5697_v23 = vpop.permute.xlu1 %879  ;;  %824 = vperm.xlu0 %3799, %v8229_v38   ;;  %v1236_v16 = vpop.permute.xlu0 %1235  ;;  %v1624_v44 = vadd.f32 %v4486_v35, %v5247_v12  ;;  %v1344_v36 = vmax.f32 %v1280_v45, 0.0  ;;  %v1345_v24 = vmax.f32 %v1281_v30, 0.0  ;;  %v2658_v59 = vadd.f32 %v4499_v54, %v8234_v6 }
 0x63c   : > { %8227 = vst [vmem:[#allocation61_spill] sm:$0xff] %v5697_v23  ;;  %v5713_v23 = vadd.f32 %v4482_v5, %v1236_v16  ;;  %v5716_v22 = vadd.f32 %v4484_v47, %v1236_v16  ;;  %v2659_v7 = vadd.f32 %v4514_v46, %v8234_v6 }
 0x63d   : > { %v1398_v30 = vadd.f32 %v1397_v27, %v1344_v36 }
 0x63e   : > { %8231 = vst [vmem:[#allocation22_spill] sm:$0xff] %v5713_v23  ;;  %8232 = vst [vmem:[#allocation144_spill] sm:$0xff] %v5716_v22  ;;  %3790 = vset.pattern.permute.xlu1 %v8218_v50  ;;  %v1435_v23 = vadd.f32 %v1434_v21, %v1345_v24  ;;  %v2470_v22 = vadd.f32 %v5495_v13, %v2377_v15 }
 0x63f   : > { %3255 = vperm.xlu1 %3790, %v8096_v53   ;;  %904 = vperm.xlu0 %3799, %v8233_v29  }
 0x640   : > { %v1168_v58 = vpop.permute.xlu1 %1167  ;;  %v1518_v53 = vpop.permute.xlu0 %1517 }
 0x641   : > { %v1282_v8 = vadd.f32 %v4482_v5, %v1168_v58  ;;  %v1283_v19 = vadd.f32 %v4484_v47, %v1168_v58  ;;  %v5740_v48 = vadd.f32 %v4486_v35, %v1518_v53  ;;  %v5743_v12 = vadd.f32 %v4488_v56, %v1518_v53 }
 0x642   : > { %v2433_v58 = vadd.f32 %v5493_v60, %v2376_v11  ;;  %v1688_v47 = vmax.f32 %v1624_v44, 0.0  ;;  %v1689_v5 = vmax.f32 %v1625_v26, 0.0  ;;  %v1348_v53 = vmax.f32 %v5676_v43, 0.0  ;;  %v8235_v60 = vld [vmem:[#allocation57_spill] sm:$0xff] }
 0x643   : > { %v1346_v16 = vmax.f32 %v1282_v8, 0.0  ;;  %v1347_v45 = vmax.f32 %v1283_v19, 0.0  ;;  %3791 = vset.pattern.permute.xlu1 %v8226_v10  ;;  %3800 = vset.pattern.permute.xlu0 %v7883_v37  ;;  %v1349_v8 = vmax.f32 %v5679_v61, 0.0  ;;  %v1626_v13 = vadd.f32 %v4486_v35, %v8235_v60 }
 0x644   : > { %v5749_v6 = vpop.permute.xlu1 %1231  ;;  %819 = vperm.xlu1 %3791, %v8223_v51   ;;  %1187 = vperm.xlu0 %3800, %v8229_v38   ;;  %v1582_v10 = vpop.permute.xlu0 %1581  ;;  %v1627_v15 = vadd.f32 %v4488_v56, %v8235_v60  ;;  %v2722_v43 = vmax.f32 %v2658_v59, 0.0  ;;  %v2723_v26 = vmax.f32 %v2659_v7, 0.0  ;;  %v1780_v36 = vadd.f32 %v1779_v14, %v1689_v5 }
 0x645   : > { %v1399_v27 = vadd.f32 %v1398_v30, %v1346_v16  ;;  %v1436_v21 = vadd.f32 %v1435_v23, %v1347_v45  ;;  %v5760_v11 = vadd.f32 %v4486_v35, %v1582_v10  ;;  %v5763_v44 = vadd.f32 %v4488_v56, %v1582_v10  ;;  %v8238_v45 = vld [vmem:[#allocation23_spill] sm:$0xff]  ;;  %v8239_v30 = vld [vmem:[#allocation154_spill] sm:$0xff] }
 0x646   : > { %v1743_v16 = vadd.f32 %v1742_v63, %v1688_v47  ;;  %v5769_v24 = vadd.f32 %v2433_v58, %v2378_v41  ;;  %v5771_v19 = vadd.f32 %v2470_v22, %v2379_v40  ;;  %v5776_v60 = vadd.f32 %v4516_v4, %v8239_v30 }
 0x647   : > { %8236 = vst [vmem:[#allocation27_spill] sm:$0xff] %v5760_v11  ;;  %8237 = vst [vmem:[#allocation26_spill] sm:$0xff] %v5763_v44  ;;  %v5765_v61 = vadd.f32 %v1399_v27, %v1348_v53  ;;  %v5767_v23 = vadd.f32 %v1436_v21, %v1349_v8  ;;  %v5780_v59 = vadd.f32 %v4529_v18, %v8239_v30  ;;  %v1690_v22 = vmax.f32 %v1626_v13, 0.0 }
 0x648   : > { %899 = vperm.xlu1 %3791, %v8238_v45   ;;  %v1970_v7 = vadd.f32 %v4490_v39, %v5323_v33  ;;  %v1971_v47 = vadd.f32 %v4492_v3, %v5323_v33  ;;  %1251 = vperm.xlu0 %3800, %v8233_v29   ;;  %v1691_v63 = vmax.f32 %v1627_v15, 0.0  ;;  %v2779_v58 = vadd.f32 %v5531_v34, %v2722_v43 }
 0x649   : > { %v1514_v5 = vpop.permute.xlu1 %1513  ;;  %v1864_v40 = vpop.permute.xlu0 %1863  ;;  %v2816_v53 = vadd.f32 %v5533_v17, %v2723_v26  ;;  %v1744_v10 = vadd.f32 %v1743_v16, %v1690_v22  ;;  %v1695_v34 = vmax.f32 %v5743_v12, 0.0  ;;  %v8240_v43 = vmov 2   ;;  %v8246_v22 = vld [vmem:[#allocation158_spill] sm:$0xff] }
 0x64a   : > { %v1628_v14 = vadd.f32 %v4486_v35, %v1514_v5  ;;  %v1629_v41 = vadd.f32 %v4488_v56, %v1514_v5  ;;  %v5792_v8 = vadd.f32 %v4490_v39, %v1864_v40  ;;  %v5795_v27 = vadd.f32 %v4492_v3, %v1864_v40 }
 0x64b   : > { %v1781_v13 = vadd.f32 %v1780_v36, %v1691_v63  ;;  %v2034_v15 = vmax.f32 %v1970_v7, 0.0  ;;  %v2035_v30 = vmax.f32 %v1971_v47, 0.0  ;;  %v1694_v5 = vmax.f32 %v5740_v48, 0.0  ;;  %v8243_v36 = vld [vmem:[#allocation64_spill] sm:$0xff] }
 0x64c   : > { %v1692_v33 = vmax.f32 %v1628_v14, 0.0  ;;  %v1693_v21 = vmax.f32 %v1629_v41, 0.0  ;;  %3792 = vset.pattern.permute.xlu1 %v7883_v37  ;;  %3801 = vset.pattern.permute.xlu0 %v8240_v43  ;;  %v1972_v48 = vadd.f32 %v4490_v39, %v8243_v36  ;;  %v1973_v12 = vadd.f32 %v4492_v3, %v8243_v36 }
 0x64d   : > { %v1578_v17 = vpop.permute.xlu1 %1577  ;;  %1183 = vperm.xlu1 %3792, %v8223_v51   ;;  %1533 = vperm.xlu0 %3801, %v8229_v38   ;;  %v1928_v37 = vpop.permute.xlu0 %1927  ;;  %v3004_v63 = vadd.f32 %v4516_v4, %v8246_v22  ;;  %v3005_v41 = vadd.f32 %v4529_v18, %v8246_v22  ;;  %v2126_v36 = vadd.f32 %v5722_v1, %v2035_v30 }
 0x64e   : > { %v1745_v26 = vadd.f32 %v1744_v10, %v1692_v33  ;;  %v1782_v40 = vadd.f32 %v1781_v13, %v1693_v21  ;;  %v5803_v14 = vadd.f32 %v4486_v35, %v1578_v17  ;;  %v5806_v16 = vadd.f32 %v4488_v56, %v1578_v17 }
 0x64f   : > { %v5814_v7 = vadd.f32 %v4490_v39, %v1928_v37  ;;  %v5817_v47 = vadd.f32 %v4492_v3, %v1928_v37  ;;  %v2089_v17 = vadd.f32 %v5720_v9, %v2034_v15  ;;  %v8247_v37 = vld [vmem:[#allocation79_spill] sm:$0xff]  ;;  %v2036_v1 = vmax.f32 %v1972_v48, 0.0 }
 0x650   : > { %8241 = vst [vmem:[#allocation24_spill] sm:$0xff] %v5803_v14  ;;  %8242 = vst [vmem:[#allocation164_spill] sm:$0xff] %v5806_v16  ;;  %v5823_v33 = vadd.f32 %v1745_v26, %v1694_v5  ;;  %v5825_v21 = vadd.f32 %v1782_v40, %v1695_v34  ;;  %v2317_v22 = vadd.f32 %v4496_v49, %v8247_v37  ;;  %v8248_v5 = vmax.f32 %v5701_v42, 0.0 }
 0x651   : > { %8244 = vst [vmem:[#allocation25_spill] sm:$0xff] %v5814_v7  ;;  %8245 = vst [vmem:[#allocation32_spill] sm:$0xff] %v5817_v47  ;;  %1247 = vperm.xlu1 %3792, %v8238_v45   ;;  %v2316_v47 = vadd.f32 %v4494_v31, %v8247_v37  ;;  %v8249_v26 = vmax.f32 %v5705_v20, 0.0  ;;  %1597 = vperm.xlu0 %3801, %v8233_v29   ;;  %v2037_v15 = vmax.f32 %v1973_v12, 0.0  ;;  %v3068_v7 = vmax.f32 %v3004_v63, 0.0 }
 0x652   : > { %v5838_v34 = vadd.f32 %v2779_v58, %v8248_v5  ;;  %v1860_v9 = vpop.permute.xlu1 %1859  ;;  %v2210_v10 = vpop.permute.xlu0 %2209  ;;  %v3069_v37 = vmax.f32 %v3005_v41, 0.0  ;;  %v2090_v5 = vadd.f32 %v2089_v17, %v2036_v1  ;;  %v2381_v12 = vmax.f32 %v2317_v22, 0.0  ;;  %v8256_v22 = vld [vmem:[#allocation161_spill] sm:$0xff] }
 0x653   : > { %v5842_v40 = vadd.f32 %v2816_v53, %v8249_v26  ;;  %v1974_v30 = vadd.f32 %v4490_v39, %v1860_v9  ;;  %v1975_v13 = vadd.f32 %v4492_v3, %v1860_v9  ;;  %v5848_v42 = vadd.f32 %v4494_v31, %v2210_v10 }
 0x654   : > { %v5851_v58 = vadd.f32 %v4496_v49, %v2210_v10  ;;  %v2127_v26 = vadd.f32 %v2126_v36, %v2037_v15  ;;  %v2380_v48 = vmax.f32 %v2316_v47, 0.0  ;;  %v2040_v16 = vmax.f32 %v5792_v8, 0.0  ;;  %v8253_v47 = vld [vmem:[#allocation171_spill] sm:$0xff] }
 0x655   : > { %v2038_v20 = vmax.f32 %v1974_v30, 0.0  ;;  %v2039_v53 = vmax.f32 %v1975_v13, 0.0  ;;  %3793 = vset.pattern.permute.xlu1 %v8240_v43  ;;  %v2041_v9 = vmax.f32 %v5795_v27, 0.0  ;;  %v8250_v63 = vmov 3  }
 0x656   : > { %3802 = vset.pattern.permute.xlu0 %v8250_v63  ;;  %v1924_v41 = vpop.permute.xlu1 %1923  ;;  %1529 = vperm.xlu1 %3793, %v8223_v51   ;;  %v2274_v43 = vpop.permute.xlu0 %2273  ;;  %v2318_v8 = vadd.f32 %v4494_v31, %v8253_v47  ;;  %v2319_v27 = vadd.f32 %v4496_v49, %v8253_v47  ;;  %v3352_v1 = vadd.f32 %v4545_v57, %v8256_v22  ;;  %v2386_v44 = vmax.f32 %v5848_v42, 0.0 }
 0x657   : > { %v2091_v14 = vadd.f32 %v2090_v5, %v2038_v20  ;;  %v2128_v10 = vadd.f32 %v2127_v26, %v2039_v53  ;;  %v5859_v30 = vadd.f32 %v4490_v39, %v1924_v41  ;;  %v5862_v13 = vadd.f32 %v4492_v3, %v1924_v41  ;;  %1879 = vperm.xlu0 %3802, %v8229_v38   ;;  %v8257_v5 = vld [vmem:[#allocation159_spill] sm:$0xff] }
 0x658   : > { %v5870_v17 = vadd.f32 %v4494_v31, %v2274_v43  ;;  %v5873_v36 = vadd.f32 %v4496_v49, %v2274_v43  ;;  %v3353_v15 = vadd.f32 %v4547_v2, %v8256_v22  ;;  %v5885_v26 = vadd.f32 %v4545_v57, %v8257_v5 }
 0x659   : > { %8251 = vst [vmem:[#allocation57_spill] sm:$0xff] %v5859_v30  ;;  %8252 = vst [vmem:[#allocation23_spill] sm:$0xff] %v5862_v13  ;;  %v5879_v20 = vadd.f32 %v2091_v14, %v2040_v16  ;;  %v5881_v53 = vadd.f32 %v2128_v10, %v2041_v9  ;;  %v5889_v41 = vadd.f32 %v4547_v2, %v8257_v5  ;;  %v8258_v16 = vld [vmem:[#allocation86_spill] sm:$0xff] }
 0x65a   : > { %8254 = vst [vmem:[#allocation154_spill] sm:$0xff] %v5870_v17  ;;  %8255 = vst [vmem:[#allocation64_spill] sm:$0xff] %v5873_v36  ;;  %v2435_v43 = vadd.f32 %v5769_v24, %v2380_v48  ;;  %v2472_v47 = vadd.f32 %v5771_v19, %v2381_v12  ;;  %1593 = vperm.xlu1 %3793, %v8238_v45   ;;  %v3125_v22 = vadd.f32 %v5577_v62, %v3068_v7 }
 0x65b   : > { %v3162_v14 = vadd.f32 %v5579_v0, %v3069_v37  ;;  %v2662_v9 = vadd.f32 %v4499_v54, %v8258_v16  ;;  %v2663_v10 = vadd.f32 %v4514_v46, %v8258_v16  ;;  %1943 = vperm.xlu0 %3802, %v8233_v29   ;;  %v2206_v5 = vpop.permute.xlu1 %2205  ;;  %v2382_v36 = vmax.f32 %v2318_v8, 0.0  ;;  %v2556_v48 = vpop.permute.xlu0 %2555 }
 0x65c   : > { %v2383_v17 = vmax.f32 %v2319_v27, 0.0  ;;  %v2320_v24 = vadd.f32 %v4494_v31, %v2206_v5  ;;  %v2321_v19 = vadd.f32 %v4496_v49, %v2206_v5  ;;  %v3416_v12 = vmax.f32 %v3352_v1, 0.0 }
 0x65d   : > { %v3417_v62 = vmax.f32 %v3353_v15, 0.0  ;;  %v5904_v0 = vadd.f32 %v4499_v54, %v2556_v48  ;;  %v5907_v7 = vadd.f32 %v4514_v46, %v2556_v48  ;;  %v2436_v13 = vadd.f32 %v2435_v43, %v2382_v36  ;;  %v8262_v36 = vld [vmem:[#allocation174_spill] sm:$0xff] }
 0x65e   : > { %v2384_v37 = vmax.f32 %v2320_v24, 0.0  ;;  %v2385_v16 = vmax.f32 %v2321_v19, 0.0  ;;  %v2473_v30 = vadd.f32 %v2472_v47, %v2383_v17  ;;  %3794 = vset.pattern.permute.xlu1 %v8250_v63  ;;  %v2726_v8 = vmax.f32 %v2662_v9, 0.0 }
 0x65f   : > { %v2727_v27 = vmax.f32 %v2663_v10, 0.0  ;;  %v2387_v5 = vmax.f32 %v5851_v58, 0.0  ;;  %v8259_v1 = vmov 4   ;;  %v2270_v15 = vpop.permute.xlu1 %2269  ;;  %1875 = vperm.xlu1 %3794, %v8223_v51   ;;  %v2620_v63 = vpop.permute.xlu0 %2619  ;;  %v2664_v42 = vadd.f32 %v4499_v54, %v8262_v36 }
 0x660   : > { %3803 = vset.pattern.permute.xlu0 %v8259_v1  ;;  %v2437_v11 = vadd.f32 %v2436_v13, %v2384_v37  ;;  %v2474_v48 = vadd.f32 %v2473_v30, %v2385_v16  ;;  %v5915_v24 = vadd.f32 %v4494_v31, %v2270_v15  ;;  %v5918_v17 = vadd.f32 %v4496_v49, %v2270_v15 }
 0x661   : > { %2225 = vperm.xlu0 %3803, %v8229_v38   ;;  %v2665_v58 = vadd.f32 %v4514_v46, %v8262_v36  ;;  %v5926_v43 = vadd.f32 %v4499_v54, %v2620_v63  ;;  %v5929_v30 = vadd.f32 %v4514_v46, %v2620_v63  ;;  %v3418_v13 = vmax.f32 %v5885_v26, 0.0 }
 0x662   : > { %8260 = vst [vmem:[#allocation158_spill] sm:$0xff] %v5915_v24  ;;  %8261 = vst [vmem:[#allocation79_spill] sm:$0xff] %v5918_v17  ;;  %v3419_v47 = vmax.f32 %v5889_v41, 0.0  ;;  %v5933_v9 = vadd.f32 %v2437_v11, %v2386_v44  ;;  %v5935_v10 = vadd.f32 %v2474_v48, %v2387_v5  ;;  %v2781_v19 = vadd.f32 %v5838_v34, %v2726_v8  ;;  %v8267_v11 = vld [vmem:[#allocation95_spill] sm:$0xff] }
 0x663   : > { %8263 = vst [vmem:[#allocation171_spill] sm:$0xff] %v5926_v43  ;;  %8264 = vst [vmem:[#allocation161_spill] sm:$0xff] %v5929_v30  ;;  %v2818_v37 = vadd.f32 %v5842_v40, %v2727_v27  ;;  %v8265_v16 = vmax.f32 %v5776_v60, 0.0  ;;  %v8266_v36 = vmax.f32 %v5780_v59, 0.0  ;;  %1939 = vperm.xlu1 %3794, %v8238_v45   ;;  %v3472_v26 = vadd.f32 %v5592_v52, %v3416_v12  ;;  %v8268_v27 = vld [vmem:[#allocation51_spill] sm:$0xff]  ;;  %v8269_v52 = vld [vmem:[#allocation98_spill] sm:$0xff] }
 0x664   : > { %v3509_v41 = vadd.f32 %v5594_v55, %v3417_v62  ;;  %v3008_v44 = vadd.f32 %v4516_v4, %v8267_v11  ;;  %v3009_v34 = vadd.f32 %v4529_v18, %v8267_v11  ;;  %v2552_v40 = vpop.permute.xlu1 %2551  ;;  %v2728_v60 = vmax.f32 %v2664_v42, 0.0  ;;  %v2902_v8 = vpop.permute.xlu0 %2901  ;;  %v8270_v55 = vld [vmem:[#allocation99_spill] sm:$0xff] }
 0x665   : > { %v3126_v15 = vadd.f32 %v3125_v22, %v8265_v16  ;;  %v3163_v43 = vadd.f32 %v3162_v14, %v8266_v36  ;;  %2289 = vperm.xlu0 %3803, %v8233_v29   ;;  %v2729_v22 = vmax.f32 %v2665_v58, 0.0  ;;  %v2666_v59 = vadd.f32 %v4499_v54, %v2552_v40 }
 0x666   : > { %v2667_v14 = vadd.f32 %v4514_v46, %v2552_v40  ;;  %v931_v12 = vadd.f32 %v8269_v52, %v8268_v27  ;;  %v932_v62 = vadd.f32 %v8270_v55, %v8268_v27  ;;  %v5958_v5 = vadd.f32 %v4516_v4, %v2902_v8 }
 0x667   : > { %v5961_v48 = vadd.f32 %v4529_v18, %v2902_v8  ;;  %v2730_v63 = vmax.f32 %v2666_v59, 0.0  ;;  %v2782_v58 = vadd.f32 %v2781_v19, %v2728_v60  ;;  %v2819_v16 = vadd.f32 %v2818_v37, %v2729_v22  ;;  %3795 = vset.pattern.permute.xlu1 %v8259_v1  ;;  %v8274_v37 = vld [vmem:[#allocation177_spill] sm:$0xff] }
 0x668   : > { %v2731_v42 = vmax.f32 %v2667_v14, 0.0  ;;  %v3072_v36 = vmax.f32 %v3008_v44, 0.0  ;;  %v3073_v11 = vmax.f32 %v3009_v34, 0.0  ;;  %v2732_v40 = vmax.f32 %v5904_v0, 0.0  ;;  %v2616_v27 = vpop.permute.xlu1 %2615  ;;  %2221 = vperm.xlu1 %3795, %v8223_v51   ;;  %v2966_v1 = vpop.permute.xlu0 %2965 }
 0x669   : > { %v2733_v30 = vmax.f32 %v5907_v7, 0.0  ;;  %v8271_v17 = vmov 5   ;;  %v2783_v24 = vadd.f32 %v2782_v58, %v2730_v63  ;;  %v5969_v59 = vadd.f32 %v4499_v54, %v2616_v27 }
 0x66a   : > { %3804 = vset.pattern.permute.xlu0 %v8271_v17  ;;  %v2820_v8 = vadd.f32 %v2819_v16, %v2731_v42  ;;  %v5972_v19 = vadd.f32 %v4514_v46, %v2616_v27  ;;  %v3010_v0 = vadd.f32 %v4516_v4, %v8274_v37  ;;  %v3011_v7 = vadd.f32 %v4529_v18, %v8274_v37  ;;  %v8277_v42 = vld [vmem:[#allocation44_spill] sm:$0xff] }
 0x66b   : > { %8272 = vst [vmem:[#allocation159_spill] sm:$0xff] %v5969_v59  ;;  %2571 = vperm.xlu0 %3804, %v8229_v38   ;;  %v5980_v44 = vadd.f32 %v4516_v4, %v2966_v1  ;;  %v5983_v34 = vadd.f32 %v4529_v18, %v2966_v1  ;;  %v995_v60 = vmax.f32 %v931_v12, 0.0  ;;  %v996_v22 = vmax.f32 %v932_v62, 0.0 }
 0x66c   : > { %8273 = vst [vmem:[#allocation86_spill] sm:$0xff] %v5972_v19  ;;  %v5985_v14 = vadd.f32 %v2783_v24, %v2732_v40  ;;  %v5987_v63 = vadd.f32 %v2820_v8, %v2733_v30  ;;  %v933_v58 = vadd.f32 %v8269_v52, %v8277_v42  ;;  %v934_v16 = vadd.f32 %v8270_v55, %v8277_v42 }
 0x66d   : > { %8275 = vst [vmem:[#allocation174_spill] sm:$0xff] %v5980_v44  ;;  %8276 = vst [vmem:[#allocation95_spill] sm:$0xff] %v5983_v34  ;;  %v3127_v27 = vadd.f32 %v3126_v15, %v3072_v36  ;;  %v3164_v37 = vadd.f32 %v3163_v43, %v3073_v11  ;;  %2285 = vperm.xlu1 %3795, %v8238_v45   ;;  %v8278_v44 = vld [vmem:[#allocation100_spill] sm:$0xff]  ;;  %v3473_v24 = vadd.f32 %v3472_v26, %v3418_v13  ;;  %v2898_v30 = vpop.permute.xlu1 %2897  ;;  %v3252_v43 = vpop.permute.xlu0 %3251 }
 0x66e   : > { %v3356_v1 = vadd.f32 %v4545_v57, %v8278_v44  ;;  %v3357_v12 = vadd.f32 %v4547_v2, %v8278_v44  ;;  %v3510_v62 = vadd.f32 %v3509_v41, %v3419_v47  ;;  %v3074_v40 = vmax.f32 %v3010_v0, 0.0 }
 0x66f   : > { %2635 = vperm.xlu0 %3804, %v8233_v29   ;;  %v3075_v8 = vmax.f32 %v3011_v7, 0.0  ;;  %v3012_v34 = vadd.f32 %v4516_v4, %v2898_v30  ;;  %v3013_v15 = vadd.f32 %v4529_v18, %v2898_v30  ;;  %v1050_v36 = vadd.f32 %v5635_v28, %v995_v60 }
 0x670   : > { %v1087_v11 = vadd.f32 %v5637_v32, %v996_v22  ;;  %v6004_v42 = vadd.f32 %v4545_v57, %v3252_v43  ;;  %v6007_v13 = vadd.f32 %v4547_v2, %v3252_v43  ;;  %v3128_v41 = vadd.f32 %v3127_v27, %v3074_v40 }
 0x671   : > { %v3076_v47 = vmax.f32 %v3012_v34, 0.0  ;;  %v3077_v26 = vmax.f32 %v3013_v15, 0.0  ;;  %v3165_v0 = vadd.f32 %v3164_v37, %v3075_v8  ;;  %3796 = vset.pattern.permute.xlu1 %v8271_v17  ;;  %v3420_v7 = vmax.f32 %v3356_v1, 0.0  ;;  %v2962_v60 = vpop.permute.xlu1 %2961  ;;  %v8282_v37 = vld [vmem:[#allocation180_spill] sm:$0xff] }
 0x672   : > { %v3421_v44 = vmax.f32 %v3357_v12, 0.0  ;;  %v935_v30 = vadd.f32 %v8269_v52, %v5671_v25  ;;  %v936_v28 = vadd.f32 %v8270_v55, %v5671_v25  ;;  %v8279_v32 = vmov 6   ;;  %2567 = vperm.xlu1 %3796, %v8223_v51   ;;  %v815_v8 = vpop.permute.xlu0 %814 }
 0x673   : > { %3805 = vset.pattern.permute.xlu0 %v8279_v32  ;;  %v3129_v22 = vadd.f32 %v3128_v41, %v3076_v47  ;;  %v3166_v34 = vadd.f32 %v3165_v0, %v3077_v26  ;;  %v6017_v27 = vadd.f32 %v4516_v4, %v2962_v60  ;;  %v6020_v17 = vadd.f32 %v4529_v18, %v2962_v60 }
 0x674   : > { %2917 = vperm.xlu0 %3805, %v8229_v38   ;;  %v3358_v1 = vadd.f32 %v4545_v57, %v8282_v37  ;;  %v3359_v25 = vadd.f32 %v4547_v2, %v8282_v37  ;;  %v3078_v12 = vmax.f32 %v5958_v5, 0.0  ;;  %v3079_v40 = vmax.f32 %v5961_v48, 0.0 }
 0x675   : > { %8280 = vst [vmem:[#allocation51_spill] sm:$0xff] %v6017_v27  ;;  %8281 = vst [vmem:[#allocation98_spill] sm:$0xff] %v6020_v17  ;;  %v997_v15 = vmax.f32 %v933_v58, 0.0  ;;  %v998_v43 = vmax.f32 %v934_v16, 0.0  ;;  %v6030_v47 = vadd.f32 %v8269_v52, %v815_v8  ;;  %v6033_v26 = vadd.f32 %v8270_v55, %v815_v8 }
 0x676   : > { %v3474_v41 = vadd.f32 %v3473_v24, %v3420_v7  ;;  %v3511_v0 = vadd.f32 %v3510_v62, %v3421_v44  ;;  %2631 = vperm.xlu1 %3796, %v8238_v45   ;;  %v6036_v60 = vadd.f32 %v3129_v22, %v3078_v12  ;;  %v6038_v37 = vadd.f32 %v3166_v34, %v3079_v40  ;;  %v3248_v58 = vpop.permute.xlu1 %3247  ;;  %v8283_v62 = vld [vmem:[#allocation10_spill] sm:$0xff]  ;;  %v895_v7 = vpop.permute.xlu0 %894  ;;  %v8284_v44 = vld [vmem:[#allocation181_spill] sm:$0xff] }
 0x677   : > { %v999_v5 = vmax.f32 %v935_v30, 0.0  ;;  %v1000_v17 = vmax.f32 %v936_v28, 0.0  ;;  %v1051_v48 = vadd.f32 %v1050_v36, %v997_v15  ;;  %v1088_v27 = vadd.f32 %v1087_v11, %v998_v43  ;;  %v8285_v12 = vld [vmem:[#allocation134_spill] sm:$0xff] }
 0x678   : > { %3807 = vset.pattern.permute.xlu0 %v8218_v50  ;;  %v3422_v16 = vmax.f32 %v3358_v1, 0.0  ;;  %v3423_v19 = vmax.f32 %v3359_v25, 0.0  ;;  %v3360_v8 = vadd.f32 %v4545_v57, %v3248_v58  ;;  %v3361_v24 = vadd.f32 %v4547_v2, %v3248_v58 }
 0x679   : > { %3283 = vperm.xlu0 %3807, %v8283_v62   ;;  %v937_v22 = vadd.f32 %v8269_v52, %v8284_v44  ;;  %v938_v30 = vadd.f32 %v8270_v55, %v8284_v44  ;;  %v6049_v36 = vadd.f32 %v8269_v52, %v895_v7  ;;  %v6052_v11 = vadd.f32 %v8270_v55, %v895_v7 }
 0x67a   : > { %v3424_v28 = vmax.f32 %v3360_v8, 0.0  ;;  %v3425_v34 = vmax.f32 %v3361_v24, 0.0  ;;  %v3475_v1 = vadd.f32 %v3474_v41, %v3422_v16  ;;  %v3512_v25 = vadd.f32 %v3511_v0, %v3423_v19  ;;  %3797 = vset.pattern.permute.xlu1 %v8279_v32  ;;  %v8288_v0 = vld [vmem:[#allocation12_spill] sm:$0xff] }
 0x67b   : > { %v6057_v40 = vadd.f32 %v4486_v35, %v8285_v12  ;;  %v6061_v15 = vadd.f32 %v4488_v56, %v8285_v12  ;;  %v1052_v43 = vadd.f32 %v1051_v48, %v999_v5  ;;  %v1089_v58 = vadd.f32 %v1088_v27, %v1000_v17  ;;  %2913 = vperm.xlu1 %3797, %v8223_v51   ;;  %v810_v16 = vpop.permute.xlu1 %809  ;;  %v1180_v2 = vpop.permute.xlu0 %1179  ;;  %v8289_v5 = vld [vmem:[#allocation101_spill] sm:$0xff]  ;;  %v8290_v51 = vld [vmem:[#allocation102_spill] sm:$0xff] }
 0x67c   : > { %v3426_v62 = vmax.f32 %v6004_v42, 0.0  ;;  %v3427_v8 = vmax.f32 %v6007_v13, 0.0  ;;  %v3476_v41 = vadd.f32 %v3475_v1, %v3424_v28  ;;  %v3513_v19 = vadd.f32 %v3512_v25, %v3425_v34 }
 0x67d   : > { %8286 = vst [vmem:[#allocation99_spill] sm:$0xff] %v6057_v40  ;;  %8287 = vst [vmem:[#allocation177_spill] sm:$0xff] %v6061_v15  ;;  %3291 = vperm.xlu0 %3807, %v8288_v0   ;;  %v1001_v24 = vmax.f32 %v937_v22, 0.0  ;;  %v1002_v7 = vmax.f32 %v938_v30, 0.0  ;;  %v939_v44 = vadd.f32 %v8269_v52, %v810_v16  ;;  %v940_v12 = vadd.f32 %v8270_v55, %v810_v16  ;;  %v8293_v30 = vld [vmem:[#allocation137_spill] sm:$0xff] }
 0x67e   : > { %v6070_v27 = vadd.f32 %v8289_v5, %v1180_v2  ;;  %v6073_v17 = vadd.f32 %v8290_v51, %v1180_v2  ;;  %v6075_v42 = vadd.f32 %v3476_v41, %v3426_v62  ;;  %v6077_v13 = vadd.f32 %v3513_v19, %v3427_v8  ;;  %v8296_v8 = vld [vmem:[#allocation14_spill] sm:$0xff] }
 0x67f   : > { %v1003_v48 = vmax.f32 %v939_v44, 0.0  ;;  %v1004_v28 = vmax.f32 %v940_v12, 0.0  ;;  %v1053_v34 = vadd.f32 %v1052_v43, %v1001_v24  ;;  %v1090_v22 = vadd.f32 %v1089_v58, %v1002_v7  ;;  %3806 = vset.pattern.permute.xlu1 %v8218_v50  ;;  %v890_v41 = vpop.permute.xlu1 %889  ;;  %v1244_v16 = vpop.permute.xlu0 %1243  ;;  %v8319_v44 = vld [vmem:[#allocation11_spill] sm:$0xff] }
 0x680   : > { %8291 = vst [vmem:[#allocation44_spill] sm:$0xff] %v6075_v42  ;;  %8292 = vst [vmem:[#allocation100_spill] sm:$0xff] %v6077_v13  ;;  %v6082_v1 = vadd.f32 %v4490_v39, %v8293_v30  ;;  %v6086_v25 = vadd.f32 %v4492_v3, %v8293_v30  ;;  %v1005_v2 = vmax.f32 %v6030_v47, 0.0  ;;  %v1006_v62 = vmax.f32 %v6033_v26, 0.0  ;;  %3263 = vperm.xlu1 %3806, %v8229_v38   ;;  %v8308_v42 = vld [vmem:[#allocation9_spill] sm:$0xff] }
 0x681   : > { %3299 = vperm.xlu0 %3807, %v8296_v8   ;;  %v1054_v43 = vadd.f32 %v1053_v34, %v1003_v48  ;;  %v1091_v58 = vadd.f32 %v1090_v22, %v1004_v28  ;;  %v6093_v19 = vadd.f32 %v8269_v52, %v890_v41  ;;  %v6096_v0 = vadd.f32 %v8270_v55, %v890_v41  ;;  %v8300_v28 = vld [vmem:[#allocation148_spill] sm:$0xff]  ;;  %v8313_v48 = vld [vmem:[#allocation29_spill] sm:$0xff] }
 0x682   : > { %8294 = vst [vmem:[#allocation180_spill] sm:$0xff] %v6082_v1  ;;  %8295 = vst [vmem:[#allocation10_spill] sm:$0xff] %v6086_v25  ;;  %v6101_v26 = vadd.f32 %v8289_v5, %v1244_v16  ;;  %v6104_v12 = vadd.f32 %v8290_v51, %v1244_v16  ;;  %v6109_v34 = vadd.f32 %v4490_v39, %v8300_v28  ;;  %v8307_v16 = vld [vmem:[#allocation16_spill] sm:$0xff]  ;;  %v8316_v25 = vld [vmem:[#allocation34_spill] sm:$0xff]  ;;  %v1353_v40 = vmax.f32 %v6073_v17, 0.0 }
 0x683   : > { %v6111_v22 = vadd.f32 %v1054_v43, %v1005_v2  ;;  %v6113_v30 = vadd.f32 %v1091_v58, %v1006_v62  ;;  %v6126_v62 = vadd.f32 %v4492_v3, %v8300_v28  ;;  %v8310_v58 = vld [vmem:[#allocation149_spill] sm:$0xff]  ;;  %v6141_v28 = vadd.f32 %v4494_v31, %v8313_v48 }
 0x684   : > { %8301 = vst [vmem:[#allocation181_spill] sm:$0xff] %v6109_v34  ;;  %3279 = vperm.xlu1 %3806, %v8308_v42   ;;  %v1176_v43 = vpop.permute.xlu1 %1175  ;;  %v6130_v24 = vadd.f32 %v4494_v31, %v8310_v58  ;;  %v1526_v38 = vpop.permute.xlu0 %1525  ;;  %v8318_v34 = vld [vmem:[#allocation19_spill] sm:$0xff]  ;;  %v6161_v7 = vadd.f32 %v4514_v46, %v8316_v25 }
 0x685   : > { %8302 = vst [vmem:[#allocation134_spill] sm:$0xff] %v6111_v22  ;;  %8303 = vst [vmem:[#allocation12_spill] sm:$0xff] %v6113_v30  ;;  %3307 = vperm.xlu0 %3807, %v8307_v16   ;;  %v6134_v16 = vadd.f32 %v4496_v49, %v8310_v58  ;;  %v1286_v42 = vadd.f32 %v8289_v5, %v1176_v43  ;;  %v1287_v47 = vadd.f32 %v8290_v51, %v1176_v43 }
 0x686   : > { %8309 = vst [vmem:[#allocation101_spill] sm:$0xff] %v6126_v62  ;;  %8311 = vst [vmem:[#allocation102_spill] sm:$0xff] %v6130_v24  ;;  %v6144_v13 = vadd.f32 %v4486_v35, %v1526_v38  ;;  %v6147_v41 = vadd.f32 %v4488_v56, %v1526_v38  ;;  %v6151_v58 = vadd.f32 %v4496_v49, %v8313_v48  ;;  %v8321_v38 = vld [vmem:[#allocation156_spill] sm:$0xff]  ;;  %v1352_v48 = vmax.f32 %v6070_v27, 0.0 }
 0x687   : > { %8312 = vst [vmem:[#allocation137_spill] sm:$0xff] %v6134_v16  ;;  %8314 = vst [vmem:[#allocation14_spill] sm:$0xff] %v6141_v28  ;;  %v6155_v43 = vadd.f32 %v4499_v54, %v8316_v25  ;;  %v1350_v1 = vmax.f32 %v1286_v42, 0.0  ;;  %v1351_v2 = vmax.f32 %v1287_v47, 0.0  ;;  %v6165_v15 = vadd.f32 %v4499_v54, %v8321_v38 }
 0x688   : > { %8315 = vst [vmem:[#allocation148_spill] sm:$0xff] %v6151_v58  ;;  %3287 = vperm.xlu1 %3806, %v8319_v44   ;;  %8320 = vst [vmem:[#allocation9_spill] sm:$0xff] %v6161_v7  ;;  %v1240_v8 = vpop.permute.xlu1 %1239  ;;  %v1590_v25 = vpop.permute.xlu0 %1589  ;;  %v8344_v58 = vld [vmem:[#allocation20_spill] sm:$0xff] }
 0x689   : > { %8317 = vst [vmem:[#allocation16_spill] sm:$0xff] %v6155_v43  ;;  %3315 = vperm.xlu0 %3807, %v8318_v34   ;;  %8322 = vst [vmem:[#allocation149_spill] sm:$0xff] %v6165_v15  ;;  %v1401_v42 = vadd.f32 %v5765_v61, %v1350_v1  ;;  %v1438_v47 = vadd.f32 %v5767_v23, %v1351_v2  ;;  %v6172_v34 = vadd.f32 %v8289_v5, %v1240_v8  ;;  %v8327_v1 = vld [vmem:[#allocation21_spill] sm:$0xff]  ;;  %v8340_v43 = vld [vmem:[#allocation15_spill] sm:$0xff] }
 0x68a   : > { %v6175_v44 = vadd.f32 %v8290_v51, %v1240_v8  ;;  %v6180_v27 = vadd.f32 %v4486_v35, %v1590_v25  ;;  %v6183_v17 = vadd.f32 %v4488_v56, %v1590_v25  ;;  %v6188_v23 = vadd.f32 %v4514_v46, %v8321_v38  ;;  %v8328_v8 = vld [vmem:[#allocation13_spill] sm:$0xff]  ;;  %v8331_v38 = vld [vmem:[#allocation36_spill] sm:$0xff]  ;;  %v8341_v15 = vld [vmem:[#allocation58_spill] sm:$0xff] }
 0x68b   : > { %v6192_v2 = vadd.f32 %v1401_v42, %v1352_v48  ;;  %v6194_v30 = vadd.f32 %v1438_v47, %v1353_v40  ;;  %v6203_v62 = vadd.f32 %v4516_v4, %v8331_v38  ;;  %v6207_v48 = vadd.f32 %v4529_v18, %v8331_v38  ;;  %v8334_v40 = vld [vmem:[#allocation160_spill] sm:$0xff] }
 0x68c   : > { %8323 = vst [vmem:[#allocation29_spill] sm:$0xff] %v6175_v44  ;;  %8324 = vst [vmem:[#allocation34_spill] sm:$0xff] %v6180_v27  ;;  %3295 = vperm.xlu1 %3806, %v8328_v8   ;;  %v6211_v42 = vadd.f32 %v4516_v4, %v8334_v40  ;;  %v8337_v8 = vld [vmem:[#allocation163_spill] sm:$0xff]  ;;  %v6242_v38 = vadd.f32 %v8270_v55, %v8341_v15  ;;  %v6246_v28 = vadd.f32 %v8289_v5, %v8344_v58 }
 0x68d   : > { %8325 = vst [vmem:[#allocation19_spill] sm:$0xff] %v6183_v17  ;;  %8326 = vst [vmem:[#allocation11_spill] sm:$0xff] %v6188_v23  ;;  %3319 = vperm.xlu0 %3807, %v8327_v1   ;;  %v1522_v47 = vpop.permute.xlu1 %1521  ;;  %v6215_v1 = vadd.f32 %v4529_v18, %v8334_v40  ;;  %v6219_v61 = vadd.f32 %v8269_v52, %v8337_v8  ;;  %v1872_v24 = vpop.permute.xlu0 %1871  ;;  %v6226_v22 = vadd.f32 %v8270_v55, %v8337_v8 }
 0x68e   : > { %8329 = vst [vmem:[#allocation156_spill] sm:$0xff] %v6192_v2  ;;  %8330 = vst [vmem:[#allocation21_spill] sm:$0xff] %v6194_v30  ;;  %v1632_v25 = vadd.f32 %v4486_v35, %v1522_v47  ;;  %v1633_v16 = vadd.f32 %v4488_v56, %v1522_v47  ;;  %v6229_v7 = vadd.f32 %v4490_v39, %v1872_v24  ;;  %v1699_v30 = vmax.f32 %v6147_v41, 0.0 }
 0x68f   : > { %8332 = vst [vmem:[#allocation13_spill] sm:$0xff] %v6203_v62  ;;  %8333 = vst [vmem:[#allocation36_spill] sm:$0xff] %v6207_v48  ;;  %v6232_v40 = vadd.f32 %v4492_v3, %v1872_v24  ;;  %v6238_v47 = vadd.f32 %v8269_v52, %v8341_v15  ;;  %v6250_v24 = vadd.f32 %v8290_v51, %v8344_v58  ;;  %v8361_v62 = vld [vmem:[#allocation169_spill] sm:$0xff] }
 0x690   : > { %8335 = vst [vmem:[#allocation160_spill] sm:$0xff] %v6211_v42  ;;  %8336 = vst [vmem:[#allocation183_spill] sm:$0xff] %v6215_v1  ;;  %3303 = vperm.xlu1 %3806, %v8340_v43   ;;  %v1696_v8 = vmax.f32 %v1632_v25, 0.0  ;;  %v1697_v23 = vmax.f32 %v1633_v16, 0.0  ;;  %v1698_v43 = vmax.f32 %v6144_v13, 0.0  ;;  %v6329_v1 = vadd.f32 %v4490_v39, %v8361_v62 }
 0x691   : > { %8338 = vst [vmem:[#allocation163_spill] sm:$0xff] %v6219_v61  ;;  %8339 = vst [vmem:[#allocation184_spill] sm:$0xff] %v6226_v22  ;;  %3323 = vperm.xlu0 %3807, %v8238_v45   ;;  %v1586_v2 = vpop.permute.xlu1 %1585  ;;  %v1936_v27 = vpop.permute.xlu0 %1935  ;;  %v2045_v42 = vmax.f32 %v6232_v40, 0.0 }
 0x692   : > { %8342 = vst [vmem:[#allocation15_spill] sm:$0xff] %v6238_v47  ;;  %8343 = vst [vmem:[#allocation58_spill] sm:$0xff] %v6242_v38  ;;  %v1747_v17 = vadd.f32 %v5823_v33, %v1696_v8  ;;  %v1784_v15 = vadd.f32 %v5825_v21, %v1697_v23  ;;  %v6257_v25 = vadd.f32 %v4486_v35, %v1586_v2  ;;  %v8350_v33 = vld [vmem:[#allocation17_spill] sm:$0xff]  ;;  %v8351_v21 = vld [vmem:[#allocation168_spill] sm:$0xff] }
 0x693   : > { %8345 = vst [vmem:[#allocation20_spill] sm:$0xff] %v6246_v28  ;;  %8346 = vst [vmem:[#allocation185_spill] sm:$0xff] %v6250_v24  ;;  %v6260_v16 = vadd.f32 %v4488_v56, %v1586_v2  ;;  %v6265_v13 = vadd.f32 %v4490_v39, %v1936_v27  ;;  %v6268_v41 = vadd.f32 %v4492_v3, %v1936_v27  ;;  %v6283_v8 = vld [vmem:[%s7442_s7] sm:$0xff] }
 0x694   : > { %3311 = vperm.xlu1 %3806, %v8350_v33   ;;  %v6274_v23 = vadd.f32 %v8289_v5, %v8351_v21  ;;  %v6278_v2 = vadd.f32 %v8290_v51, %v8351_v21  ;;  %v6286_v27 = vadd.f32 %v1747_v17, %v1698_v43  ;;  %v6288_v33 = vadd.f32 %v1784_v15, %v1699_v30  ;;  %v8355_v43 = vld [vmem:[#allocation60_spill] sm:$0xff] }
 0x695   : > { %8347 = vst [vmem:[#allocation186_spill] sm:$0xff] %v6260_v16  ;;  %8348 = vst [vmem:[#allocation187_spill] sm:$0xff] %v6265_v13  ;;  %3810 = vset.pattern.permute.xlu0 %v8279_v32  ;;  %v6300_v30 = vadd.f32 %v4486_v35, %v8355_v43  ;;  %v6304_v15 = vadd.f32 %v4488_v56, %v8355_v43  ;;  %v8358_v43 = vld [vmem:[#allocation67_spill] sm:$0xff] }
 0x696   : > { %8349 = vst [vmem:[#allocation188_spill] sm:$0xff] %v6268_v41  ;;  %8352 = vst [vmem:[#allocation17_spill] sm:$0xff] %v6274_v23  ;;  %3195 = vperm.xlu0 %3810, %v6283_v8   ;;  %v1868_v17 = vpop.permute.xlu1 %1867  ;;  %v2218_v21 = vpop.permute.xlu0 %2217  ;;  %v8364_v23 = vld [vmem:[#allocation75_spill] sm:$0xff] }
 0x697   : > { %8353 = vst [vmem:[#allocation168_spill] sm:$0xff] %v6278_v2  ;;  %8354 = vst [vmem:[#allocation189_spill] sm:$0xff] %v6288_v33  ;;  %v1978_v44 = vadd.f32 %v4490_v39, %v1868_v17  ;;  %v1979_v58 = vadd.f32 %v4492_v3, %v1868_v17  ;;  %v6312_v48 = vadd.f32 %v4494_v31, %v2218_v21  ;;  %v8376_v33 = vld [vmem:[#allocation176_spill] sm:$0xff] }
 0x698   : > { %8356 = vst [vmem:[#allocation60_spill] sm:$0xff] %v6300_v30  ;;  %8357 = vst [vmem:[#allocation190_spill] sm:$0xff] %v6304_v15  ;;  %3808 = vset.pattern.permute.xlu1 %v8279_v32  ;;  %v6315_v41 = vadd.f32 %v4496_v49, %v2218_v21  ;;  %v6321_v17 = vadd.f32 %v4486_v35, %v8358_v43  ;;  %v6325_v32 = vadd.f32 %v4488_v56, %v8358_v43 }
 0x699   : > { %2977 = vperm.xlu1 %3808, %v8238_v45   ;;  %v2042_v13 = vmax.f32 %v1978_v44, 0.0  ;;  %v2043_v16 = vmax.f32 %v1979_v58, 0.0  ;;  %8362 = vst [vmem:[#allocation169_spill] sm:$0xff] %v6329_v1  ;;  %v6333_v21 = vadd.f32 %v4492_v3, %v8361_v62  ;;  %v2044_v45 = vmax.f32 %v6229_v7, 0.0 }
 0x69a   : > { %3811 = vset.pattern.permute.xlu0 %v8218_v50  ;;  %8359 = vst [vmem:[#allocation67_spill] sm:$0xff] %v6321_v17  ;;  %8360 = vst [vmem:[#allocation191_spill] sm:$0xff] %v6325_v32  ;;  %v1932_v24 = vpop.permute.xlu1 %1931  ;;  %v2282_v2 = vpop.permute.xlu0 %2281  ;;  %v6347_v62 = vadd.f32 %v4490_v39, %v8364_v23  ;;  %v6351_v7 = vadd.f32 %v4492_v3, %v8364_v23 }
 0x69b   : > { %8363 = vst [vmem:[#allocation192_spill] sm:$0xff] %v6333_v21  ;;  %v2093_v28 = vadd.f32 %v5879_v20, %v2042_v13  ;;  %v2130_v43 = vadd.f32 %v5881_v53, %v2043_v16  ;;  %v6340_v44 = vadd.f32 %v4490_v39, %v1932_v24  ;;  %v6343_v58 = vadd.f32 %v4492_v3, %v1932_v24  ;;  %v8369_v53 = vld [vmem:[#allocation172_spill] sm:$0xff]  ;;  %v8379_v21 = vld [vmem:[#allocation178_spill] sm:$0xff] }
 0x69c   : > { %8365 = vst [vmem:[#allocation75_spill] sm:$0xff] %v6347_v62  ;;  %8366 = vst [vmem:[#allocation193_spill] sm:$0xff] %v6351_v7  ;;  %v6354_v40 = vadd.f32 %v4494_v31, %v2282_v2  ;;  %v6357_v20 = vadd.f32 %v4496_v49, %v2282_v2  ;;  %v6362_v24 = vadd.f32 %v4494_v31, %v8369_v53  ;;  %v8373_v2 = vld [vmem:[#allocation82_spill] sm:$0xff] }
 0x69d   : > { %2981 = vperm.xlu1 %3808, %v8233_v29   ;;  %v6366_v16 = vadd.f32 %v4496_v49, %v8369_v53  ;;  %v6368_v13 = vadd.f32 %v2093_v28, %v2044_v45  ;;  %v6370_v23 = vadd.f32 %v2130_v43, %v2045_v42  ;;  %v6376_v38 = vadd.f32 %v4494_v31, %v8373_v2 }
 0x69e   : > { %8367 = vst [vmem:[#allocation194_spill] sm:$0xff] %v6354_v40  ;;  %8368 = vst [vmem:[#allocation195_spill] sm:$0xff] %v6357_v20  ;;  %v6380_v47 = vadd.f32 %v4496_v49, %v8373_v2  ;;  %v6395_v28 = vadd.f32 %v4499_v54, %v8376_v33  ;;  %v6399_v42 = vadd.f32 %v4514_v46, %v8376_v33  ;;  %v2391_v33 = vmax.f32 %v6315_v41, 0.0  ;;  %v8481_v20 = vld [vmem:[#allocation92_spill] sm:$0xff] }
 0x69f   : > { %8370 = vst [vmem:[#allocation172_spill] sm:$0xff] %v6362_v24  ;;  %8371 = vst [vmem:[#allocation196_spill] sm:$0xff] %v6366_v16  ;;  %v2214_v45 = vpop.permute.xlu1 %2213  ;;  %v2564_v30 = vpop.permute.xlu0 %2563  ;;  %v6406_v2 = vadd.f32 %v4499_v54, %v8379_v21  ;;  %v6410_v53 = vadd.f32 %v4514_v46, %v8379_v21  ;;  %v2390_v16 = vmax.f32 %v6312_v48, 0.0  ;;  %v6485_v62 = vadd.f32 %v8290_v51, %v5749_v6 }
 0x6a0   : > { %8372 = vst [vmem:[#allocation197_spill] sm:$0xff] %v6370_v23  ;;  %8374 = vst [vmem:[#allocation82_spill] sm:$0xff] %v6376_v38  ;;  %v2324_v22 = vadd.f32 %v4494_v31, %v2214_v45  ;;  %v2325_v15 = vadd.f32 %v4496_v49, %v2214_v45 }
 0x6a1   : > { %8375 = vst [vmem:[#allocation198_spill] sm:$0xff] %v6380_v47  ;;  %3809 = vset.pattern.permute.xlu1 %v8218_v50  ;;  %8377 = vst [vmem:[#allocation176_spill] sm:$0xff] %v6395_v28  ;;  %v8383_v47 = vld [vmem:[#allocation90_spill] sm:$0xff] }
 0x6a2   : > { %8378 = vst [vmem:[#allocation199_spill] sm:$0xff] %v6399_v42  ;;  %3327 = vperm.xlu1 %3809, %v8233_v29   ;;  %v2388_v43 = vmax.f32 %v2324_v22, 0.0  ;;  %v2389_v50 = vmax.f32 %v2325_v15, 0.0  ;;  %8380 = vst [vmem:[#allocation178_spill] sm:$0xff] %v6406_v2  ;;  %v6424_v21 = vadd.f32 %v4516_v4, %v8383_v47  ;;  %v6428_v48 = vadd.f32 %v4529_v18, %v8383_v47  ;;  %v8394_v2 = vld [vmem:[#allocation61_spill] sm:$0xff] }
 0x6a3   : > { %8381 = vst [vmem:[#allocation200_spill] sm:$0xff] %v6410_v53  ;;  %v2278_v24 = vpop.permute.xlu1 %2277  ;;  %v2628_v45 = vpop.permute.xlu0 %2627 }
 0x6a4   : > { %v2439_v29 = vadd.f32 %v5933_v9, %v2388_v43  ;;  %v2476_v61 = vadd.f32 %v5935_v10, %v2389_v50  ;;  %v6417_v22 = vadd.f32 %v4494_v31, %v2278_v24  ;;  %v6420_v15 = vadd.f32 %v4496_v49, %v2278_v24  ;;  %8384 = vst [vmem:[#allocation90_spill] sm:$0xff] %v6424_v21  ;;  %v8388_v10 = vld [vmem:[#allocation109_spill] sm:$0xff]  ;;  %v8426_v49 = vld [vmem:[#allocation114_spill] sm:$0xff] }
 0x6a5   : > { %8385 = vst [vmem:[#allocation202_spill] sm:$0xff] %v6428_v48  ;;  %v6431_v41 = vadd.f32 %v4499_v54, %v2628_v45  ;;  %v6434_v9 = vadd.f32 %v4514_v46, %v2628_v45  ;;  %v6439_v24 = vadd.f32 %v4516_v4, %v8388_v10  ;;  %v6443_v43 = vadd.f32 %v4529_v18, %v8388_v10  ;;  %v8393_v45 = vld [vmem:[#allocation142_spill] sm:$0xff] }
 0x6a6   : > { %8382 = vst [vmem:[#allocation201_spill] sm:$0xff] %v6420_v15  ;;  %3541 = vperm.xlu1 %3809, %v6283_v8   ;;  %v6445_v50 = vadd.f32 %v2439_v29, %v2390_v16  ;;  %v6447_v47 = vadd.f32 %v2476_v61, %v2391_v33  ;;  %v6453_v7 = vadd.f32 %v8269_v52, %v8393_v45  ;;  %v8482_v15 = vmax.f32 %v8481_v20, 0.0  ;;  %v8490_v20 = vld [vmem:[#allocation15_spill] sm:$0xff] }
 0x6a7   : > { %8386 = vst [vmem:[#allocation203_spill] sm:$0xff] %v6431_v41  ;;  %8387 = vst [vmem:[#allocation204_spill] sm:$0xff] %v6434_v9  ;;  %v6457_v8 = vadd.f32 %v8270_v55, %v8393_v45  ;;  %v2672_v16 = vadd.f32 %v4499_v54, %v2564_v30  ;;  %v2673_v61 = vadd.f32 %v4514_v46, %v2564_v30  ;;  %v8459_v41 = vld [vmem:[#allocation69_spill] sm:$0xff] }
 0x6a8   : > { %8389 = vst [vmem:[#allocation109_spill] sm:$0xff] %v6439_v24  ;;  %8390 = vst [vmem:[#allocation205_spill] sm:$0xff] %v6443_v43  ;;  %v2560_v33 = vpop.permute.xlu1 %2559  ;;  %v2910_v28 = vpop.permute.xlu0 %2909  ;;  %v6471_v10 = vadd.f32 %v8269_v52, %v8394_v2  ;;  %v6475_v30 = vadd.f32 %v8270_v55, %v8394_v2 }
 0x6a9   : > { %8391 = vst [vmem:[#allocation206_spill] sm:$0xff] %v6445_v50  ;;  %8392 = vst [vmem:[#allocation207_spill] sm:$0xff] %v6447_v47  ;;  %v2670_v38 = vadd.f32 %v4499_v54, %v2560_v33  ;;  %v2671_v42 = vadd.f32 %v4514_v46, %v2560_v33  ;;  %v6481_v33 = vadd.f32 %v8289_v5, %v5749_v6  ;;  %v2736_v45 = vmax.f32 %v2672_v16, 0.0 }
 0x6aa   : > { %v2737_v43 = vmax.f32 %v2673_v61, 0.0  ;;  %v3018_v17 = vadd.f32 %v4516_v4, %v2910_v28 }
 0x6ab   : > { %v2734_v48 = vmax.f32 %v2670_v38, 0.0  ;;  %v2735_v21 = vmax.f32 %v2671_v42, 0.0 }
 0x6ac   : > { %v2624_v24 = vpop.permute.xlu1 %2623  ;;  %v2974_v42 = vpop.permute.xlu0 %2973  ;;  %v3082_v31 = vmax.f32 %v3018_v17, 0.0 }
 0x6ad   : > { %v2785_v2 = vadd.f32 %v5985_v14, %v2734_v48  ;;  %v2822_v53 = vadd.f32 %v5987_v63, %v2735_v21  ;;  %v6490_v29 = vadd.f32 %v4499_v54, %v2624_v24  ;;  %v6493_v38 = vadd.f32 %v4514_v46, %v2624_v24 }
 0x6ae   : > { %v6498_v6 = vadd.f32 %v4516_v4, %v2974_v42  ;;  %v6501_v16 = vadd.f32 %v4529_v18, %v2974_v42  ;;  %v3019_v48 = vadd.f32 %v4529_v18, %v2910_v28 }
 0x6af   : > { %8395 = vst [vmem:[#allocation142_spill] sm:$0xff] %v6490_v29  ;;  %8396 = vst [vmem:[#allocation61_spill] sm:$0xff] %v6493_v38  ;;  %v6505_v61 = vadd.f32 %v2785_v2, %v2736_v45  ;;  %v6507_v50 = vadd.f32 %v2822_v53, %v2737_v43  ;;  %v8460_v38 = vmax.f32 %v8459_v41, 0.0  ;;  %v8463_v29 = vld [vmem:[#allocation116_spill] sm:$0xff]  ;;  %v8467_v41 = vld [vmem:[#allocation62_spill] sm:$0xff] }
 0x6b0   : > { %8397 = vst [vmem:[#allocation208_spill] sm:$0xff] %v6498_v6  ;;  %8398 = vst [vmem:[#allocation209_spill] sm:$0xff] %v6501_v16  ;;  %v3083_v42 = vmax.f32 %v3019_v48, 0.0  ;;  %v8447_v6 = vld [vmem:[#allocation35_spill] sm:$0xff] }
 0x6b1   : > { %8401 = vst [vmem:[#allocation210_spill] sm:$0xff] %v6505_v61  ;;  %8402 = vst [vmem:[#allocation211_spill] sm:$0xff] %v6507_v50  ;;  %v2906_v45 = vpop.permute.xlu1 %2905  ;;  %v3260_v47 = vpop.permute.xlu0 %3259 }
 0x6b2   : > { %v3016_v24 = vadd.f32 %v4516_v4, %v2906_v45  ;;  %v3017_v1 = vadd.f32 %v4529_v18, %v2906_v45  ;;  %v3366_v21 = vadd.f32 %v4545_v57, %v3260_v47  ;;  %v3367_v59 = vadd.f32 %v8426_v49, %v3260_v47 }
 0x6b4   : > { %v3080_v53 = vmax.f32 %v3016_v24, 0.0  ;;  %v3081_v2 = vmax.f32 %v3017_v1, 0.0 }
 0x6b5   : > { %v2970_v61 = vpop.permute.xlu1 %2969 }
 0x6b6   : > { %v3131_v32 = vadd.f32 %v6036_v60, %v3080_v53  ;;  %v3168_v54 = vadd.f32 %v6038_v37, %v3081_v2  ;;  %v6534_v28 = vadd.f32 %v4516_v4, %v2970_v61  ;;  %v6537_v46 = vadd.f32 %v4529_v18, %v2970_v61  ;;  %v825_v45 = vpop.permute.xlu0 %824  ;;  %v8427_v37 = vld [vmem:[#allocation29_spill] sm:$0xff]  ;;  %v8430_v60 = vld [vmem:[#allocation186_spill] sm:$0xff]  ;;  %v8433_v18 = vld [vmem:[#allocation44_spill] sm:$0xff] }
 0x6b7   : > { %v945_v17 = vadd.f32 %v8269_v52, %v825_v45 }
 0x6b8   : > { %8418 = vst [vmem:[#allocation212_spill] sm:$0xff] %v6534_v28  ;;  %8419 = vst [vmem:[#allocation213_spill] sm:$0xff] %v6537_v46  ;;  %v6547_v53 = vadd.f32 %v3131_v32, %v3082_v31  ;;  %v6549_v24 = vadd.f32 %v3168_v54, %v3083_v42  ;;  %v3431_v42 = vmax.f32 %v3367_v59, 0.0  ;;  %v8437_v59 = vld [vmem:[#allocation134_spill] sm:$0xff]  ;;  %v8448_v46 = vmax.f32 %v8447_v6, 0.0  ;;  %v8449_v28 = vld [vmem:[#allocation155_spill] sm:$0xff] }
 0x6b9   : > { %v8450_v9 = vmax.f32 %v8449_v28, 0.0 }
 0x6ba   : > { %8424 = vst [vmem:[#allocation214_spill] sm:$0xff] %v6547_v53  ;;  %8425 = vst [vmem:[#allocation215_spill] sm:$0xff] %v6549_v24  ;;  %v3256_v43 = vpop.permute.xlu1 %3255  ;;  %v905_v32 = vpop.permute.xlu0 %904 }
 0x6bb   : > { %v3364_v2 = vadd.f32 %v4545_v57, %v3256_v43  ;;  %v3365_v31 = vadd.f32 %v8426_v49, %v3256_v43  ;;  %v6562_v48 = vadd.f32 %v8269_v52, %v905_v32  ;;  %v6565_v63 = vadd.f32 %v8270_v55, %v905_v32  ;;  %v8434_v32 = vld [vmem:[#allocation100_spill] sm:$0xff] }
 0x6bc   : > { %v3430_v49 = vmax.f32 %v3366_v21, 0.0  ;;  %v946_v57 = vadd.f32 %v8270_v55, %v825_v45  ;;  %v8438_v21 = vld [vmem:[#allocation12_spill] sm:$0xff] }
 0x6bd   : > { %v3428_v1 = vmax.f32 %v3364_v2, 0.0  ;;  %v3429_v24 = vmax.f32 %v3365_v31, 0.0  ;;  %v8439_v2 = vld [vmem:[#allocation108_spill] sm:$0xff] }
 0x6be   : > { %v1010_v43 = vmax.f32 %v946_v57, 0.0 }
 0x6bf   : > { %v3478_v4 = vadd.f32 %v8433_v18, %v3428_v1  ;;  %v3515_v61 = vadd.f32 %v8434_v32, %v3429_v24  ;;  %v820_v54 = vpop.permute.xlu1 %819  ;;  %v1188_v23 = vpop.permute.xlu0 %1187  ;;  %v8441_v1 = vld [vmem:[#allocation111_spill] sm:$0xff] }
 0x6c0   : > { %v943_v31 = vadd.f32 %v8269_v52, %v820_v54  ;;  %v944_v14 = vadd.f32 %v8270_v55, %v820_v54  ;;  %v1009_v54 = vmax.f32 %v945_v17, 0.0  ;;  %v1292_v47 = vadd.f32 %v8289_v5, %v1188_v23 }
 0x6c1   : > { %v6581_v50 = vadd.f32 %v3478_v4, %v3430_v49  ;;  %v6583_v45 = vadd.f32 %v3515_v61, %v3431_v42  ;;  %v1293_v57 = vadd.f32 %v8290_v51, %v1188_v23  ;;  %v8442_v18 = vmax.f32 %v8441_v1, 0.0 }
 0x6c2   : > { %v1007_v24 = vmax.f32 %v943_v31, 0.0  ;;  %v1008_v32 = vmax.f32 %v944_v14, 0.0  ;;  %v8440_v31 = vmax.f32 %v8439_v2, 0.0 }
 0x6c3   : > { %8435 = vst [vmem:[#allocation29_spill] sm:$0xff] %v6581_v50  ;;  %8436 = vst [vmem:[#allocation186_spill] sm:$0xff] %v6583_v45  ;;  %v900_v53 = vpop.permute.xlu1 %899  ;;  %v1252_v42 = vpop.permute.xlu0 %1251 }
 0x6c4   : > { %v1056_v40 = vadd.f32 %v8437_v59, %v1007_v24  ;;  %v1093_v4 = vadd.f32 %v8438_v21, %v1008_v32  ;;  %v6592_v49 = vadd.f32 %v8269_v52, %v900_v53  ;;  %v6595_v61 = vadd.f32 %v8270_v55, %v900_v53  ;;  %v8443_v32 = vld [vmem:[#allocation135_spill] sm:$0xff]  ;;  %v8452_v53 = vld [vmem:[#allocation21_spill] sm:$0xff] }
 0x6c5   : > { %v6612_v17 = vadd.f32 %v8289_v5, %v1252_v42  ;;  %v8444_v2 = vmax.f32 %v8443_v32, 0.0 }
 0x6c6   : > { %v1057_v21 = vadd.f32 %v1056_v40, %v1009_v54  ;;  %v1094_v24 = vadd.f32 %v1093_v4, %v1010_v43  ;;  %v6615_v40 = vadd.f32 %v8290_v51, %v1252_v42  ;;  %v1356_v54 = vmax.f32 %v1292_v47, 0.0 }
 0x6c7   : > { %v1357_v4 = vmax.f32 %v1293_v57, 0.0 }
 0x6c8   : > { %v1058_v14 = vadd.f32 %v1057_v21, %v8440_v31  ;;  %v1095_v23 = vadd.f32 %v1094_v24, %v8442_v18  ;;  %v1184_v43 = vpop.permute.xlu1 %1183  ;;  %v1534_v52 = vpop.permute.xlu0 %1533  ;;  %v8445_v21 = vld [vmem:[#allocation136_spill] sm:$0xff]  ;;  %v8457_v24 = vld [vmem:[#allocation66_spill] sm:$0xff] }
 0x6c9   : > { %v1290_v59 = vadd.f32 %v8289_v5, %v1184_v43  ;;  %v1291_v55 = vadd.f32 %v8290_v51, %v1184_v43  ;;  %v8446_v1 = vmax.f32 %v8445_v21, 0.0  ;;  %v1638_v47 = vadd.f32 %v4486_v35, %v1534_v52  ;;  %v8451_v21 = vld [vmem:[#allocation156_spill] sm:$0xff] }
 0x6ca   : > { %v1059_v31 = vadd.f32 %v1058_v14, %v8444_v2  ;;  %v1639_v57 = vadd.f32 %v4488_v56, %v1534_v52 }
 0x6cb   : > { %v1096_v18 = vadd.f32 %v1095_v23, %v8446_v1  ;;  %v1354_v42 = vmax.f32 %v1290_v59, 0.0  ;;  %v1355_v16 = vmax.f32 %v1291_v55, 0.0 }
 0x6cc   : > { %v1060_v43 = vadd.f32 %v1059_v31, %v8448_v46  ;;  %v1248_v2 = vpop.permute.xlu1 %1247  ;;  %v1598_v6 = vpop.permute.xlu0 %1597  ;;  %v8453_v46 = vld [vmem:[#allocation38_spill] sm:$0xff] }
 0x6cd   : > { %v1097_v32 = vadd.f32 %v1096_v18, %v8450_v9  ;;  %v1403_v1 = vadd.f32 %v8451_v21, %v1354_v42  ;;  %v1440_v59 = vadd.f32 %v8452_v53, %v1355_v16  ;;  %v6636_v55 = vadd.f32 %v8289_v5, %v1248_v2  ;;  %v8455_v9 = vld [vmem:[#allocation33_spill] sm:$0xff] }
 0x6ce   : > { %v6639_v52 = vadd.f32 %v8290_v51, %v1248_v2  ;;  %v8454_v31 = vmax.f32 %v8453_v46, 0.0  ;;  %v8456_v18 = vmax.f32 %v8455_v9, 0.0  ;;  %v6646_v23 = vadd.f32 %v4486_v35, %v1598_v6 }
 0x6cf   : > { %v6649_v42 = vadd.f32 %v4488_v56, %v1598_v6  ;;  %v1404_v16 = vadd.f32 %v1403_v1, %v1356_v54  ;;  %v1441_v53 = vadd.f32 %v1440_v59, %v1357_v4  ;;  %v1702_v5 = vmax.f32 %v1638_v47, 0.0 }
 0x6d0   : > { %v1061_v28 = vadd.f32 %v1060_v43, %v8454_v31  ;;  %v1098_v14 = vadd.f32 %v1097_v32, %v8456_v18  ;;  %v1703_v21 = vmax.f32 %v1639_v57, 0.0  ;;  %v8458_v51 = vmax.f32 %v8457_v24, 0.0  ;;  %v8461_v31 = vld [vmem:[#allocation115_spill] sm:$0xff]  ;;  %v8465_v24 = vld [vmem:[#allocation65_spill] sm:$0xff] }
 0x6d1   : > { %v8462_v9 = vmax.f32 %v8461_v31, 0.0  ;;  %v8464_v6 = vmax.f32 %v8463_v29, 0.0  ;;  %v1530_v47 = vpop.permute.xlu1 %1529  ;;  %v8466_v57 = vmax.f32 %v8465_v24, 0.0  ;;  %v8477_v43 = vld [vmem:[#allocation39_spill] sm:$0xff] }
 0x6d2   : > { %v1062_v2 = vadd.f32 %v1061_v28, %v8458_v51  ;;  %v1099_v46 = vadd.f32 %v1098_v14, %v8460_v38  ;;  %v8468_v38 = vmax.f32 %v8467_v41, 0.0  ;;  %v1636_v59 = vadd.f32 %v4486_v35, %v1530_v47  ;;  %v1880_v51 = vpop.permute.xlu0 %1879  ;;  %v8475_v41 = vld [vmem:[#allocation97_spill] sm:$0xff] }
 0x6d3   : > { %v1405_v18 = vadd.f32 %v1404_v16, %v8462_v9  ;;  %v1442_v45 = vadd.f32 %v1441_v53, %v8464_v6  ;;  %v1637_v28 = vadd.f32 %v4488_v56, %v1530_v47  ;;  %v8469_v16 = vld [vmem:[#allocation138_spill] sm:$0xff]  ;;  %v8471_v53 = vld [vmem:[#allocation139_spill] sm:$0xff]  ;;  %v6674_v4 = vadd.f32 %v4490_v39, %v1880_v51 }
 0x6d4   : > { %v1063_v1 = vadd.f32 %v1062_v2, %v8466_v57  ;;  %v1100_v14 = vadd.f32 %v1099_v46, %v8468_v38  ;;  %v8470_v31 = vmax.f32 %v8469_v16, 0.0  ;;  %v8472_v9 = vmax.f32 %v8471_v53, 0.0  ;;  %v8473_v2 = vld [vmem:[#allocation96_spill] sm:$0xff] }
 0x6d5   : > { %v6677_v24 = vadd.f32 %v4492_v3, %v1880_v51  ;;  %v8474_v57 = vmax.f32 %v8473_v2, 0.0  ;;  %v8476_v38 = vmax.f32 %v8475_v41, 0.0  ;;  %v1700_v47 = vmax.f32 %v1636_v59, 0.0  ;;  %v1594_v51 = vpop.permute.xlu1 %1593  ;;  %v8485_v59 = vld [vmem:[#allocation189_spill] sm:$0xff] }
 0x6d6   : > { %v1406_v29 = vadd.f32 %v1405_v18, %v8470_v31  ;;  %v1443_v6 = vadd.f32 %v1442_v45, %v8472_v9  ;;  %v1701_v32 = vmax.f32 %v1637_v28, 0.0  ;;  %v8478_v16 = vmax.f32 %v8477_v43, 0.0  ;;  %v8479_v31 = vld [vmem:[#allocation157_spill] sm:$0xff]  ;;  %v8486_v43 = vld [vmem:[#allocation42_spill] sm:$0xff] }
 0x6d7   : > { %v1064_v46 = vadd.f32 %v1063_v1, %v8474_v57  ;;  %v1101_v54 = vadd.f32 %v1100_v14, %v8476_v38  ;;  %v8480_v53 = vmax.f32 %v8479_v31, 0.0  ;;  %v2048_v9 = vmax.f32 %v6674_v4, 0.0  ;;  %v8483_v1 = vld [vmem:[#allocation94_spill] sm:$0xff]  ;;  %v8568_v4 = vld [vmem:[#allocation144_spill] sm:$0xff] }
 0x6d8   : > { %v1407_v18 = vadd.f32 %v1406_v29, %v8478_v16  ;;  %v8484_v57 = vmax.f32 %v8483_v1, 0.0  ;;  %v1749_v14 = vadd.f32 %v6286_v27, %v1700_v47  ;;  %v1786_v28 = vadd.f32 %v8485_v59, %v1701_v32  ;;  %v8488_v16 = vld [vmem:[#allocation37_spill] sm:$0xff]  ;;  %v8494_v59 = vld [vmem:[#allocation70_spill] sm:$0xff] }
 0x6d9   : > { %v1444_v45 = vadd.f32 %v1443_v6, %v8480_v53  ;;  %v1065_v2 = vadd.f32 %v1064_v46, %v8482_v15  ;;  %v8487_v29 = vmax.f32 %v8486_v43, 0.0  ;;  %v8489_v6 = vmax.f32 %v8488_v16, 0.0 }
 0x6da   : > { %v1102_v41 = vadd.f32 %v1101_v54, %v8484_v57  ;;  %v6700_v53 = vadd.f32 %v4486_v35, %v1594_v51  ;;  %v6703_v50 = vadd.f32 %v4488_v56, %v1594_v51  ;;  %v8491_v15 = vmax.f32 %v8490_v20, 0.0  ;;  %v8492_v54 = vld [vmem:[#allocation58_spill] sm:$0xff]  ;;  %v1944_v57 = vpop.permute.xlu0 %1943  ;;  %v8498_v51 = vld [vmem:[#allocation163_spill] sm:$0xff] }
 0x6db   : > { %v1408_v38 = vadd.f32 %v1407_v18, %v8487_v29  ;;  %v1445_v31 = vadd.f32 %v1444_v45, %v8489_v6  ;;  %v8493_v1 = vmax.f32 %v8492_v54, 0.0  ;;  %v1750_v47 = vadd.f32 %v1749_v14, %v1702_v5  ;;  %v8496_v29 = vld [vmem:[#allocation71_spill] sm:$0xff] }
 0x6dc   : > { %v1066_v46 = vadd.f32 %v1065_v2, %v8491_v15  ;;  %v1787_v32 = vadd.f32 %v1786_v28, %v1703_v21  ;;  %v8495_v18 = vmax.f32 %v8494_v59, 0.0  ;;  %v8497_v45 = vmax.f32 %v8496_v29, 0.0  ;;  %v8500_v2 = vld [vmem:[#allocation184_spill] sm:$0xff]  ;;  %v8504_v14 = vld [vmem:[#allocation119_spill] sm:$0xff] }
 0x6dd   : > { %v1103_v27 = vadd.f32 %v1102_v41, %v8493_v1  ;;  %v1732_v35 = vmax.f32 %v6700_v53, 0.0  ;;  %v8499_v6 = vmax.f32 %v8498_v51, 0.0  ;;  %v8501_v15 = vmax.f32 %v8500_v2, 0.0  ;;  %v8502_v41 = vld [vmem:[#allocation117_spill] sm:$0xff]  ;;  %v8512_v2 = vld [vmem:[#allocation140_spill] sm:$0xff] }
 0x6de   : > { %v1409_v43 = vadd.f32 %v1408_v38, %v8495_v18  ;;  %v1446_v16 = vadd.f32 %v1445_v31, %v8497_v45  ;;  %v8503_v5 = vmax.f32 %v8502_v41, 0.0  ;;  %v8505_v28 = vmax.f32 %v8504_v14, 0.0  ;;  %v8506_v38 = vld [vmem:[#allocation73_spill] sm:$0xff]  ;;  %v8508_v31 = vld [vmem:[#allocation68_spill] sm:$0xff]  ;;  %v1876_v14 = vpop.permute.xlu1 %1875 }
 0x6df   : > { %v1067_v20 = vadd.f32 %v1066_v46, %v8499_v6  ;;  %v1104_v54 = vadd.f32 %v1103_v27, %v8501_v15  ;;  %v8507_v59 = vmax.f32 %v8506_v38, 0.0  ;;  %v8509_v29 = vmax.f32 %v8508_v31, 0.0  ;;  %v8514_v41 = vld [vmem:[#allocation141_spill] sm:$0xff] }
 0x6e0   : > { %v1751_v21 = vadd.f32 %v1750_v47, %v8503_v5  ;;  %v1788_v1 = vadd.f32 %v1787_v32, %v8505_v28  ;;  %v6728_v56 = vadd.f32 %v4490_v39, %v1944_v57  ;;  %v6731_v46 = vadd.f32 %v4492_v3, %v1944_v57 }
 0x6e1   : > { %v1410_v18 = vadd.f32 %v1409_v43, %v8507_v59  ;;  %v1447_v45 = vadd.f32 %v1446_v16, %v8509_v29  ;;  %v8510_v27 = vmax.f32 %v6471_v10, 0.0  ;;  %v8511_v47 = vmax.f32 %v6475_v30, 0.0  ;;  %v8516_v16 = vld [vmem:[#allocation129_spill] sm:$0xff]  ;;  %v8518_v59 = vld [vmem:[#allocation118_spill] sm:$0xff] }
 0x6e2   : > { %v8513_v32 = vmax.f32 %v8512_v2, 0.0  ;;  %v8515_v43 = vmax.f32 %v8514_v41, 0.0  ;;  %v8517_v28 = vmax.f32 %v8516_v16, 0.0  ;;  %v8519_v31 = vmax.f32 %v8518_v59, 0.0  ;;  %v8524_v2 = vld [vmem:[#allocation43_spill] sm:$0xff] }
 0x6e3   : > { %v1068_v51 = vadd.f32 %v1067_v20, %v8510_v27  ;;  %v1105_v6 = vadd.f32 %v1104_v54, %v8511_v47  ;;  %v2080_v29 = vmax.f32 %v6728_v56, 0.0  ;;  %v2081_v10 = vmax.f32 %v6731_v46, 0.0  ;;  %v8522_v27 = vld [vmem:[#allocation41_spill] sm:$0xff]  ;;  %v8684_v46 = vld [vmem:[#allocation211_spill] sm:$0xff] }
 0x6e4   : > { %v1752_v15 = vadd.f32 %v1751_v21, %v8513_v32  ;;  %v1789_v5 = vadd.f32 %v1788_v1, %v8515_v43  ;;  %v1411_v38 = vadd.f32 %v1410_v18, %v8517_v28  ;;  %v1448_v57 = vadd.f32 %v1447_v45, %v8519_v31  ;;  %v8526_v18 = vld [vmem:[#allocation126_spill] sm:$0xff]  ;;  %v8528_v45 = vld [vmem:[#allocation112_spill] sm:$0xff] }
 0x6e5   : > { %v8520_v30 = vmax.f32 %v6453_v7, 0.0  ;;  %v8521_v54 = vmax.f32 %v6457_v8, 0.0  ;;  %v8523_v47 = vmax.f32 %v8522_v27, 0.0  ;;  %v8525_v32 = vmax.f32 %v8524_v2, 0.0 }
 0x6e6   : > { %v8527_v43 = vmax.f32 %v8526_v18, 0.0  ;;  %v8529_v28 = vmax.f32 %v8528_v45, 0.0  ;;  %v1982_v31 = vadd.f32 %v4490_v39, %v1876_v14  ;;  %v1983_v7 = vadd.f32 %v4492_v3, %v1876_v14 }
 0x6e7   : > { %v1069_v20 = vadd.f32 %v1068_v51, %v8520_v30  ;;  %v1106_v21 = vadd.f32 %v1105_v6, %v8521_v54  ;;  %v1753_v1 = vadd.f32 %v1752_v15, %v8523_v47  ;;  %v1790_v41 = vadd.f32 %v1789_v5, %v8525_v32  ;;  %v8532_v15 = vld [vmem:[#allocation40_spill] sm:$0xff]  ;;  %v8534_v5 = vld [vmem:[#allocation46_spill] sm:$0xff] }
 0x6e8   : > { %v1412_v16 = vadd.f32 %v1411_v38, %v8527_v43  ;;  %v1449_v59 = vadd.f32 %v1448_v57, %v8529_v28  ;;  %v8530_v51 = vmax.f32 %v6093_v19, 0.0  ;;  %v8531_v6 = vmax.f32 %v6096_v0, 0.0  ;;  %v8536_v38 = vld [vmem:[#allocation17_spill] sm:$0xff]  ;;  %v8538_v57 = vld [vmem:[#allocation168_spill] sm:$0xff] }
 0x6e9   : > { %v8533_v54 = vmax.f32 %v8532_v15, 0.0  ;;  %v8535_v47 = vmax.f32 %v8534_v5, 0.0  ;;  %v8537_v32 = vmax.f32 %v8536_v38, 0.0  ;;  %v8539_v43 = vmax.f32 %v8538_v57, 0.0  ;;  %v8544_v15 = vld [vmem:[#allocation74_spill] sm:$0xff]  ;;  %v8546_v5 = vld [vmem:[#allocation20_spill] sm:$0xff] }
 0x6ea   : > { %v1070_v8 = vadd.f32 %v1069_v20, %v8530_v51  ;;  %v1107_v30 = vadd.f32 %v1106_v21, %v8531_v6  ;;  %v2046_v28 = vmax.f32 %v1982_v31, 0.0  ;;  %v2047_v14 = vmax.f32 %v1983_v7, 0.0  ;;  %v8542_v51 = vld [vmem:[#allocation77_spill] sm:$0xff] }
 0x6eb   : > { %v1754_v27 = vadd.f32 %v1753_v1, %v8533_v54  ;;  %v1791_v2 = vadd.f32 %v1790_v41, %v8535_v47  ;;  %v1413_v18 = vadd.f32 %v1412_v16, %v8537_v32  ;;  %v1450_v45 = vadd.f32 %v1449_v59, %v8539_v43  ;;  %v8548_v38 = vld [vmem:[#allocation185_spill] sm:$0xff] }
 0x6ec   : > { %v8540_v19 = vmax.f32 %v6049_v36, 0.0  ;;  %v8541_v0 = vmax.f32 %v6052_v11, 0.0  ;;  %v8543_v6 = vmax.f32 %v8542_v51, 0.0  ;;  %v8545_v54 = vmax.f32 %v8544_v15, 0.0  ;;  %v8550_v7 = vld [vmem:[#allocation197_spill] sm:$0xff]  ;;  %v8562_v15 = vld [vmem:[#allocation99_spill] sm:$0xff] }
 0x6ed   : > { %v8547_v47 = vmax.f32 %v8546_v5, 0.0  ;;  %v8549_v32 = vmax.f32 %v8548_v38, 0.0  ;;  %v2095_v31 = vadd.f32 %v6368_v13, %v2046_v28  ;;  %v2132_v36 = vadd.f32 %v8550_v7, %v2047_v14 }
 0x6ee   : > { %v1071_v20 = vadd.f32 %v1070_v8, %v8540_v19  ;;  %v1108_v21 = vadd.f32 %v1107_v30, %v8541_v0  ;;  %v1755_v1 = vadd.f32 %v1754_v27, %v8543_v6  ;;  %v1792_v41 = vadd.f32 %v1791_v2, %v8545_v54  ;;  %v8553_v27 = vld [vmem:[#allocation72_spill] sm:$0xff]  ;;  %v8555_v2 = vld [vmem:[#allocation170_spill] sm:$0xff] }
 0x6ef   : > { %v1414_v16 = vadd.f32 %v1413_v18, %v8547_v47  ;;  %v1451_v59 = vadd.f32 %v1450_v45, %v8549_v32  ;;  %v8551_v8 = vmax.f32 %v6592_v49, 0.0  ;;  %v8552_v30 = vmax.f32 %v6595_v61, 0.0 }
 0x6f0   : > { %v8554_v43 = vmax.f32 %v8553_v27, 0.0  ;;  %v8556_v0 = vmax.f32 %v8555_v2, 0.0  ;;  %v8557_v18 = vmax.f32 %v6481_v33, 0.0  ;;  %v8558_v45 = vmax.f32 %v6485_v62, 0.0  ;;  %v8564_v33 = vld [vmem:[#allocation177_spill] sm:$0xff]  ;;  %v8566_v62 = vld [vmem:[#allocation22_spill] sm:$0xff] }
 0x6f1   : > { %v1072_v11 = vadd.f32 %v1071_v20, %v8551_v8  ;;  %v1109_v57 = vadd.f32 %v1108_v21, %v8552_v30  ;;  %v2096_v28 = vadd.f32 %v2095_v31, %v2048_v9  ;;  %v8559_v49 = vmax.f32 %v6677_v24, 0.0  ;;  %v8570_v24 = vld [vmem:[#allocation122_spill] sm:$0xff]  ;;  %v8574_v30 = vld [vmem:[#allocation120_spill] sm:$0xff] }
 0x6f2   : > { %v1756_v19 = vadd.f32 %v1755_v1, %v8554_v43  ;;  %v1793_v51 = vadd.f32 %v1792_v41, %v8556_v0  ;;  %v1415_v6 = vadd.f32 %v1414_v16, %v8557_v18  ;;  %v1452_v13 = vadd.f32 %v1451_v59, %v8558_v45  ;;  %v8576_v43 = vld [vmem:[#allocation182_spill] sm:$0xff]  ;;  %v8580_v45 = vld [vmem:[#allocation143_spill] sm:$0xff] }
 0x6f3   : > { %v2133_v14 = vadd.f32 %v2132_v36, %v8559_v49  ;;  %v8560_v61 = vmax.f32 %v6562_v48, 0.0  ;;  %v8561_v21 = vmax.f32 %v6565_v63, 0.0  ;;  %v8563_v54 = vmax.f32 %v8562_v15, 0.0  ;;  %v8572_v48 = vld [vmem:[#allocation123_spill] sm:$0xff]  ;;  %v6819_v63 = vpop.permute.xlu1 %1939  ;;  %v8582_v49 = vld [vmem:[#allocation145_spill] sm:$0xff] }
 0x6f4   : > { %v8565_v5 = vmax.f32 %v8564_v33, 0.0  ;;  %v8567_v16 = vmax.f32 %v8566_v62, 0.0  ;;  %v8569_v9 = vmax.f32 %v8568_v4, 0.0  ;;  %v8571_v59 = vmax.f32 %v8570_v24, 0.0  ;;  %v8590_v4 = vld [vmem:[#allocation47_spill] sm:$0xff]  ;;  %v8592_v24 = vld [vmem:[#allocation162_spill] sm:$0xff] }
 0x6f5   : > { %v1073_v20 = vadd.f32 %v1072_v11, %v8560_v61  ;;  %v1110_v1 = vadd.f32 %v1109_v57, %v8561_v21  ;;  %v1757_v41 = vadd.f32 %v1756_v19, %v8563_v54  ;;  %v8573_v7 = vmax.f32 %v8572_v48, 0.0  ;;  %v8584_v54 = vld [vmem:[#allocation67_spill] sm:$0xff]  ;;  %v8594_v48 = vld [vmem:[#allocation60_spill] sm:$0xff] }
 0x6f6   : > { %v1794_v47 = vadd.f32 %v1793_v51, %v8565_v5  ;;  %v1416_v38 = vadd.f32 %v1415_v6, %v8567_v16  ;;  %v1453_v32 = vadd.f32 %v1452_v13, %v8569_v9  ;;  %v2097_v31 = vadd.f32 %v2096_v28, %v8571_v59  ;;  %v8586_v5 = vld [vmem:[#allocation191_spill] sm:$0xff] }
 0x6f7   : > { %v2134_v36 = vadd.f32 %v2133_v14, %v8573_v7  ;;  %v1074_v8 = vrot.slane %v1073_v20, 4  ;;  %v1111_v11 = vrot.slane %v1110_v1, 4  ;;  %v8575_v57 = vmax.f32 %v8574_v30, 0.0 }
 0x6f8   : > { %v8577_v19 = vmax.f32 %v8576_v43, 0.0  ;;  %v8578_v0 = vmax.f32 %v6172_v34, 0.0  ;;  %v8579_v18 = vmax.f32 %v8427_v37, 0.0  ;;  %v8581_v13 = vmax.f32 %v8580_v45, 0.0  ;;  %v8600_v43 = vld [vmem:[#allocation50_spill] sm:$0xff] }
 0x6f9   : > { %v1758_v27 = vadd.f32 %v1757_v41, %v8575_v57  ;;  %v8583_v14 = vmax.f32 %v8582_v49, 0.0  ;;  %v1075_v21 = vadd.f32 %v1074_v8, %v1073_v20  ;;  %v1112_v15 = vadd.f32 %v1111_v11, %v1110_v1  ;;  %v8596_v8 = vld [vmem:[#allocation190_spill] sm:$0xff] }
 0x6fa   : > { %v1795_v2 = vadd.f32 %v1794_v47, %v8577_v19  ;;  %v1417_v51 = vadd.f32 %v1416_v38, %v8578_v0  ;;  %v1454_v6 = vadd.f32 %v1453_v32, %v8579_v18  ;;  %v2098_v28 = vadd.f32 %v2097_v31, %v8581_v13  ;;  %v8602_v0 = vld [vmem:[#allocation45_spill] sm:$0xff] }
 0x6fb   : > { %v2135_v61 = vadd.f32 %v2134_v36, %v8583_v14  ;;  %v8585_v33 = vmax.f32 %v8584_v54, 0.0  ;;  %v8587_v62 = vmax.f32 %v8586_v5, 0.0  ;;  %v8588_v34 = vmax.f32 %v6101_v26, 0.0 }
 0x6fc   : > { %v8589_v37 = vmax.f32 %v6104_v12, 0.0  ;;  %v8591_v9 = vmax.f32 %v8590_v4, 0.0  ;;  %v8593_v59 = vmax.f32 %v8592_v24, 0.0  ;;  %v1076_v20 = vrot.slane %v1075_v21, 2 }
 0x6fd   : > { %v1759_v41 = vadd.f32 %v1758_v27, %v8585_v33  ;;  %v1796_v47 = vadd.f32 %v1795_v2, %v8587_v62  ;;  %v1418_v16 = vadd.f32 %v1417_v51, %v8588_v34  ;;  %v1113_v1 = vrot.slane %v1112_v15, 2  ;;  %v2226_v33 = vpop.permute.xlu0 %2225 }
 0x6fe   : > { %v1455_v38 = vadd.f32 %v1454_v6, %v8589_v37  ;;  %v2099_v32 = vadd.f32 %v2098_v28, %v8591_v9  ;;  %v2136_v31 = vadd.f32 %v2135_v61, %v8593_v59  ;;  %v8595_v7 = vmax.f32 %v8594_v48, 0.0  ;;  %v6857_v6 = vpop.permute.xlu1 %2221  ;;  %v8604_v28 = vld [vmem:[#allocation24_spill] sm:$0xff]  ;;  %v8612_v37 = vld [vmem:[#allocation78_spill] sm:$0xff]  ;;  %v8614_v9 = vld [vmem:[#allocation27_spill] sm:$0xff] }
 0x6ff   : > { %v8597_v11 = vmax.f32 %v8596_v8, 0.0  ;;  %v8598_v26 = vmax.f32 %v6636_v55, 0.0  ;;  %v8599_v12 = vmax.f32 %v6639_v52, 0.0  ;;  %v8601_v19 = vmax.f32 %v8600_v43, 0.0  ;;  %v8606_v61 = vld [vmem:[#allocation164_spill] sm:$0xff]  ;;  %v8616_v59 = vld [vmem:[#allocation26_spill] sm:$0xff] }
 0x700   : > { %v1760_v36 = vadd.f32 %v1759_v41, %v8595_v7  ;;  %v8603_v51 = vmax.f32 %v8602_v0, 0.0  ;;  %v1077_v45 = vadd.f32 %v1076_v20, %v1075_v21  ;;  %v1114_v13 = vadd.f32 %v1113_v1, %v1112_v15  ;;  %v8618_v48 = vld [vmem:[#allocation76_spill] sm:$0xff]  ;;  %v8624_v0 = vld [vmem:[#allocation103_spill] sm:$0xff] }
 0x701   : > { %v1797_v30 = vadd.f32 %v1796_v47, %v8597_v11  ;;  %v1419_v57 = vadd.f32 %v1418_v16, %v8598_v26  ;;  %v1456_v27 = vadd.f32 %v1455_v38, %v8599_v12  ;;  %v2100_v2 = vadd.f32 %v2099_v32, %v8601_v19  ;;  %v8610_v47 = vld [vmem:[#allocation81_spill] sm:$0xff] }
 0x702   : > { %v2137_v18 = vadd.f32 %v2136_v31, %v8603_v51  ;;  %v8605_v49 = vmax.f32 %v8604_v28, 0.0  ;;  %v8607_v54 = vmax.f32 %v8606_v61, 0.0  ;;  %v8608_v52 = vmax.f32 %v6612_v17, 0.0 }
 0x703   : > { %v8609_v5 = vmax.f32 %v6615_v40, 0.0  ;;  %v8611_v34 = vmax.f32 %v8610_v47, 0.0  ;;  %v8613_v38 = vmax.f32 %v8612_v37, 0.0  ;;  %v1078_v15 = vrot.slane %v1077_v45, 1 }
 0x704   : > { %v1761_v14 = vadd.f32 %v1760_v36, %v8605_v49  ;;  %v1798_v55 = vadd.f32 %v1797_v30, %v8607_v54  ;;  %v1420_v41 = vadd.f32 %v1419_v57, %v8608_v52  ;;  %v1115_v4 = vrot.slane %v1114_v13, 1  ;;  %v8620_v36 = vld [vmem:[#allocation173_spill] sm:$0xff]  ;;  %v6889_v49 = vpop.permute.xlu1 %2285  ;;  %v8629_v54 = vld [vmem:[#allocation19_spill] sm:$0xff] }
 0x705   : > { %v1457_v62 = vadd.f32 %v1456_v27, %v8609_v5  ;;  %v2101_v16 = vadd.f32 %v2100_v2, %v8611_v34  ;;  %v2138_v21 = vadd.f32 %v2137_v18, %v8613_v38  ;;  %v8615_v32 = vmax.f32 %v8614_v9, 0.0  ;;  %v8625_v18 = vld [vmem:[#allocation104_spill] sm:$0xff]  ;;  %v8632_v9 = vld [vmem:[#allocation181_spill] sm:$0xff] }
 0x706   : > { %v8617_v31 = vmax.f32 %v8616_v59, 0.0  ;;  %v1421_v1 = vrot.slane %v1420_v41, 4  ;;  %v8619_v7 = vmax.f32 %v8618_v48, 0.0  ;;  %v8621_v8 = vmax.f32 %v8620_v36, 0.0  ;;  %v8634_v59 = vld [vmem:[#allocation101_spill] sm:$0xff]  ;;  %v8638_v48 = vld [vmem:[#allocation180_spill] sm:$0xff] }
 0x707   : > { %v1762_v24 = vadd.f32 %v1761_v14, %v8615_v32  ;;  %v1458_v17 = vrot.slane %v1457_v62, 4  ;;  %v1079_v30 = vadd.f32 %v1078_v15, %v1077_v45  ;;  %v1116_v26 = vadd.f32 %v1115_v4, %v1114_v13  ;;  %v8626_v14 = vld [vmem:[#allocation2_spill] sm:$0xff] }
 0x708   : > { %v1799_v20 = vadd.f32 %v1798_v55, %v8617_v31  ;;  %v2102_v40 = vadd.f32 %v2101_v16, %v8619_v7  ;;  %v2139_v11 = vadd.f32 %v2138_v21, %v8621_v8  ;;  %v8622_v57 = vmax.f32 %v6257_v25, 0.0  ;;  %v8627_v25 = vld [vmem:[#allocation34_spill] sm:$0xff] }
 0x709   : > { %v8623_v27 = vmax.f32 %v8430_v60, 0.0  ;;  %v1422_v19 = vadd.f32 %v1421_v1, %v1420_v41  ;;  %v1459_v2 = vadd.f32 %v1458_v17, %v1457_v62  ;;  %v6884_v51 = vadd.f32 %v8624_v0, %v2226_v33  ;;  %v2290_v41 = vpop.permute.xlu0 %2289  ;;  %v8640_v8 = vld [vmem:[#allocation10_spill] sm:$0xff] }
 0x70a   : > { %v1763_v12 = vadd.f32 %v1762_v24, %v8622_v57  ;;  %v6887_v28 = vadd.f32 %v8625_v18, %v2226_v33  ;;  %v6892_v61 = vmul.f32 %v8626_v14, %v1079_v30  ;;  %v6895_v45 = vmul.f32 %v8626_v14, %v1116_v26  ;;  %v2568_v26 = vpop.permute.xlu1 %2567 }
 0x70b   : > { %v1800_v43 = vadd.f32 %v1799_v20, %v8623_v27  ;;  %v8628_v13 = vmax.f32 %v8627_v25, 0.0  ;;  %v8630_v55 = vmax.f32 %v8629_v54, 0.0  ;;  %v1423_v5 = vrot.slane %v1422_v19, 2  ;;  %v8644_v25 = vld [vmem:[#allocation193_spill] sm:$0xff] }
 0x70c   : > { %v1460_v62 = vrot.slane %v1459_v2, 2  ;;  %v2394_v33 = vmax.f32 %v6884_v51, 0.0  ;;  %v2395_v47 = vmax.f32 %v6887_v28, 0.0  ;;  %v8631_v16 = vmax.f32 %v6703_v50, 0.0  ;;  %v8671_v51 = vld [vmem:[#allocation125_spill] sm:$0xff] }
 0x70d   : > { %v1764_v60 = vadd.f32 %v1763_v12, %v8628_v13  ;;  %v1801_v52 = vadd.f32 %v1800_v43, %v8630_v55  ;;  %v6909_v38 = vadd.f32 %v4490_v39, %v6819_v63  ;;  %v6913_v21 = vadd.f32 %v4492_v3, %v6819_v63  ;;  %v2572_v12 = vpop.permute.xlu0 %2571 }
 0x70e   : > { %v1424_v15 = vadd.f32 %v1423_v5, %v1422_v19  ;;  %v1461_v4 = vadd.f32 %v1460_v62, %v1459_v2  ;;  %v8633_v32 = vmax.f32 %v8632_v9, 0.0  ;;  %v8635_v31 = vmax.f32 %v8634_v59, 0.0  ;;  %v8642_v19 = vld [vmem:[#allocation75_spill] sm:$0xff] }
 0x70f   : > { %v1765_v34 = vadd.f32 %v1764_v60, %v1732_v35  ;;  %v1802_v37 = vadd.f32 %v1801_v52, %v8631_v16  ;;  %v8636_v35 = vmax.f32 %v6646_v23, 0.0  ;;  %v8637_v20 = vmax.f32 %v6649_v42, 0.0  ;;  %v8646_v62 = vld [vmem:[#allocation3_spill] sm:$0xff]  ;;  %v8647_v16 = vld [vmem:[#allocation169_spill] sm:$0xff] }
 0x710   : > { %v2103_v24 = vadd.f32 %v2102_v40, %v8633_v32  ;;  %v2140_v53 = vadd.f32 %v2139_v11, %v8635_v31  ;;  %v2078_v39 = vmax.f32 %v6909_v38, 0.0  ;;  %v2079_v17 = vmax.f32 %v6913_v21, 0.0 }
 0x711   : > { %v1766_v50 = vadd.f32 %v1765_v34, %v8636_v35  ;;  %v1803_v1 = vadd.f32 %v1802_v37, %v8637_v20  ;;  %v1425_v3 = vrot.slane %v1424_v15, 1  ;;  %v1462_v63 = vrot.slane %v1461_v4, 1  ;;  %v8651_v35 = vld [vmem:[#allocation57_spill] sm:$0xff] }
 0x712   : > { %v8639_v7 = vmax.f32 %v8638_v48, 0.0  ;;  %v8641_v40 = vmax.f32 %v8640_v8, 0.0  ;;  %v6930_v23 = vadd.f32 %v8624_v0, %v2290_v41  ;;  %v6933_v42 = vadd.f32 %v8625_v18, %v2290_v41  ;;  %v8655_v48 = vld [vmem:[#allocation105_spill] sm:$0xff] }
 0x713   : > { %v1767_v11 = vrot.slane %v1766_v50, 4  ;;  %v1804_v57 = vrot.slane %v1803_v1, 4  ;;  %v1426_v27 = vadd.f32 %v1425_v3, %v1424_v15  ;;  %v1463_v43 = vadd.f32 %v1462_v63, %v1461_v4  ;;  %v8649_v4 = vld [vmem:[#allocation192_spill] sm:$0xff] }
 0x714   : > { %v2104_v36 = vadd.f32 %v2103_v24, %v8639_v7  ;;  %v2141_v30 = vadd.f32 %v2140_v53, %v8641_v40  ;;  %v8643_v2 = vmax.f32 %v8642_v19, 0.0  ;;  %v8645_v13 = vmax.f32 %v8644_v25, 0.0  ;;  %v6965_v40 = vpop.permute.xlu1 %2631 }
 0x715   : > { %v1768_v54 = vadd.f32 %v1767_v11, %v1766_v50  ;;  %v1805_v55 = vadd.f32 %v1804_v57, %v1803_v1  ;;  %v2426_v52 = vmax.f32 %v6930_v23, 0.0  ;;  %v2427_v5 = vmax.f32 %v6933_v42, 0.0  ;;  %v8653_v1 = vld [vmem:[#allocation23_spill] sm:$0xff] }
 0x716   : > { %v2105_v14 = vadd.f32 %v2104_v36, %v8643_v2  ;;  %v2142_v60 = vadd.f32 %v2141_v30, %v8645_v13  ;;  %v6942_v34 = vmul.f32 %v8646_v62, %v1426_v27  ;;  %v6945_v41 = vmul.f32 %v8646_v62, %v1463_v43  ;;  %v8656_v36 = vld [vmem:[#allocation106_spill] sm:$0xff]  ;;  %v2636_v43 = vpop.permute.xlu0 %2635  ;;  %v8800_v23 = vld [vmem:[#allocation131_spill] sm:$0xff] }
 0x717   : > { %v8648_v37 = vmax.f32 %v8647_v16, 0.0  ;;  %v8650_v9 = vmax.f32 %v8649_v4, 0.0  ;;  %v1769_v24 = vrot.slane %v1768_v54, 2  ;;  %v1806_v59 = vrot.slane %v1805_v55, 2  ;;  %v8662_v4 = vld [vmem:[#allocation207_spill] sm:$0xff] }
 0x718   : > { %v2328_v31 = vadd.f32 %v8624_v0, %v6857_v6  ;;  %v2329_v53 = vadd.f32 %v8625_v18, %v6857_v6  ;;  %v8652_v50 = vmax.f32 %v8651_v35, 0.0  ;;  %v8654_v3 = vmax.f32 %v8653_v1, 0.0  ;;  %v8657_v6 = vld [vmem:[#allocation25_spill] sm:$0xff] }
 0x719   : > { %v2106_v15 = vadd.f32 %v2105_v14, %v8648_v37  ;;  %v2143_v32 = vadd.f32 %v2142_v60, %v8650_v9  ;;  %v6960_v7 = vadd.f32 %v8655_v48, %v2572_v12  ;;  %v6963_v8 = vadd.f32 %v8656_v36, %v2572_v12  ;;  %v8659_v14 = vld [vmem:[#allocation32_spill] sm:$0xff]  ;;  %v8661_v37 = vld [vmem:[#allocation206_spill] sm:$0xff] }
 0x71a   : > { %v1770_v30 = vadd.f32 %v1769_v24, %v1768_v54  ;;  %v1807_v11 = vadd.f32 %v1806_v59, %v1805_v55  ;;  %v2392_v57 = vmax.f32 %v2328_v31, 0.0  ;;  %v2393_v27 = vmax.f32 %v2329_v53, 0.0 }
 0x71b   : > { %v2107_v20 = vadd.f32 %v2106_v15, %v8652_v50  ;;  %v2144_v63 = vadd.f32 %v2143_v32, %v8654_v3  ;;  %v8658_v19 = vmax.f32 %v8657_v6, 0.0  ;;  %v8660_v25 = vmax.f32 %v8659_v14, 0.0  ;;  %v8667_v3 = vld [vmem:[#allocation188_spill] sm:$0xff] }
 0x71c   : > { %v2740_v60 = vmax.f32 %v6960_v7, 0.0  ;;  %v2741_v62 = vmax.f32 %v6963_v8, 0.0  ;;  %v1771_v16 = vrot.slane %v1770_v30, 1  ;;  %v1808_v12 = vrot.slane %v1807_v11, 1  ;;  %v8669_v8 = vld [vmem:[#allocation124_spill] sm:$0xff] }
 0x71d   : > { %v2108_v2 = vadd.f32 %v2107_v20, %v8658_v19  ;;  %v2145_v13 = vadd.f32 %v2144_v63, %v8660_v25  ;;  %v2441_v15 = vadd.f32 %v8661_v37, %v2392_v57  ;;  %v2478_v54 = vadd.f32 %v8662_v4, %v2393_v27  ;;  %v2918_v27 = vpop.permute.xlu0 %2917  ;;  %v8673_v25 = vld [vmem:[#allocation146_spill] sm:$0xff] }
 0x71e   : > { %v8663_v55 = vmax.f32 %v6340_v44, 0.0  ;;  %v8664_v32 = vmax.f32 %v6343_v58, 0.0  ;;  %v6981_v59 = vadd.f32 %v8624_v0, %v6889_v49  ;;  %v6985_v31 = vadd.f32 %v8625_v18, %v6889_v49  ;;  %v8665_v58 = vld [vmem:[#allocation187_spill] sm:$0xff]  ;;  %v7001_v49 = vpop.permute.xlu1 %2913 }
 0x71f   : > { %v6987_v53 = vadd.f32 %v1771_v16, %v1770_v30  ;;  %v6989_v35 = vadd.f32 %v1808_v12, %v1807_v11  ;;  %v2442_v50 = vadd.f32 %v2441_v15, %v2394_v33  ;;  %v2479_v44 = vadd.f32 %v2478_v54, %v2395_v47  ;;  %v8675_v12 = vld [vmem:[#allocation147_spill] sm:$0xff]  ;;  %v8677_v54 = vld [vmem:[#allocation49_spill] sm:$0xff] }
 0x720   : > { %v2109_v9 = vadd.f32 %v2108_v2, %v8663_v55  ;;  %v2146_v24 = vadd.f32 %v2145_v13, %v8664_v32  ;;  %v8666_v20 = vmax.f32 %v8665_v58, 0.0  ;;  %v8668_v0 = vmax.f32 %v8667_v3, 0.0  ;;  %v8682_v58 = vld [vmem:[#allocation110_spill] sm:$0xff] }
 0x721   : > { %v2424_v7 = vmax.f32 %v6981_v59, 0.0  ;;  %v2425_v18 = vmax.f32 %v6985_v31, 0.0  ;;  %v8670_v30 = vmax.f32 %v8669_v8, 0.0  ;;  %v8672_v33 = vmax.f32 %v8671_v51, 0.0 }
 0x722   : > { %v2110_v1 = vadd.f32 %v2109_v9, %v8666_v20  ;;  %v2147_v63 = vadd.f32 %v2146_v24, %v8668_v0  ;;  %v7008_v28 = vadd.f32 %v8655_v48, %v2636_v43  ;;  %v7011_v47 = vadd.f32 %v8656_v36, %v2636_v43  ;;  %v8679_v9 = vld [vmem:[#allocation18_spill] sm:$0xff]  ;;  %v7041_v0 = vpop.permute.xlu1 %3263  ;;  %v8745_v43 = vld [vmem:[#allocation149_spill] sm:$0xff] }
 0x723   : > { %v2443_v11 = vadd.f32 %v2442_v50, %v8670_v30  ;;  %v2480_v57 = vadd.f32 %v2479_v44, %v8672_v33  ;;  %v2674_v2 = vadd.f32 %v8655_v48, %v2568_v26  ;;  %v2675_v14 = vadd.f32 %v8656_v36, %v2568_v26  ;;  %v8681_v50 = vld [vmem:[#allocation107_spill] sm:$0xff] }
 0x724   : > { %v2111_v6 = vadd.f32 %v2110_v1, %v2078_v39  ;;  %v2148_v19 = vadd.f32 %v2147_v63, %v2079_v17  ;;  %v8674_v13 = vmax.f32 %v8673_v25, 0.0  ;;  %v8676_v37 = vmax.f32 %v8675_v12, 0.0  ;;  %v8685_v63 = vld [vmem:[#allocation48_spill] sm:$0xff] }
 0x725   : > { %v2738_v39 = vmax.f32 %v2674_v2, 0.0  ;;  %v2739_v17 = vmax.f32 %v2675_v14, 0.0  ;;  %v8678_v26 = vmax.f32 %v8677_v54, 0.0  ;;  %v8680_v32 = vmax.f32 %v8679_v9, 0.0 }
 0x726   : > { %v2444_v16 = vadd.f32 %v2443_v11, %v8674_v13  ;;  %v2481_v15 = vadd.f32 %v2480_v57, %v8676_v37  ;;  %v2112_v38 = vadd.f32 %v2111_v6, %v2080_v29  ;;  %v2149_v21 = vadd.f32 %v2148_v19, %v2081_v10  ;;  %v8683_v29 = vld [vmem:[#allocation210_spill] sm:$0xff]  ;;  %v8689_v13 = vld [vmem:[#allocation85_spill] sm:$0xff]  ;;  %v8691_v37 = vld [vmem:[#allocation83_spill] sm:$0xff] }
 0x727   : > { %v7034_v44 = vadd.f32 %v8681_v50, %v2918_v27  ;;  %v7037_v20 = vadd.f32 %v8682_v58, %v2918_v27  ;;  %v2787_v3 = vadd.f32 %v8683_v29, %v2738_v39  ;;  %v2824_v10 = vadd.f32 %v8684_v46, %v2739_v17  ;;  %v8687_v11 = vld [vmem:[#allocation54_spill] sm:$0xff]  ;;  %v3284_v27 = vpop.permute.xlu0 %3283  ;;  %v8699_v29 = vld [vmem:[#allocation175_spill] sm:$0xff] }
 0x728   : > { %v2445_v55 = vadd.f32 %v2444_v16, %v8678_v26  ;;  %v2482_v24 = vadd.f32 %v2481_v15, %v8680_v32  ;;  %v2113_v1 = vrot.slane %v2112_v38, 4  ;;  %v2150_v56 = vrot.slane %v2149_v21, 4 }
 0x729   : > { %v8686_v8 = vmax.f32 %v8685_v63, 0.0  ;;  %v8688_v51 = vmax.f32 %v8687_v11, 0.0  ;;  %v3086_v57 = vmax.f32 %v7034_v44, 0.0  ;;  %v3087_v6 = vmax.f32 %v7037_v20, 0.0  ;;  %v8701_v63 = vld [vmem:[#allocation150_spill] sm:$0xff]  ;;  %v8703_v11 = vld [vmem:[#allocation151_spill] sm:$0xff] }
 0x72a   : > { %v2114_v19 = vadd.f32 %v2113_v1, %v2112_v38  ;;  %v2151_v2 = vadd.f32 %v2150_v56, %v2149_v21  ;;  %v2788_v14 = vadd.f32 %v2787_v3, %v2740_v60  ;;  %v2825_v25 = vadd.f32 %v2824_v10, %v2741_v62  ;;  %v8693_v38 = vld [vmem:[#allocation127_spill] sm:$0xff]  ;;  %v8695_v62 = vld [vmem:[#allocation128_spill] sm:$0xff]  ;;  %v8758_v44 = vld [vmem:[#allocation201_spill] sm:$0xff] }
 0x72b   : > { %v2446_v30 = vadd.f32 %v2445_v55, %v8686_v8  ;;  %v2483_v33 = vadd.f32 %v2482_v24, %v8688_v51  ;;  %v8690_v16 = vmax.f32 %v8689_v13, 0.0  ;;  %v8692_v15 = vmax.f32 %v8691_v37, 0.0  ;;  %v8697_v24 = vld [vmem:[#allocation80_spill] sm:$0xff] }
 0x72c   : > { %v7055_v17 = vadd.f32 %v8655_v48, %v6965_v40  ;;  %v7059_v54 = vadd.f32 %v8656_v36, %v6965_v40  ;;  %v2115_v26 = vrot.slane %v2114_v19, 2  ;;  %v2152_v55 = vrot.slane %v2151_v2, 2  ;;  %v8760_v20 = vld [vmem:[#allocation132_spill] sm:$0xff] }
 0x72d   : > { %v2447_v12 = vadd.f32 %v2446_v30, %v8690_v16  ;;  %v2484_v39 = vadd.f32 %v2483_v33, %v8692_v15  ;;  %v8694_v21 = vmax.f32 %v8693_v38, 0.0  ;;  %v8696_v9 = vmax.f32 %v8695_v62, 0.0 }
 0x72e   : > { %v8698_v1 = vmax.f32 %v8697_v24, 0.0  ;;  %v8700_v3 = vmax.f32 %v8699_v29, 0.0  ;;  %v2770_v48 = vmax.f32 %v7055_v17, 0.0  ;;  %v2771_v10 = vmax.f32 %v7059_v54, 0.0  ;;  %v8715_v29 = vld [vmem:[#allocation102_spill] sm:$0xff] }
 0x72f   : > { %v2789_v60 = vadd.f32 %v2788_v14, %v8694_v21  ;;  %v2826_v32 = vadd.f32 %v2825_v25, %v8696_v9  ;;  %v2116_v36 = vadd.f32 %v2115_v26, %v2114_v19  ;;  %v2153_v40 = vadd.f32 %v2152_v55, %v2151_v2  ;;  %v7075_v14 = vpop.permute.xlu1 %3279  ;;  %v8705_v25 = vld [vmem:[#allocation14_spill] sm:$0xff]  ;;  %v3292_v2 = vpop.permute.xlu0 %3291 }
 0x730   : > { %v2448_v56 = vadd.f32 %v2447_v12, %v8698_v1  ;;  %v2485_v46 = vadd.f32 %v2484_v39, %v8700_v3  ;;  %v8702_v8 = vmax.f32 %v8701_v63, 0.0  ;;  %v8704_v51 = vmax.f32 %v8703_v11, 0.0  ;;  %v8707_v12 = vld [vmem:[#allocation148_spill] sm:$0xff]  ;;  %v8709_v39 = vld [vmem:[#allocation113_spill] sm:$0xff]  ;;  %v8710_v21 = vld [vmem:[#allocation114_spill] sm:$0xff] }
 0x731   : > { %v8706_v13 = vmax.f32 %v8705_v25, 0.0  ;;  %v8708_v37 = vmax.f32 %v8707_v12, 0.0  ;;  %v7082_v38 = vadd.f32 %v8709_v39, %v3284_v27  ;;  %v7085_v19 = vadd.f32 %v8710_v21, %v3284_v27  ;;  %v8717_v63 = vld [vmem:[#allocation137_spill] sm:$0xff]  ;;  %v8739_v11 = vld [vmem:[#allocation158_spill] sm:$0xff] }
 0x732   : > { %v2790_v30 = vadd.f32 %v2789_v60, %v8702_v8  ;;  %v2827_v33 = vadd.f32 %v2826_v32, %v8704_v51  ;;  %v2117_v26 = vrot.slane %v2116_v36, 1  ;;  %v2154_v55 = vrot.slane %v2153_v40, 1  ;;  %v8711_v60 = vld [vmem:[#allocation55_spill] sm:$0xff]  ;;  %v8713_v32 = vld [vmem:[#allocation166_spill] sm:$0xff] }
 0x733   : > { %v2449_v16 = vadd.f32 %v2448_v56, %v8706_v13  ;;  %v2486_v15 = vadd.f32 %v2485_v46, %v8708_v37  ;;  %v8712_v62 = vmax.f32 %v8711_v60, 0.0  ;;  %v8714_v24 = vmax.f32 %v8713_v32, 0.0  ;;  %v8719_v13 = vld [vmem:[#allocation52_spill] sm:$0xff]  ;;  %v8721_v37 = vld [vmem:[#allocation53_spill] sm:$0xff]  ;;  %v8824_v54 = vld [vmem:[#allocation30_spill] sm:$0xff] }
 0x734   : > { %v8716_v56 = vmax.f32 %v8715_v29, 0.0  ;;  %v8718_v46 = vmax.f32 %v8717_v63, 0.0  ;;  %v7097_v51 = vadd.f32 %v2117_v26, %v2116_v36  ;;  %v7099_v25 = vadd.f32 %v2154_v55, %v2153_v40  ;;  %v8727_v40 = vld [vmem:[#allocation89_spill] sm:$0xff]  ;;  %v8729_v63 = vld [vmem:[#allocation87_spill] sm:$0xff] }
 0x735   : > { %v2791_v9 = vadd.f32 %v2790_v30, %v8712_v62  ;;  %v2828_v1 = vadd.f32 %v2827_v33, %v8714_v24  ;;  %v8720_v12 = vmax.f32 %v8719_v13, 0.0  ;;  %v8722_v60 = vmax.f32 %v8721_v37, 0.0  ;;  %v8723_v62 = vld [vmem:[#allocation82_spill] sm:$0xff]  ;;  %v7123_v13 = vpop.permute.xlu1 %3287 }
 0x736   : > { %v2450_v3 = vadd.f32 %v2449_v16, %v8716_v56  ;;  %v2487_v8 = vadd.f32 %v2486_v15, %v8718_v46  ;;  %v8724_v32 = vmax.f32 %v8723_v62, 0.0  ;;  %v8725_v24 = vld [vmem:[#allocation198_spill] sm:$0xff]  ;;  %v3020_v56 = vadd.f32 %v8681_v50, %v7001_v49 }
 0x737   : > { %v2792_v30 = vadd.f32 %v2791_v9, %v8720_v12  ;;  %v2829_v33 = vadd.f32 %v2828_v1, %v8722_v60  ;;  %v8726_v29 = vmax.f32 %v8725_v24, 0.0  ;;  %v3021_v36 = vadd.f32 %v8682_v58, %v7001_v49  ;;  %v8733_v60 = vld [vmem:[#allocation196_spill] sm:$0xff] }
 0x738   : > { %v2451_v16 = vadd.f32 %v2450_v3, %v8724_v32  ;;  %v8728_v26 = vmax.f32 %v8727_v40, 0.0  ;;  %v8730_v9 = vmax.f32 %v8729_v63, 0.0  ;;  %v7118_v1 = vadd.f32 %v8709_v39, %v3292_v2 }
 0x739   : > { %v2488_v15 = vadd.f32 %v2487_v8, %v8726_v29  ;;  %v7121_v3 = vadd.f32 %v8710_v21, %v3292_v2  ;;  %v8731_v8 = vld [vmem:[#allocation172_spill] sm:$0xff]  ;;  %v8734_v62 = vmax.f32 %v8733_v60, 0.0  ;;  %v3084_v32 = vmax.f32 %v3020_v56, 0.0  ;;  %v8735_v29 = vld [vmem:[#allocation165_spill] sm:$0xff] }
 0x73a   : > { %v2793_v55 = vadd.f32 %v2792_v30, %v8728_v26  ;;  %v2830_v46 = vadd.f32 %v2829_v33, %v8730_v9  ;;  %v8732_v12 = vmax.f32 %v8731_v8, 0.0  ;;  %v3085_v24 = vmax.f32 %v3021_v36, 0.0  ;;  %v3300_v30 = vpop.permute.xlu0 %3299  ;;  %v8737_v26 = vld [vmem:[#allocation84_spill] sm:$0xff]  ;;  %v8744_v36 = vld [vmem:[#allocation215_spill] sm:$0xff] }
 0x73b   : > { %v2489_v49 = vadd.f32 %v2488_v15, %v8734_v62  ;;  %v8736_v40 = vmax.f32 %v8735_v29, 0.0  ;;  %v8738_v63 = vmax.f32 %v8737_v26, 0.0  ;;  %v8740_v4 = vmax.f32 %v8739_v11, 0.0  ;;  %v8743_v15 = vld [vmem:[#allocation214_spill] sm:$0xff] }
 0x73c   : > { %v2452_v37 = vadd.f32 %v2451_v16, %v8732_v12  ;;  %v8741_v16 = vld [vmem:[#allocation79_spill] sm:$0xff]  ;;  %v3133_v56 = vadd.f32 %v8743_v15, %v3084_v32  ;;  %v3170_v62 = vadd.f32 %v8744_v36, %v3085_v24  ;;  %v8746_v29 = vmax.f32 %v8745_v43, 0.0  ;;  %v8755_v15 = vld [vmem:[#allocation9_spill] sm:$0xff] }
 0x73d   : > { %v2794_v33 = vadd.f32 %v2793_v55, %v8736_v40  ;;  %v2831_v9 = vadd.f32 %v2830_v46, %v8738_v63  ;;  %v8742_v12 = vmax.f32 %v8741_v16, 0.0  ;;  %v8747_v40 = vld [vmem:[#allocation11_spill] sm:$0xff]  ;;  %v7146_v63 = vadd.f32 %v8709_v39, %v3300_v30 }
 0x73e   : > { %v2453_v8 = vadd.f32 %v2452_v37, %v8740_v4  ;;  %v8748_v26 = vmax.f32 %v8747_v40, 0.0  ;;  %v7149_v27 = vadd.f32 %v8710_v21, %v3300_v30  ;;  %v8749_v4 = vld [vmem:[#allocation154_spill] sm:$0xff]  ;;  %v3134_v24 = vadd.f32 %v3133_v56, %v3086_v57  ;;  %v3308_v2 = vpop.permute.xlu0 %3307 }
 0x73f   : > { %v2490_v60 = vadd.f32 %v2489_v49, %v8742_v12  ;;  %v2795_v55 = vadd.f32 %v2794_v33, %v8746_v29  ;;  %v8750_v11 = vmax.f32 %v8749_v4, 0.0  ;;  %v8751_v49 = vld [vmem:[#allocation64_spill] sm:$0xff]  ;;  %v3171_v43 = vadd.f32 %v3170_v62, %v3087_v6  ;;  %v8762_v4 = vld [vmem:[#allocation133_spill] sm:$0xff] }
 0x740   : > { %v2832_v46 = vadd.f32 %v2831_v9, %v8748_v26  ;;  %v8752_v16 = vmax.f32 %v8751_v49, 0.0  ;;  %v8753_v33 = vld [vmem:[#allocation16_spill] sm:$0xff]  ;;  %v8756_v36 = vmax.f32 %v8755_v15, 0.0  ;;  %v8759_v57 = vmax.f32 %v8758_v44, 0.0  ;;  %v8764_v49 = vld [vmem:[#allocation178_spill] sm:$0xff]  ;;  %v8770_v44 = vld [vmem:[#allocation195_spill] sm:$0xff] }
 0x741   : > { %v2454_v37 = vadd.f32 %v2453_v8, %v8750_v11  ;;  %v8754_v9 = vmax.f32 %v8753_v33, 0.0  ;;  %v7165_v8 = vpop.permute.xlu1 %3295  ;;  %v8761_v6 = vmax.f32 %v8760_v20, 0.0  ;;  %v8766_v33 = vld [vmem:[#allocation200_spill] sm:$0xff]  ;;  %v8823_v17 = vmax.f32 %v7011_v47, 0.0 }
 0x742   : > { %v2491_v32 = vadd.f32 %v2490_v60, %v8752_v16  ;;  %v2833_v29 = vadd.f32 %v2832_v46, %v8756_v36  ;;  %v8757_v60 = vmax.f32 %v6417_v22, 0.0  ;;  %v8765_v46 = vmax.f32 %v8764_v49, 0.0  ;;  %v8772_v20 = vld [vmem:[#allocation28_spill] sm:$0xff] }
 0x743   : > { %v2796_v12 = vadd.f32 %v2795_v55, %v8754_v9  ;;  %v3135_v62 = vadd.f32 %v3134_v24, %v8761_v6  ;;  %v8763_v55 = vmax.f32 %v8762_v4, 0.0  ;;  %v8767_v9 = vmax.f32 %v8766_v33, 0.0  ;;  %v8774_v4 = vld [vmem:[#allocation152_spill] sm:$0xff]  ;;  %v8778_v33 = vld [vmem:[#allocation199_spill] sm:$0xff] }
 0x744   : > { %v2455_v26 = vadd.f32 %v2454_v37, %v8757_v60  ;;  %v2492_v56 = vadd.f32 %v2491_v32, %v8759_v57  ;;  %v3368_v36 = vadd.f32 %v8709_v39, %v7041_v0  ;;  %v3369_v22 = vadd.f32 %v8710_v21, %v7041_v0  ;;  %v8768_v37 = vld [vmem:[#allocation194_spill] sm:$0xff]  ;;  %v8776_v49 = vld [vmem:[#allocation176_spill] sm:$0xff] }
 0x745   : > { %v3172_v11 = vadd.f32 %v3171_v43, %v8763_v55  ;;  %v2797_v16 = vadd.f32 %v2796_v12, %v8765_v46  ;;  %v2834_v15 = vadd.f32 %v2833_v29, %v8767_v9  ;;  %v8769_v32 = vmax.f32 %v8768_v37, 0.0  ;;  %v8780_v37 = vld [vmem:[#allocation59_spill] sm:$0xff] }
 0x746   : > { %v8771_v24 = vmax.f32 %v8770_v44, 0.0  ;;  %v8773_v43 = vmax.f32 %v8772_v20, 0.0  ;;  %v8775_v12 = vmax.f32 %v8774_v4, 0.0  ;;  %v8777_v29 = vmax.f32 %v8776_v49, 0.0  ;;  %v8782_v44 = vld [vmem:[#allocation167_spill] sm:$0xff]  ;;  %v8786_v4 = vld [vmem:[#allocation86_spill] sm:$0xff] }
 0x747   : > { %v2456_v60 = vadd.f32 %v2455_v26, %v8769_v32  ;;  %v8779_v9 = vmax.f32 %v8778_v33, 0.0  ;;  %v3432_v30 = vmax.f32 %v3368_v36, 0.0  ;;  %v3433_v0 = vmax.f32 %v3369_v22, 0.0  ;;  %v8784_v20 = vld [vmem:[#allocation159_spill] sm:$0xff]  ;;  %v8788_v22 = vld [vmem:[#allocation29_spill] sm:$0xff]  ;;  %v8789_v49 = vld [vmem:[#allocation186_spill] sm:$0xff] }
 0x748   : > { %v2493_v57 = vadd.f32 %v2492_v56, %v8771_v24  ;;  %v3136_v6 = vadd.f32 %v3135_v62, %v8773_v43  ;;  %v3173_v55 = vadd.f32 %v3172_v11, %v8775_v12  ;;  %v2798_v46 = vadd.f32 %v2797_v16, %v8777_v29  ;;  %v8794_v33 = vld [vmem:[#allocation171_spill] sm:$0xff] }
 0x749   : > { %v2835_v40 = vadd.f32 %v2834_v15, %v8779_v9  ;;  %v2457_v26 = vadd.f32 %v2456_v60, %v2424_v7  ;;  %v8781_v62 = vmax.f32 %v8780_v37, 0.0  ;;  %v8783_v11 = vmax.f32 %v8782_v44, 0.0  ;;  %v7209_v7 = vpop.permute.xlu1 %3303  ;;  %v8790_v60 = vld [vmem:[#allocation56_spill] sm:$0xff] }
 0x74a   : > { %v2494_v56 = vadd.f32 %v2493_v57, %v2425_v18  ;;  %v8785_v16 = vmax.f32 %v8784_v20, 0.0  ;;  %v8787_v15 = vmax.f32 %v8786_v4, 0.0  ;;  %v3480_v12 = vadd.f32 %v8788_v22, %v3432_v30  ;;  %v8796_v30 = vld [vmem:[#allocation161_spill] sm:$0xff] }
 0x74b   : > { %v3137_v32 = vadd.f32 %v3136_v6, %v8781_v62  ;;  %v3174_v24 = vadd.f32 %v3173_v55, %v8783_v11  ;;  %v3517_v59 = vadd.f32 %v8789_v49, %v3433_v0  ;;  %v2458_v31 = vadd.f32 %v2457_v26, %v2426_v52  ;;  %v8792_v55 = vld [vmem:[#allocation63_spill] sm:$0xff]  ;;  %v8798_v62 = vld [vmem:[#allocation130_spill] sm:$0xff]  ;;  %v8808_v49 = vld [vmem:[#allocation61_spill] sm:$0xff] }
 0x74c   : > { %v2799_v43 = vadd.f32 %v2798_v46, %v8785_v16  ;;  %v2836_v36 = vadd.f32 %v2835_v40, %v8787_v15  ;;  %v2495_v18 = vadd.f32 %v2494_v56, %v2427_v5  ;;  %v8791_v57 = vmax.f32 %v8790_v60, 0.0  ;;  %v8802_v56 = vld [vmem:[#allocation91_spill] sm:$0xff]  ;;  %v8806_v15 = vld [vmem:[#allocation142_spill] sm:$0xff] }
 0x74d   : > { %v8793_v29 = vmax.f32 %v8792_v55, 0.0  ;;  %v8795_v40 = vmax.f32 %v8794_v33, 0.0  ;;  %v8797_v37 = vmax.f32 %v8796_v30, 0.0  ;;  %v8799_v44 = vmax.f32 %v8798_v62, 0.0  ;;  %v8804_v16 = vld [vmem:[#allocation179_spill] sm:$0xff]  ;;  %v8810_v33 = vld [vmem:[#allocation93_spill] sm:$0xff] }
 0x74e   : > { %v3138_v6 = vadd.f32 %v3137_v32, %v8791_v57  ;;  %v8801_v52 = vmax.f32 %v8800_v23, 0.0  ;;  %v2459_v42 = vrot.slane %v2458_v31, 4  ;;  %v2496_v5 = vrot.slane %v2495_v18, 4 }
 0x74f   : > { %v3175_v46 = vadd.f32 %v3174_v24, %v8793_v29  ;;  %v2800_v9 = vadd.f32 %v2799_v43, %v8795_v40  ;;  %v2837_v0 = vadd.f32 %v2836_v36, %v8797_v37  ;;  %v3481_v11 = vadd.f32 %v3480_v12, %v8799_v44  ;;  %v8816_v44 = vld [vmem:[#allocation204_spill] sm:$0xff] }
 0x750   : > { %v3518_v26 = vadd.f32 %v3517_v59, %v8801_v52  ;;  %v8803_v20 = vmax.f32 %v8802_v56, 0.0  ;;  %v8805_v4 = vmax.f32 %v8804_v16, 0.0  ;;  %v8807_v22 = vmax.f32 %v8806_v15, 0.0  ;;  %v3316_v59 = vpop.permute.xlu0 %3315 }
 0x751   : > { %v8809_v60 = vmax.f32 %v8808_v49, 0.0  ;;  %v7236_v57 = vadd.f32 %v8709_v39, %v3308_v2  ;;  %v7239_v12 = vadd.f32 %v8710_v21, %v3308_v2  ;;  %v2460_v55 = vadd.f32 %v2459_v42, %v2458_v31  ;;  %v3312_v31 = vpop.permute.xlu1 %3311 }
 0x752   : > { %v3139_v32 = vadd.f32 %v3138_v6, %v8803_v20  ;;  %v3176_v24 = vadd.f32 %v3175_v46, %v8805_v4  ;;  %v2801_v43 = vadd.f32 %v2800_v9, %v8807_v22  ;;  %v2497_v29 = vadd.f32 %v2496_v5, %v2495_v18  ;;  %v8812_v46 = vld [vmem:[#allocation88_spill] sm:$0xff]  ;;  %v8814_v9 = vld [vmem:[#allocation203_spill] sm:$0xff]  ;;  %v8818_v4 = vld [vmem:[#allocation121_spill] sm:$0xff] }
 0x753   : > { %v2838_v36 = vadd.f32 %v2837_v0, %v8809_v60  ;;  %v8811_v6 = vmax.f32 %v8810_v33, 0.0  ;;  %v8813_v30 = vmax.f32 %v8812_v46, 0.0  ;;  %v8815_v62 = vmax.f32 %v8814_v9, 0.0  ;;  %v8820_v22 = vld [vmem:[#allocation31_spill] sm:$0xff]  ;;  %v8826_v9 = vld [vmem:[#allocation153_spill] sm:$0xff] }
 0x754   : > { %v8817_v23 = vmax.f32 %v8816_v44, 0.0  ;;  %v3454_v2 = vmax.f32 %v7236_v57, 0.0  ;;  %v3455_v56 = vmax.f32 %v7239_v12, 0.0  ;;  %v2461_v18 = vrot.slane %v2460_v55, 2 }
 0x755   : > { %v7243_v40 = vadd.f32 %v3139_v32, %v8811_v6  ;;  %v7247_v37 = vadd.f32 %v3176_v24, %v8813_v30  ;;  %v2802_v0 = vadd.f32 %v2801_v43, %v8815_v62  ;;  %v2498_v42 = vrot.slane %v2497_v29, 2 }
 0x756   : > { %v2839_v52 = vadd.f32 %v2838_v36, %v8817_v23  ;;  %v3376_v5 = vadd.f32 %v8709_v39, %v7075_v14  ;;  %v3377_v20 = vadd.f32 %v8710_v21, %v7075_v14  ;;  %v8819_v24 = vmax.f32 %v8818_v4, 0.0 }
 0x757   : > { %v2803_v32 = vadd.f32 %v2802_v0, %v2770_v48  ;;  %v8821_v43 = vmax.f32 %v8820_v22, 0.0  ;;  %v7267_v60 = vadd.f32 %v2461_v18, %v2460_v55  ;;  %v7269_v36 = vadd.f32 %v2498_v42, %v2497_v29  ;;  %v3320_v0 = vpop.permute.xlu0 %3319  ;;  %v2978_v18 = vpop.permute.xlu1 %2977 }
 0x758   : > { %v2840_v16 = vadd.f32 %v2839_v52, %v2771_v10  ;;  %v3482_v15 = vadd.f32 %v3481_v11, %v8819_v24  ;;  %v3440_v33 = vmax.f32 %v3376_v5, 0.0  ;;  %v3441_v6 = vmax.f32 %v3377_v20, 0.0 }
 0x759   : > { %v3519_v49 = vadd.f32 %v3518_v26, %v8821_v43  ;;  %v8822_v14 = vmax.f32 %v7008_v28, 0.0  ;;  %v8825_v10 = vmax.f32 %v8824_v54, 0.0  ;;  %v8827_v11 = vmax.f32 %v8826_v9, 0.0 }
 0x75a   : > { %v2841_v48 = vadd.f32 %v2840_v16, %v8823_v17  ;;  %v2463_v26 = vrot.slane %v7267_v60, 1  ;;  %v2500_v55 = vrot.slane %v7269_v36, 1  ;;  %v7282_v29 = vadd.f32 %v8709_v39, %v3316_v59 }
 0x75b   : > { %v2804_v46 = vadd.f32 %v2803_v32, %v8822_v14  ;;  %v3483_v30 = vadd.f32 %v3482_v15, %v8825_v10  ;;  %v3520_v62 = vadd.f32 %v3519_v49, %v8827_v11  ;;  %v7285_v28 = vadd.f32 %v8710_v21, %v3316_v59 }
 0x75c   : > { %v2842_v47 = vrot.slane %v2841_v48, 4  ;;  %v3458_v42 = vmax.f32 %v7282_v29, 0.0  ;;  %v3380_v20 = vadd.f32 %v8709_v39, %v7123_v13  ;;  %v3381_v32 = vadd.f32 %v8710_v21, %v7123_v13 }
 0x75d   : > { %v2805_v44 = vrot.slane %v2804_v46, 4  ;;  %v3484_v23 = vadd.f32 %v3483_v30, %v3440_v33  ;;  %v3521_v52 = vadd.f32 %v3520_v62, %v3441_v6  ;;  %v3459_v5 = vmax.f32 %v7285_v28, 0.0 }
 0x75e   : > { %v2843_v4 = vadd.f32 %v2842_v47, %v2841_v48  ;;  %v8828_v59 = vmax.f32 %v7082_v38, 0.0  ;;  %v8829_v15 = vmax.f32 %v7085_v19, 0.0  ;;  %v3444_v43 = vmax.f32 %v3380_v20, 0.0 }
 0x75f   : > { %v2806_v16 = vadd.f32 %v2805_v44, %v2804_v46  ;;  %v3445_v49 = vmax.f32 %v3381_v32, 0.0  ;;  %v7298_v33 = vadd.f32 %v8709_v39, %v3320_v0  ;;  %v7301_v6 = vadd.f32 %v8710_v21, %v3320_v0  ;;  %v3324_v46 = vpop.permute.xlu0 %3323  ;;  %v2982_v0 = vpop.permute.xlu1 %2981 }
 0x760   : > { %v3485_v24 = vadd.f32 %v3484_v23, %v8828_v59  ;;  %v3522_v22 = vadd.f32 %v3521_v52, %v8829_v15  ;;  %v2844_v17 = vrot.slane %v2843_v4, 2  ;;  %v3384_v13 = vadd.f32 %v8709_v39, %v7165_v8 }
 0x761   : > { %v2807_v14 = vrot.slane %v2806_v16, 2  ;;  %v3385_v38 = vadd.f32 %v8710_v21, %v7165_v8  ;;  %v3460_v54 = vmax.f32 %v7298_v33, 0.0  ;;  %v3461_v10 = vmax.f32 %v7301_v6, 0.0 }
 0x762   : > { %v3486_v48 = vadd.f32 %v3485_v24, %v3444_v43  ;;  %v3523_v19 = vadd.f32 %v3522_v22, %v3445_v49  ;;  %v7311_v9 = vadd.f32 %v2844_v17, %v2843_v4  ;;  %v3448_v11 = vmax.f32 %v3384_v13, 0.0 }
 0x763   : > { %v7309_v30 = vadd.f32 %v2807_v14, %v2806_v16  ;;  %v3449_v62 = vmax.f32 %v3385_v38, 0.0  ;;  %v8830_v44 = vmax.f32 %v7118_v1, 0.0  ;;  %v8831_v23 = vmax.f32 %v7121_v3, 0.0 }
 0x764   : > { %v7318_v52 = vadd.f32 %v8709_v39, %v3324_v46  ;;  %v7321_v20 = vadd.f32 %v8710_v21, %v3324_v46  ;;  %v3388_v32 = vadd.f32 %v8709_v39, %v7209_v7  ;;  %v3389_v16 = vadd.f32 %v8710_v21, %v7209_v7 }
 0x765   : > { %v3487_v47 = vadd.f32 %v3486_v48, %v8830_v44  ;;  %v3524_v8 = vadd.f32 %v3523_v19, %v8831_v23  ;;  %v3392_v4 = vadd.f32 %v8709_v39, %v3312_v31  ;;  %v3393_v1 = vadd.f32 %v8710_v21, %v3312_v31  ;;  %v8834_v48 = vld [vmem:[#allocation160_spill] sm:$0xff]  ;;  %v3328_v23 = vpop.permute.xlu1 %3327 }
 0x766   : > { %v3462_v3 = vmax.f32 %v7318_v52, 0.0  ;;  %v3463_v15 = vmax.f32 %v7321_v20, 0.0  ;;  %v3452_v22 = vmax.f32 %v3388_v32, 0.0  ;;  %v3453_v43 = vmax.f32 %v3389_v16, 0.0  ;;  %v8838_v32 = vld [vmem:[#allocation13_spill] sm:$0xff] }
 0x767   : > { %v3488_v59 = vadd.f32 %v3487_v47, %v3448_v11  ;;  %v3525_v24 = vadd.f32 %v3524_v8, %v3449_v62  ;;  %v3456_v49 = vmax.f32 %v3392_v4, 0.0  ;;  %v3457_v14 = vmax.f32 %v3393_v1, 0.0  ;;  %v8836_v62 = vld [vmem:[#allocation183_spill] sm:$0xff]  ;;  %v8840_v4 = vld [vmem:[#allocation36_spill] sm:$0xff] }
 0x768   : > { %v8832_v17 = vmax.f32 %v7146_v63, 0.0  ;;  %v8833_v38 = vmax.f32 %v7149_v27, 0.0  ;;  %v7336_v46 = vadd.f32 %v8681_v50, %v2978_v18  ;;  %v7339_v31 = vadd.f32 %v8682_v58, %v2978_v18 }
 0x769   : > { %v8835_v19 = vmax.f32 %v8834_v48, 0.0  ;;  %v8837_v44 = vmax.f32 %v8836_v62, 0.0  ;;  %v7348_v63 = vadd.f32 %v8681_v50, %v2982_v0  ;;  %v7351_v27 = vadd.f32 %v8682_v58, %v2982_v0 }
 0x76a   : > { %v3489_v13 = vadd.f32 %v3488_v59, %v8832_v17  ;;  %v3526_v7 = vadd.f32 %v3525_v24, %v8833_v38  ;;  %v3116_v18 = vmax.f32 %v7336_v46, 0.0  ;;  %v3117_v20 = vmax.f32 %v7339_v31, 0.0  ;;  %v8844_v38 = vld [vmem:[#allocation205_spill] sm:$0xff]  ;;  %v8846_v31 = vld [vmem:[#allocation8_spill] sm:$0xff] }
 0x76b   : > { %v3141_v11 = vadd.f32 %v7243_v40, %v8835_v19  ;;  %v3178_v47 = vadd.f32 %v7247_v37, %v8837_v44  ;;  %v8839_v16 = vmax.f32 %v8838_v32, 0.0  ;;  %v8841_v1 = vmax.f32 %v8840_v4, 0.0 }
 0x76c   : > { %v3490_v8 = vadd.f32 %v3489_v13, %v3452_v22  ;;  %v3527_v52 = vadd.f32 %v3526_v7, %v3453_v43  ;;  %v3118_v37 = vmax.f32 %v7348_v63, 0.0  ;;  %v3119_v50 = vmax.f32 %v7351_v27, 0.0  ;;  %v8842_v43 = vld [vmem:[#allocation109_spill] sm:$0xff] }
 0x76d   : > { %v3142_v40 = vadd.f32 %v3141_v11, %v8839_v16  ;;  %v3179_v59 = vadd.f32 %v3178_v47, %v8841_v1  ;;  %v3400_v24 = vadd.f32 %v8709_v39, %v3328_v23  ;;  %v3401_v22 = vadd.f32 %v8710_v21, %v3328_v23  ;;  %v8847_v11 = vld [vmem:[#allocation90_spill] sm:$0xff] }
 0x76e   : > { %v3491_v58 = vadd.f32 %v3490_v8, %v3454_v2  ;;  %v3528_v0 = vadd.f32 %v3527_v52, %v3455_v56  ;;  %v8843_v17 = vmax.f32 %v8842_v43, 0.0  ;;  %v8845_v7 = vmax.f32 %v8844_v38, 0.0  ;;  %v8849_v21 = vld [vmem:[#allocation202_spill] sm:$0xff]  ;;  %v8852_v8 = vld [vmem:[#allocation51_spill] sm:$0xff] }
 0x76f   : > { %v1124_v48 = vadd.f32 %v6892_v61, %v8846_v31  ;;  %v1125_v57 = vadd.f32 %v6895_v45, %v8846_v31  ;;  %v3464_v12 = vmax.f32 %v3400_v24, 0.0  ;;  %v3465_v56 = vmax.f32 %v3401_v22, 0.0  ;;  %v8854_v16 = vld [vmem:[#allocation98_spill] sm:$0xff]  ;;  %v8861_v22 = vld [vmem:[#allocation212_spill] sm:$0xff] }
 0x770   : > { %v3143_v13 = vadd.f32 %v3142_v40, %v8843_v17  ;;  %v3180_v46 = vadd.f32 %v3179_v59, %v8845_v7  ;;  %v3492_v2 = vadd.f32 %v3491_v58, %v3456_v49  ;;  %v3529_v19 = vadd.f32 %v3528_v0, %v3457_v14  ;;  %v8851_v49 = vld [vmem:[#allocation4_spill] sm:$0xff]  ;;  %v8859_v58 = vld [vmem:[#allocation95_spill] sm:$0xff] }
 0x771   : > { %v8848_v39 = vmax.f32 %v8847_v11, 0.0  ;;  %v8850_v44 = vmax.f32 %v8849_v21, 0.0  ;;  %v1470_v63 = vadd.f32 %v6942_v34, %v1124_v48  ;;  %v1471_v27 = vadd.f32 %v6945_v41, %v1125_v57  ;;  %v8856_v41 = vld [vmem:[#allocation5_spill] sm:$0xff] }
 0x772   : > { %v3493_v61 = vadd.f32 %v3492_v2, %v3458_v42  ;;  %v3530_v45 = vadd.f32 %v3529_v19, %v3459_v5  ;;  %v1814_v14 = vmul.f32 %v8851_v49, %v6987_v53  ;;  %v1815_v23 = vmul.f32 %v8851_v49, %v6989_v35  ;;  %v8857_v5 = vld [vmem:[#allocation174_spill] sm:$0xff]  ;;  %v8868_v2 = vld [vmem:[#allocation209_spill] sm:$0xff] }
 0x773   : > { %v3144_v62 = vadd.f32 %v3143_v13, %v8848_v39  ;;  %v3181_v47 = vadd.f32 %v3180_v46, %v8850_v44  ;;  %v8853_v52 = vmax.f32 %v8852_v8, 0.0  ;;  %v8855_v40 = vmax.f32 %v8854_v16, 0.0  ;;  %v8863_v13 = vld [vmem:[#allocation213_spill] sm:$0xff]  ;;  %v8865_v46 = vld [vmem:[#allocation6_spill] sm:$0xff] }
 0x774   : > { %v2160_v4 = vmul.f32 %v8856_v41, %v7097_v51  ;;  %v2161_v29 = vmul.f32 %v8856_v41, %v7099_v25  ;;  %v3494_v28 = vadd.f32 %v3493_v61, %v3460_v54  ;;  %v3531_v53 = vadd.f32 %v3530_v45, %v3461_v10  ;;  %v8870_v45 = vld [vmem:[#allocation7_spill] sm:$0xff] }
 0x775   : > { %v3145_v32 = vadd.f32 %v3144_v62, %v8853_v52  ;;  %v3182_v34 = vadd.f32 %v3181_v47, %v8855_v40  ;;  %v1816_v42 = vadd.f32 %v1814_v14, %v1470_v63  ;;  %v1817_v35 = vadd.f32 %v1815_v23, %v1471_v27 }
 0x776   : > { %v8858_v1 = vmax.f32 %v8857_v5, 0.0  ;;  %v8860_v0 = vmax.f32 %v8859_v58, 0.0  ;;  %v2464_v51 = vadd.f32 %v2463_v26, %v7267_v60  ;;  %v2501_v25 = vadd.f32 %v2500_v55, %v7269_v36  ;;  %v8866_v55 = vld [vmem:[#allocation208_spill] sm:$0xff] }
 0x777   : > { %v3495_v33 = vadd.f32 %v3494_v28, %v3462_v3  ;;  %v3532_v54 = vadd.f32 %v3531_v53, %v3463_v15  ;;  %v2162_v6 = vadd.f32 %v2160_v4, %v1816_v42  ;;  %v2163_v10 = vadd.f32 %v2161_v29, %v1817_v35 }
 0x778   : > { %v3146_v59 = vadd.f32 %v3145_v32, %v8858_v1  ;;  %v3183_v24 = vadd.f32 %v3182_v34, %v8860_v0  ;;  %v8862_v43 = vmax.f32 %v8861_v22, 0.0  ;;  %v8864_v38 = vmax.f32 %v8863_v13, 0.0 }
 0x779   : > { %v2506_v31 = vmul.f32 %v8865_v46, %v2464_v51  ;;  %v2507_v48 = vmul.f32 %v8865_v46, %v2501_v25  ;;  %v3496_v57 = vadd.f32 %v3495_v33, %v3464_v12  ;;  %v3533_v60 = vadd.f32 %v3532_v54, %v3465_v56 }
 0x77a   : > { %v3147_v17 = vadd.f32 %v3146_v59, %v8862_v43  ;;  %v3184_v7 = vadd.f32 %v3183_v24, %v8864_v38  ;;  %v2809_v26 = vrot.slane %v7309_v30, 1  ;;  %v2846_v36 = vrot.slane %v7311_v9, 1  ;;  %v3196_v59 = vpop.permute.xlu0 %3195  ;;  %v3542_v24 = vpop.permute.xlu1 %3541 }
 0x77b   : > { %v8867_v3 = vmax.f32 %v8866_v55, 0.0  ;;  %v8869_v19 = vmax.f32 %v8868_v2, 0.0  ;;  %v2508_v39 = vadd.f32 %v2506_v31, %v2162_v6  ;;  %v2509_v62 = vadd.f32 %v2507_v48, %v2163_v10 }
 0x77c   : > { %v3497_v21 = vrot.slane %v3496_v57, 4  ;;  %v3534_v44 = vrot.slane %v3533_v60, 4  ;;  %v2810_v47 = vadd.f32 %v2809_v26, %v7309_v30  ;;  %v2847_v63 = vadd.f32 %v2846_v36, %v7311_v9 }
 0x77d   : > { %v3148_v15 = vadd.f32 %v3147_v17, %v8867_v3  ;;  %v3185_v11 = vadd.f32 %v3184_v7, %v8869_v19 }
 0x77e   : > { %v3498_v27 = vadd.f32 %v3497_v21, %v3496_v57  ;;  %v3535_v61 = vadd.f32 %v3534_v44, %v3533_v60  ;;  %v2852_v49 = vmul.f32 %v8870_v45, %v2810_v47  ;;  %v2853_v14 = vmul.f32 %v8870_v45, %v2847_v63 }
 0x77f   : > { %v3149_v12 = vadd.f32 %v3148_v15, %v3116_v18  ;;  %v3186_v56 = vadd.f32 %v3185_v11, %v3117_v20 }
 0x780   : > { %v3499_v52 = vrot.slane %v3498_v27, 2  ;;  %v3536_v32 = vrot.slane %v3535_v61, 2  ;;  %v2854_v16 = vadd.f32 %v2852_v49, %v2508_v39  ;;  %v2855_v40 = vadd.f32 %v2853_v14, %v2509_v62 }
 0x781   : > { %v3150_v23 = vadd.f32 %v3149_v12, %v3118_v37  ;;  %v3187_v8 = vadd.f32 %v3186_v56, %v3119_v50 }
 0x782   : > { %v3500_v4 = vadd.f32 %v3499_v52, %v3498_v27  ;;  %v3537_v30 = vadd.f32 %v3536_v32, %v3535_v61 }
 0x783   : > { %v3151_v34 = vrot.slane %v3150_v23, 4  ;;  %v3188_v41 = vrot.slane %v3187_v8, 4 }
 0x784   : > { %v3501_v18 = vrot.slane %v3500_v4, 1  ;;  %v3538_v20 = vrot.slane %v3537_v30, 1 }
 0x785   : > { %v3152_v29 = vadd.f32 %v3151_v34, %v3150_v23  ;;  %v3189_v9 = vadd.f32 %v3188_v41, %v3187_v8 }
 0x786   : > { %v3502_v5 = vadd.f32 %v3501_v18, %v3500_v4  ;;  %v3539_v37 = vadd.f32 %v3538_v20, %v3537_v30 }
 0x787   : > { %v3153_v28 = vrot.slane %v3152_v29, 2  ;;  %v3190_v53 = vrot.slane %v3189_v9, 2 }
 0x788   : > { %v3544_v51 = vmul.f32 %v3542_v24, %v3502_v5  ;;  %v3545_v25 = vmul.f32 %v3542_v24, %v3539_v37 }
 0x789   : > { %v3154_v42 = vadd.f32 %v3153_v28, %v3152_v29  ;;  %v3191_v35 = vadd.f32 %v3190_v53, %v3189_v9 }
 0x78b   : > { %v3155_v50 = vrot.slane %v3154_v42, 1  ;;  %v3192_v1 = vrot.slane %v3191_v35, 1 }
 0x78d   : > { %v3156_v58 = vadd.f32 %v3155_v50, %v3154_v42  ;;  %v3193_v0 = vadd.f32 %v3192_v1, %v3191_v35 }
 0x78f   : > { %v3198_v33 = vmul.f32 %v3196_v59, %v3156_v58  ;;  %v3199_v54 = vmul.f32 %v3196_v59, %v3193_v0 }
 0x791   : > { %v3200_v6 = vadd.f32 %v3198_v33, %v2854_v16  ;;  %v3201_v10 = vadd.f32 %v3199_v54, %v2855_v40 }
 0x793   : > { %v3546_v22 = vadd.f32 %v3544_v51, %v3200_v6  ;;  %v3547_v43 = vadd.f32 %v3545_v25, %v3201_v10 }
 0x795   : > { %3548 = vst [vmem:[%s325_s26] sm:$0xff] %v3546_v22  ;;  %3549 = vst [vmem:[%s325_s26 + $0x8] sm:$0xff] %v3547_v43 }
 0x796 PF: > { %s18_s27 = sadd.s32 1, %s3825_s27  }
 0x797   : > { %p15_p4 = scmp.ge.s32.totalorder %s18_s27, 4  }
 0x799   :  { %17 = sbr.rel (!%p15_p4) target bundleno = 1 (0x1), region = 85 }

</bundles_post_ra>
